<compile_context>
chip_gen: v5e
topology: v5e:2x2
jax: 0.10.0
libtpu: 0.0.40
codegen_flags: <defaults>
</compile_context>

<pallas_src>
import functools

import jax
import jax.numpy as jnp
from jax import lax
from jax.experimental import pallas as pl
from jax.experimental.pallas import tpu as pltpu

# f32 by default for exact parity with the f32 reference; set to jnp.bfloat16 for
# ~2x MXU throughput (with f32 accumulation) once the matmuls dominate.
MATMUL_DTYPE = jnp.float32

VMEM = pl.BlockSpec(memory_space=pltpu.MemorySpace.VMEM)
SMEM = pl.BlockSpec(memory_space=pltpu.MemorySpace.SMEM)


# ----------------------------------------------------------------------------
# Single fused kernel: conv1 -> conv2 -> fc1 -> heads -> CE x2 + SupCon
# ----------------------------------------------------------------------------
def _ddlearn_fused_kernel(x_ref, w1_ref, b1_ref, w2_ref, b2_ref,
                          v1_ref, fb1_ref, hdw_ref, hdb_ref,
                          act_col_ref, aug_col_ref, act_row_ref,
                          logits_ref, losses_ref, *,
                          b2, hp2, k, n_act, n_aug,
                          temperature, base_temperature, mm_dtype):
    f32 = jnp.float32
    r = b2 * hp2                                   # rows carried at every W position

    def conv_bn_relu_pool(a, w_ref_, b_ref_, cin, cout, wcur):
        """a: (wcur, r, cin).  w_ref_: (K*cin, cout), rows ordered (tap, cin).
        Conv(1,K) + folded-BN bias + ReLU + MaxPool((1,2), stride 2) over W."""
        wout = wcur - k + 1
        wp = (wout - 2) // 2 + 1
        a2 = a.reshape(wcur * r, cin)              # merge leading dims (r % 8 == 0)
        acc = jnp.zeros((wout * r, cout), f32)
        for t in range(k):                         # in-kernel im2col: K shifted slices
            at = a2[t * r:(t + wout) * r, :]       # rows (j+t)*r .. for every output j
            wt = w_ref_[t * cin:(t + 1) * cin, :]
            if cin == 1:
                # contraction depth 1: keep it off the MXU (pure VPU broadcast FMA)
                acc = acc + at * wt
            else:
                acc = acc + jnp.dot(at.astype(mm_dtype), wt.astype(mm_dtype),
                                    preferred_element_type=f32)
        z = jnp.maximum(acc + b_ref_[...], 0.0)    # folded-BN bias + ReLU
        # rows are ordered (w_out, r): fold W into (wp, 2*r) and max the two halves
        z3 = z[:2 * wp * r, :].reshape(wp, 2 * r, cout)
        return jnp.maximum(z3[:, :r, :], z3[:, r:, :])          # (wp, r, cout)

    cin = x_ref.shape[-1]
    c1 = w1_ref.shape[-1]
    c2 = w2_ref.shape[-1]
    nf = v1_ref.shape[-1]
    w_in = x_ref.shape[0]

    x = x_ref[...].astype(f32)                                   # (W, r, Cin)
    y1 = conv_bn_relu_pool(x, w1_ref, b1_ref, cin, c1, w_in)     # (Wp1, r, C1)
    y2 = conv_bn_relu_pool(y1, w2_ref, b2_ref, c1, c2, y1.shape[0])   # (Wp2, r, C2)
    wp2 = y2.shape[0]

    # fc1 (+ReLU).  torch flattens the conv output as (c2, h2, w2); that permutation is
    # folded into v1's row order (w2, h2, c2), so this is a plain accumulation of
    # (2B, C2) @ (C2, F) blocks with zero activation transposes.
    feat_pre = jnp.zeros((b2, nf), f32)
    for jw in range(wp2):
        for jh in range(hp2):
            blk = y2[jw, jh * b2:(jh + 1) * b2, :]                        # (2B, C2)
            v = v1_ref[(jw * hp2 + jh) * c2:(jw * hp2 + jh + 1) * c2, :]  # (C2, F)
            feat_pre = feat_pre + jnp.dot(blk.astype(mm_dtype), v.astype(mm_dtype),
                                          preferred_element_type=f32)
    feat = jnp.maximum(feat_pre + fb1_ref[...], 0.0)                      # (2B, F)

    # both classifier heads as one matmul; act head cols [0,n_act), aug head after it.
    logits = jnp.dot(feat.astype(mm_dtype), hdw_ref[...].astype(mm_dtype),
                     preferred_element_type=f32) + hdb_ref[...]           # (2B, n_tot)
    logits_ref[...] = logits

    cols = lax.broadcasted_iota(jnp.int32, logits.shape, 1)

    def masked_ce(lab_col, lo, hi):
        # CrossEntropyLoss(reduction='mean') over columns [lo, hi) of `logits`.
        valid = jnp.logical_and(cols >= lo, cols < hi)
        lg = jnp.where(valid, logits, jnp.float32(-1e30))
        m = jnp.max(lg, axis=1, keepdims=True)
        lse = jnp.log(jnp.sum(jnp.exp(lg - m), axis=1, keepdims=True)) + m
        onehot = (cols == (lab_col + lo)).astype(f32)
        picked = jnp.sum(logits * onehot, axis=1, keepdims=True)
        return jnp.mean(lse - picked)

    losses_ref[0] = masked_ce(act_col_ref[...], 0, n_act)                 # loss_c
    losses_ref[1] = masked_ce(aug_col_ref[...], n_act, n_act + n_aug)     # loss_selfsup

    # SupConLoss_m, contrast_mode='all': anchors == all 2B contrast features
    # [feat_ori; feat_aug]; positive mask from cat([actlabel_ori, actlabel_aug]).
    inv_norm = lax.rsqrt(jnp.sum(feat * feat, axis=1, keepdims=True) + 1e-12)
    fn = feat * inv_norm
    sim = lax.dot_general(fn, fn, (((1,), (1,)), ((), ())),
                          preferred_element_type=f32) * (1.0 / temperature)
    lg = sim - jnp.max(sim, axis=1, keepdims=True)
    n = sim.shape[0]
    rows_i = lax.broadcasted_iota(jnp.int32, (n, n), 0)
    cols_i = lax.broadcasted_iota(jnp.int32, (n, n), 1)
    self_mask = (rows_i != cols_i).astype(f32)                            # drop self
    pos_mask = (act_col_ref[...] == act_row_ref[...]).astype(f32) * self_mask
    exp_lg = jnp.exp(lg) * self_mask
    log_prob = lg - jnp.log(jnp.sum(exp_lg, axis=1, keepdims=True))
    denom = jnp.maximum(jnp.sum(pos_mask, axis=1, keepdims=True), 1.0)    # NaN guard
    mlpp = (jnp.sum(pos_mask * log_prob, axis=1, keepdims=True)
            * pl.reciprocal(denom, approx=True))
    losses_ref[2] = -(temperature / base_temperature) * jnp.mean(mlpp)    # con_loss


# ----------------------------------------------------------------------------
# Wrapper: weight folding / layout plumbing (tiny), one pallas_call
# ----------------------------------------------------------------------------
def _fold_bn(w, b, gamma, beta, mean, var, eps=1e-5):
    """Fold eval-mode BN into a (K*Cin, Cout) conv matrix, rows ordered (tap, cin)."""
    s = gamma / jnp.sqrt(var + eps)
    cout, cin, _, kk = w.shape
    w_km = jnp.transpose(w[:, :, 0, :], (2, 1, 0)) * s            # (K, Cin, Cout)
    b_fold = (b - mean) * s + beta
    return (w_km.reshape(kk * cin, cout).astype(jnp.float32),
            b_fold.reshape(1, cout).astype(jnp.float32))


@jax.jit
def ddlearn_forward(params, x_ori, x_onlyaug, labels):
    actlabel_ori, actlabel_aug, auglabel_ori, auglabel_aug = labels
    n_act = params["act_w"].shape[1]
    n_aug = params["aug_w"].shape[1]

    x_all = jnp.concatenate([x_ori, x_onlyaug], axis=0)           # (2B, Cin, H, W) NCHW
    b2, cin, h, w = x_all.shape
    k = params["conv1_w"].shape[-1]
    c1 = params["conv1_w"].shape[0]
    c2 = params["conv2_w"].shape[0]
    nf = params["fc1_w"].shape[1]

    # conv kernels are (1,K) and both pools stride-2-subsample H, so only rows
    # h = 0, 4, 8, ... survive both stages — select them once, up front.
    hp1 = (h - 1) // 2 + 1
    hp2 = (hp1 - 1) // 2 + 1
    wout1 = w - k + 1
    wp1 = (wout1 - 2) // 2 + 1
    wout2 = wp1 - k + 1
    wp2 = (wout2 - 2) // 2 + 1

    xh = x_all[:, :, ::4, :]                                       # (2B, Cin, Hp2, W)
    # (W, Hp2*2B, Cin): rows independent per (h2, sample); W leading so every conv tap,
    # the pool and the fc1 blocks are contiguous leading-dim slices inside the kernel.
    x_lay = jnp.transpose(xh, (3, 2, 0, 1)).reshape(w, hp2 * b2, cin).astype(jnp.float32)

    w1_mat, b1_fold = _fold_bn(params["conv1_w"], params["conv1_b"], params["bn1_gamma"],
                               params["bn1_beta"], params["bn1_mean"], params["bn1_var"])
    w2_mat, b2_fold = _fold_bn(params["conv2_w"], params["conv2_b"], params["bn2_gamma"],
                               params["bn2_beta"], params["bn2_mean"], params["bn2_var"])

    # fc1 weight rows are torch-ordered (c2, h2, w2); permute once to (w2, h2, c2) so the
    # kernel never transposes/flattens the conv activations.
    v1 = (params["fc1_w"].reshape(c2, hp2, wp2, nf)
          .transpose(2, 1, 0, 3).reshape(wp2 * hp2 * c2, nf).astype(jnp.float32))
    fb1 = params["fc1_b"].reshape(1, nf).astype(jnp.float32)

    hd_w = jnp.concatenate([params["act_w"], params["aug_w"]], axis=1).astype(jnp.float32)
    hd_b = jnp.concatenate([params["act_b"], params["aug_b"]], axis=0).reshape(1, -1)
    hd_b = hd_b.astype(jnp.float32)

    actlabel_true = jnp.concatenate([actlabel_ori, actlabel_aug], axis=0)
    auglabel_true = jnp.concatenate([auglabel_ori, auglabel_aug], axis=0)
    act_col = actlabel_true.reshape(-1, 1).astype(jnp.int32)
    aug_col = auglabel_true.reshape(-1, 1).astype(jnp.int32)
    act_row = actlabel_true.reshape(1, -1).astype(jnp.int32)

    kern = functools.partial(_ddlearn_fused_kernel, b2=b2, hp2=hp2, k=k,
                             n_act=n_act, n_aug=n_aug,
                             temperature=0.07, base_temperature=0.07,
                             mm_dtype=MATMUL_DTYPE)
    logits, losses = pl.pallas_call(
        kern,
        out_shape=(jax.ShapeDtypeStruct((b2, n_act + n_aug), jnp.float32),
                   jax.ShapeDtypeStruct((3,), jnp.float32)),
        in_specs=[VMEM] * 12,
        out_specs=(VMEM, SMEM),
    )(x_lay, w1_mat, b1_fold, w2_mat, b2_fold, v1, fb1, hd_w, hd_b,
      act_col, aug_col, act_row)

    actlabel_p = logits[:, :n_act]
    loss_c = losses[0:1]
    loss_selfsup = losses[1:2]
    con_loss = losses[2:3]
    # TODO(synk): DPLoss (MMD/CORAL) branch not implemented; this mirrors dp == 'no'.
    loss_dp = jnp.zeros((1,), jnp.float32)
    return actlabel_p, loss_c, loss_selfsup, loss_dp, con_loss


# ----------------------------------------------------------------------------
# Parameter init + smoke test
# ----------------------------------------------------------------------------
def init_params(key, *, n_feature, n_act, n_aug, K, c1, c2, fc_in):
    ks = jax.random.split(key, 12)
    return {
        "conv1_w": 0.1 * jax.random.normal(ks[0], (c1, 1, 1, K), jnp.float32),
        "conv1_b": 0.1 * jax.random.normal(ks[1], (c1,), jnp.float32),
        "bn1_gamma": 1.0 + 0.05 * jax.random.normal(ks[2], (c1,), jnp.float32),
        "bn1_beta": 0.05 * jax.random.normal(ks[3], (c1,), jnp.float32),
        "bn1_mean": jnp.zeros((c1,), jnp.float32),
        "bn1_var": jnp.ones((c1,), jnp.float32),
        "conv2_w": 0.1 * jax.random.normal(ks[4], (c2, c1, 1, K), jnp.float32),
        "conv2_b": 0.1 * jax.random.normal(ks[5], (c2,), jnp.float32),
        "bn2_gamma": 1.0 + 0.05 * jax.random.normal(ks[6], (c2,), jnp.float32),
        "bn2_beta": 0.05 * jax.random.normal(ks[7], (c2,), jnp.float32),
        "bn2_mean": jnp.zeros((c2,), jnp.float32),
        "bn2_var": jnp.ones((c2,), jnp.float32),
        "fc1_w": 0.1 * jax.random.normal(ks[8], (fc_in, n_feature), jnp.float32),
        "fc1_b": 0.1 * jax.random.normal(ks[9], (n_feature,), jnp.float32),
        "act_w": 0.1 * jax.random.normal(ks[10], (n_feature, n_act), jnp.float32),
        "act_b": jnp.zeros((n_act,), jnp.float32),
        "aug_w": 0.1 * jax.random.normal(ks[11], (n_feature, n_aug), jnp.float32),
        "aug_b": jnp.zeros((n_aug,), jnp.float32),
    }


if __name__ == "__main__":
    key = jax.random.PRNGKey(0)
    k_x1, k_x2, k_act, k_aug, k_par = jax.random.split(key, 5)

    B, Cin, H, W = 8, 1, 4, 32          # small synthetic sensor window (NCHW)
    K, c1, c2 = 5, 16, 32
    n_feature, n_act, n_aug = 32, 5, 4

    # derive fc_in from the conv/pool arithmetic: conv(1,K) -> pool(1,2)/2 twice
    w1 = W - K + 1; h1 = (H - 1) // 2 + 1; w1 = (w1 - 2) // 2 + 1
    w2 = w1 - K + 1; h2 = (h1 - 1) // 2 + 1; w2 = (w2 - 2) // 2 + 1
    fc_in = c2 * h2 * w2                 # = 160 for these shapes

    params = init_params(k_par, n_feature=n_feature, n_act=n_act, n_aug=n_aug,
                         K=K, c1=c1, c2=c2, fc_in=fc_in)

    x_ori = jax.random.normal(k_x1, (B, Cin, H, W), jnp.float32)
    x_onlyaug = jax.random.normal(k_x2, (B, Cin, H, W), jnp.float32)
    actlabel_ori = jax.random.randint(k_act, (B,), 0, n_act, jnp.int32)
    actlabel_aug = actlabel_ori                           # augmentation keeps activity label
    auglabel_ori = jnp.zeros((B,), jnp.int32)             # "original" augmentation class 0
    auglabel_aug = jax.random.randint(k_aug, (B,), 1, n_aug, jnp.int32)
    labels = (actlabel_ori, actlabel_aug, auglabel_ori, auglabel_aug)

    out = ddlearn_forward(params, x_ori, x_onlyaug, labels)
    jax.block_until_ready(out)
    actlabel_p, loss_c, loss_selfsup, loss_dp, con_loss = out
    assert actlabel_p.shape == (2 * B, n_act)
    assert loss_c.shape == (1,) and loss_selfsup.shape == (1,)
    assert loss_dp.shape == (1,) and con_loss.shape == (1,)
    assert bool(jnp.isfinite(actlabel_p).all())
    assert bool(jnp.isfinite(loss_c)[0]) and bool(jnp.isfinite(loss_selfsup)[0])
    assert bool(jnp.isfinite(con_loss)[0])
    print("KERNEL_OK")
</pallas_src>

<mosaic_0001>
module attributes {stable_mosaic.version = 11 : i64} {
  func.func @_ddlearn_fused_kernel(%arg0: memref<32x16x1xf32, #tpu.memory_space<vmem>>, %arg1: memref<5x16xf32, #tpu.memory_space<vmem>>, %arg2: memref<1x16xf32, #tpu.memory_space<vmem>>, %arg3: memref<80x32xf32, #tpu.memory_space<vmem>>, %arg4: memref<1x32xf32, #tpu.memory_space<vmem>>, %arg5: memref<160x32xf32, #tpu.memory_space<vmem>>, %arg6: memref<1x32xf32, #tpu.memory_space<vmem>>, %arg7: memref<32x9xf32, #tpu.memory_space<vmem>>, %arg8: memref<1x9xf32, #tpu.memory_space<vmem>>, %arg9: memref<16x1xi32, #tpu.memory_space<vmem>>, %arg10: memref<16x1xi32, #tpu.memory_space<vmem>>, %arg11: memref<1x16xi32, #tpu.memory_space<vmem>>, %arg12: memref<16x9xf32, #tpu.memory_space<vmem>>, %arg13: memref<3xf32, #tpu.memory_space<smem>>) attributes {dimension_semantics = [], scalar_prefetch = 0 : i64, scratch_operands = 0 : i64, tpu.core_type = #tpu.core_type<tc>} {
    %c0 = arith.constant 0 : index
    %c0_0 = arith.constant 0 : index
    %c0_1 = arith.constant 0 : index
    %0 = vector.load %arg0[%c0, %c0_0, %c0_1] : memref<32x16x1xf32, #tpu.memory_space<vmem>>, vector<32x16x1xf32>
    %1 = vector.shape_cast %0 : vector<32x16x1xf32> to vector<512x1xf32>
    %cst = arith.constant 0.000000e+00 : f32
    %2 = vector.broadcast %cst : f32 to vector<448x16xf32>
    %3 = vector.extract_strided_slice %1 {offsets = [0, 0], sizes = [448, 1], strides = [1, 1]} : vector<512x1xf32> to vector<448x1xf32>
    %c0_2 = arith.constant 0 : index
    %c0_3 = arith.constant 0 : index
    %4 = vector.load %arg1[%c0_2, %c0_3] : memref<5x16xf32, #tpu.memory_space<vmem>>, vector<1x16xf32>
    %5 = vector.broadcast %3 : vector<448x1xf32> to vector<448x16xf32>
    %6 = vector.broadcast %4 : vector<1x16xf32> to vector<448x16xf32>
    %7 = arith.mulf %5, %6 : vector<448x16xf32>
    %8 = arith.addf %2, %7 : vector<448x16xf32>
    %9 = vector.extract_strided_slice %1 {offsets = [16, 0], sizes = [448, 1], strides = [1, 1]} : vector<512x1xf32> to vector<448x1xf32>
    %c1 = arith.constant 1 : index
    %c0_4 = arith.constant 0 : index
    %10 = vector.load %arg1[%c1, %c0_4] : memref<5x16xf32, #tpu.memory_space<vmem>>, vector<1x16xf32>
    %11 = vector.broadcast %9 : vector<448x1xf32> to vector<448x16xf32>
    %12 = vector.broadcast %10 : vector<1x16xf32> to vector<448x16xf32>
    %13 = arith.mulf %11, %12 : vector<448x16xf32>
    %14 = arith.addf %8, %13 : vector<448x16xf32>
    %15 = vector.extract_strided_slice %1 {offsets = [32, 0], sizes = [448, 1], strides = [1, 1]} : vector<512x1xf32> to vector<448x1xf32>
    %c2 = arith.constant 2 : index
    %c0_5 = arith.constant 0 : index
    %16 = vector.load %arg1[%c2, %c0_5] : memref<5x16xf32, #tpu.memory_space<vmem>>, vector<1x16xf32>
    %17 = vector.broadcast %15 : vector<448x1xf32> to vector<448x16xf32>
    %18 = vector.broadcast %16 : vector<1x16xf32> to vector<448x16xf32>
    %19 = arith.mulf %17, %18 : vector<448x16xf32>
    %20 = arith.addf %14, %19 : vector<448x16xf32>
    %21 = vector.extract_strided_slice %1 {offsets = [48, 0], sizes = [448, 1], strides = [1, 1]} : vector<512x1xf32> to vector<448x1xf32>
    %c3 = arith.constant 3 : index
    %c0_6 = arith.constant 0 : index
    %22 = vector.load %arg1[%c3, %c0_6] : memref<5x16xf32, #tpu.memory_space<vmem>>, vector<1x16xf32>
    %23 = vector.broadcast %21 : vector<448x1xf32> to vector<448x16xf32>
    %24 = vector.broadcast %22 : vector<1x16xf32> to vector<448x16xf32>
    %25 = arith.mulf %23, %24 : vector<448x16xf32>
    %26 = arith.addf %20, %25 : vector<448x16xf32>
    %27 = vector.extract_strided_slice %1 {offsets = [64, 0], sizes = [448, 1], strides = [1, 1]} : vector<512x1xf32> to vector<448x1xf32>
    %c4 = arith.constant 4 : index
    %c0_7 = arith.constant 0 : index
    %28 = vector.load %arg1[%c4, %c0_7] : memref<5x16xf32, #tpu.memory_space<vmem>>, vector<1x16xf32>
    %29 = vector.broadcast %27 : vector<448x1xf32> to vector<448x16xf32>
    %30 = vector.broadcast %28 : vector<1x16xf32> to vector<448x16xf32>
    %31 = arith.mulf %29, %30 : vector<448x16xf32>
    %32 = arith.addf %26, %31 : vector<448x16xf32>
    %c0_8 = arith.constant 0 : index
    %c0_9 = arith.constant 0 : index
    %33 = vector.load %arg2[%c0_8, %c0_9] : memref<1x16xf32, #tpu.memory_space<vmem>>, vector<1x16xf32>
    %34 = vector.broadcast %33 : vector<1x16xf32> to vector<448x16xf32>
    %35 = arith.addf %32, %34 : vector<448x16xf32>
    %cst_10 = arith.constant 0.000000e+00 : f32
    %36 = vector.broadcast %cst_10 : f32 to vector<448x16xf32>
    %37 = arith.maximumf %35, %36 : vector<448x16xf32>
    %38 = vector.shape_cast %37 : vector<448x16xf32> to vector<14x32x16xf32>
    %39 = vector.extract_strided_slice %38 {offsets = [0, 0, 0], sizes = [14, 16, 16], strides = [1, 1, 1]} : vector<14x32x16xf32> to vector<14x16x16xf32>
    %40 = vector.extract_strided_slice %38 {offsets = [0, 16, 0], sizes = [14, 16, 16], strides = [1, 1, 1]} : vector<14x32x16xf32> to vector<14x16x16xf32>
    %41 = arith.maximumf %39, %40 : vector<14x16x16xf32>
    %42 = vector.shape_cast %41 : vector<14x16x16xf32> to vector<224x16xf32>
    %cst_11 = arith.constant 0.000000e+00 : f32
    %43 = vector.broadcast %cst_11 : f32 to vector<160x32xf32>
    %44 = vector.extract_strided_slice %42 {offsets = [0, 0], sizes = [160, 16], strides = [1, 1]} : vector<224x16xf32> to vector<160x16xf32>
    %c0_12 = arith.constant 0 : index
    %c0_13 = arith.constant 0 : index
    %45 = vector.load %arg3[%c0_12, %c0_13] : memref<80x32xf32, #tpu.memory_space<vmem>>, vector<16x32xf32>
    %cst_14 = arith.constant dense<0.000000e+00> : vector<160x32xf32>
    %46 = tpu.matmul %44, %45, %cst_14 {dimension_numbers = #tpu.dot_dimension_numbers<[1], [0], [0], [1], [0, 0, 1, 1], [], []>} : vector<160x16xf32>, vector<16x32xf32>, vector<160x32xf32> -> vector<160x32xf32>
    %47 = arith.addf %43, %46 : vector<160x32xf32>
    %48 = vector.extract_strided_slice %42 {offsets = [16, 0], sizes = [160, 16], strides = [1, 1]} : vector<224x16xf32> to vector<160x16xf32>
    %c16 = arith.constant 16 : index
    %c0_15 = arith.constant 0 : index
    %49 = vector.load %arg3[%c16, %c0_15] : memref<80x32xf32, #tpu.memory_space<vmem>>, vector<16x32xf32>
    %cst_16 = arith.constant dense<0.000000e+00> : vector<160x32xf32>
    %50 = tpu.matmul %48, %49, %cst_16 {dimension_numbers = #tpu.dot_dimension_numbers<[1], [0], [0], [1], [0, 0, 1, 1], [], []>} : vector<160x16xf32>, vector<16x32xf32>, vector<160x32xf32> -> vector<160x32xf32>
    %51 = arith.addf %47, %50 : vector<160x32xf32>
    %52 = vector.extract_strided_slice %42 {offsets = [32, 0], sizes = [160, 16], strides = [1, 1]} : vector<224x16xf32> to vector<160x16xf32>
    %c32 = arith.constant 32 : index
    %c0_17 = arith.constant 0 : index
    %53 = vector.load %arg3[%c32, %c0_17] : memref<80x32xf32, #tpu.memory_space<vmem>>, vector<16x32xf32>
    %cst_18 = arith.constant dense<0.000000e+00> : vector<160x32xf32>
    %54 = tpu.matmul %52, %53, %cst_18 {dimension_numbers = #tpu.dot_dimension_numbers<[1], [0], [0], [1], [0, 0, 1, 1], [], []>} : vector<160x16xf32>, vector<16x32xf32>, vector<160x32xf32> -> vector<160x32xf32>
    %55 = arith.addf %51, %54 : vector<160x32xf32>
    %56 = vector.extract_strided_slice %42 {offsets = [48, 0], sizes = [160, 16], strides = [1, 1]} : vector<224x16xf32> to vector<160x16xf32>
    %c48 = arith.constant 48 : index
    %c0_19 = arith.constant 0 : index
    %57 = vector.load %arg3[%c48, %c0_19] : memref<80x32xf32, #tpu.memory_space<vmem>>, vector<16x32xf32>
    %cst_20 = arith.constant dense<0.000000e+00> : vector<160x32xf32>
    %58 = tpu.matmul %56, %57, %cst_20 {dimension_numbers = #tpu.dot_dimension_numbers<[1], [0], [0], [1], [0, 0, 1, 1], [], []>} : vector<160x16xf32>, vector<16x32xf32>, vector<160x32xf32> -> vector<160x32xf32>
    %59 = arith.addf %55, %58 : vector<160x32xf32>
    %60 = vector.extract_strided_slice %42 {offsets = [64, 0], sizes = [160, 16], strides = [1, 1]} : vector<224x16xf32> to vector<160x16xf32>
    %c64 = arith.constant 64 : index
    %c0_21 = arith.constant 0 : index
    %61 = vector.load %arg3[%c64, %c0_21] : memref<80x32xf32, #tpu.memory_space<vmem>>, vector<16x32xf32>
    %cst_22 = arith.constant dense<0.000000e+00> : vector<160x32xf32>
    %62 = tpu.matmul %60, %61, %cst_22 {dimension_numbers = #tpu.dot_dimension_numbers<[1], [0], [0], [1], [0, 0, 1, 1], [], []>} : vector<160x16xf32>, vector<16x32xf32>, vector<160x32xf32> -> vector<160x32xf32>
    %63 = arith.addf %59, %62 : vector<160x32xf32>
    %c0_23 = arith.constant 0 : index
    %c0_24 = arith.constant 0 : index
    %64 = vector.load %arg4[%c0_23, %c0_24] : memref<1x32xf32, #tpu.memory_space<vmem>>, vector<1x32xf32>
    %65 = vector.broadcast %64 : vector<1x32xf32> to vector<160x32xf32>
    %66 = arith.addf %63, %65 : vector<160x32xf32>
    %cst_25 = arith.constant 0.000000e+00 : f32
    %67 = vector.broadcast %cst_25 : f32 to vector<160x32xf32>
    %68 = arith.maximumf %66, %67 : vector<160x32xf32>
    %69 = vector.shape_cast %68 : vector<160x32xf32> to vector<5x32x32xf32>
    %70 = vector.extract_strided_slice %69 {offsets = [0, 0, 0], sizes = [5, 16, 32], strides = [1, 1, 1]} : vector<5x32x32xf32> to vector<5x16x32xf32>
    %71 = vector.extract_strided_slice %69 {offsets = [0, 16, 0], sizes = [5, 16, 32], strides = [1, 1, 1]} : vector<5x32x32xf32> to vector<5x16x32xf32>
    %72 = arith.maximumf %70, %71 : vector<5x16x32xf32>
    %cst_26 = arith.constant 0.000000e+00 : f32
    %73 = vector.broadcast %cst_26 : f32 to vector<16x32xf32>
    %74 = vector.extract_strided_slice %72 {offsets = [0, 0, 0], sizes = [1, 16, 32], strides = [1, 1, 1]} : vector<5x16x32xf32> to vector<1x16x32xf32>
    %75 = vector.shape_cast %74 : vector<1x16x32xf32> to vector<16x32xf32>
    %c0_27 = arith.constant 0 : index
    %c0_28 = arith.constant 0 : index
    %76 = vector.load %arg5[%c0_27, %c0_28] : memref<160x32xf32, #tpu.memory_space<vmem>>, vector<32x32xf32>
    %cst_29 = arith.constant dense<0.000000e+00> : vector<16x32xf32>
    %77 = tpu.matmul %75, %76, %cst_29 {dimension_numbers = #tpu.dot_dimension_numbers<[1], [0], [0], [1], [0, 0, 1, 1], [], []>} : vector<16x32xf32>, vector<32x32xf32>, vector<16x32xf32> -> vector<16x32xf32>
    %78 = arith.addf %73, %77 : vector<16x32xf32>
    %79 = vector.extract_strided_slice %72 {offsets = [1, 0, 0], sizes = [1, 16, 32], strides = [1, 1, 1]} : vector<5x16x32xf32> to vector<1x16x32xf32>
    %80 = vector.shape_cast %79 : vector<1x16x32xf32> to vector<16x32xf32>
    %c32_30 = arith.constant 32 : index
    %c0_31 = arith.constant 0 : index
    %81 = vector.load %arg5[%c32_30, %c0_31] : memref<160x32xf32, #tpu.memory_space<vmem>>, vector<32x32xf32>
    %cst_32 = arith.constant dense<0.000000e+00> : vector<16x32xf32>
    %82 = tpu.matmul %80, %81, %cst_32 {dimension_numbers = #tpu.dot_dimension_numbers<[1], [0], [0], [1], [0, 0, 1, 1], [], []>} : vector<16x32xf32>, vector<32x32xf32>, vector<16x32xf32> -> vector<16x32xf32>
    %83 = arith.addf %78, %82 : vector<16x32xf32>
    %84 = vector.extract_strided_slice %72 {offsets = [2, 0, 0], sizes = [1, 16, 32], strides = [1, 1, 1]} : vector<5x16x32xf32> to vector<1x16x32xf32>
    %85 = vector.shape_cast %84 : vector<1x16x32xf32> to vector<16x32xf32>
    %c64_33 = arith.constant 64 : index
    %c0_34 = arith.constant 0 : index
    %86 = vector.load %arg5[%c64_33, %c0_34] : memref<160x32xf32, #tpu.memory_space<vmem>>, vector<32x32xf32>
    %cst_35 = arith.constant dense<0.000000e+00> : vector<16x32xf32>
    %87 = tpu.matmul %85, %86, %cst_35 {dimension_numbers = #tpu.dot_dimension_numbers<[1], [0], [0], [1], [0, 0, 1, 1], [], []>} : vector<16x32xf32>, vector<32x32xf32>, vector<16x32xf32> -> vector<16x32xf32>
    %88 = arith.addf %83, %87 : vector<16x32xf32>
    %89 = vector.extract_strided_slice %72 {offsets = [3, 0, 0], sizes = [1, 16, 32], strides = [1, 1, 1]} : vector<5x16x32xf32> to vector<1x16x32xf32>
    %90 = vector.shape_cast %89 : vector<1x16x32xf32> to vector<16x32xf32>
    %c96 = arith.constant 96 : index
    %c0_36 = arith.constant 0 : index
    %91 = vector.load %arg5[%c96, %c0_36] : memref<160x32xf32, #tpu.memory_space<vmem>>, vector<32x32xf32>
    %cst_37 = arith.constant dense<0.000000e+00> : vector<16x32xf32>
    %92 = tpu.matmul %90, %91, %cst_37 {dimension_numbers = #tpu.dot_dimension_numbers<[1], [0], [0], [1], [0, 0, 1, 1], [], []>} : vector<16x32xf32>, vector<32x32xf32>, vector<16x32xf32> -> vector<16x32xf32>
    %93 = arith.addf %88, %92 : vector<16x32xf32>
    %94 = vector.extract_strided_slice %72 {offsets = [4, 0, 0], sizes = [1, 16, 32], strides = [1, 1, 1]} : vector<5x16x32xf32> to vector<1x16x32xf32>
    %95 = vector.shape_cast %94 : vector<1x16x32xf32> to vector<16x32xf32>
    %c128 = arith.constant 128 : index
    %c0_38 = arith.constant 0 : index
    %96 = vector.load %arg5[%c128, %c0_38] : memref<160x32xf32, #tpu.memory_space<vmem>>, vector<32x32xf32>
    %cst_39 = arith.constant dense<0.000000e+00> : vector<16x32xf32>
    %97 = tpu.matmul %95, %96, %cst_39 {dimension_numbers = #tpu.dot_dimension_numbers<[1], [0], [0], [1], [0, 0, 1, 1], [], []>} : vector<16x32xf32>, vector<32x32xf32>, vector<16x32xf32> -> vector<16x32xf32>
    %98 = arith.addf %93, %97 : vector<16x32xf32>
    %c0_40 = arith.constant 0 : index
    %c0_41 = arith.constant 0 : index
    %99 = vector.load %arg6[%c0_40, %c0_41] : memref<1x32xf32, #tpu.memory_space<vmem>>, vector<1x32xf32>
    %100 = vector.broadcast %99 : vector<1x32xf32> to vector<16x32xf32>
    %101 = arith.addf %98, %100 : vector<16x32xf32>
    %cst_42 = arith.constant 0.000000e+00 : f32
    %102 = vector.broadcast %cst_42 : f32 to vector<16x32xf32>
    %103 = arith.maximumf %101, %102 : vector<16x32xf32>
    %c0_43 = arith.constant 0 : index
    %c0_44 = arith.constant 0 : index
    %104 = vector.load %arg7[%c0_43, %c0_44] : memref<32x9xf32, #tpu.memory_space<vmem>>, vector<32x9xf32>
    %cst_45 = arith.constant dense<0.000000e+00> : vector<16x9xf32>
    %105 = tpu.matmul %103, %104, %cst_45 {dimension_numbers = #tpu.dot_dimension_numbers<[1], [0], [0], [1], [0, 0, 1, 1], [], []>} : vector<16x32xf32>, vector<32x9xf32>, vector<16x9xf32> -> vector<16x9xf32>
    %c0_46 = arith.constant 0 : index
    %c0_47 = arith.constant 0 : index
    %106 = vector.load %arg8[%c0_46, %c0_47] : memref<1x9xf32, #tpu.memory_space<vmem>>, vector<1x9xf32>
    %107 = vector.broadcast %106 : vector<1x9xf32> to vector<16x9xf32>
    %108 = arith.addf %105, %107 : vector<16x9xf32>
    %c0_48 = arith.constant 0 : index
    %c0_49 = arith.constant 0 : index
    %109 = vector.load %arg12[%c0_48, %c0_49] : memref<16x9xf32, #tpu.memory_space<vmem>>, vector<16x9xf32>
    tpu.vector_store %arg12[%c0_48, %c0_49], %108 {strides = array<i32>} : memref<16x9xf32, #tpu.memory_space<vmem>>, vector<16x9xf32>,
    %110 = tpu.iota {dimensions = array<i32: 1>} : vector<16x9xi32>
    %c0_50 = arith.constant 0 : index
    %c0_51 = arith.constant 0 : index
    %111 = vector.load %arg9[%c0_50, %c0_51] : memref<16x1xi32, #tpu.memory_space<vmem>>, vector<16x1xi32>
    %c0_i32 = arith.constant 0 : i32
    %112 = vector.broadcast %c0_i32 : i32 to vector<16x9xi32>
    %113 = arith.cmpi sge, %110, %112 : vector<16x9xi32>
    %c5_i32 = arith.constant 5 : i32
    %114 = vector.broadcast %c5_i32 : i32 to vector<16x9xi32>
    %115 = arith.cmpi slt, %110, %114 : vector<16x9xi32>
    %116 = arith.andi %113, %115 : vector<16x9xi1>
    %cst_52 = arith.constant -1.000000e+30 : f32
    %117 = vector.broadcast %cst_52 : f32 to vector<16x9xf32>
    %118 = arith.select %116, %108, %117 : vector<16x9xi1>, vector<16x9xf32>
    %cst_53 = arith.constant dense<0xFF800000> : vector<16xf32>
    %119 = vector.multi_reduction <maximumf>, %118, %cst_53 [1] : vector<16x9xf32> to vector<16xf32>
    %120 = vector.shape_cast %119 : vector<16xf32> to vector<16x1xf32>
    %121 = vector.broadcast %120 : vector<16x1xf32> to vector<16x9xf32>
    %122 = arith.subf %118, %121 : vector<16x9xf32>
    %123 = math.exp %122 : vector<16x9xf32>
    %cst_54 = arith.constant dense<0.000000e+00> : vector<16xf32>
    %124 = vector.multi_reduction <add>, %123, %cst_54 [1] : vector<16x9xf32> to vector<16xf32>
    %125 = vector.shape_cast %124 : vector<16xf32> to vector<16x1xf32>
    %126 = math.log %125 : vector<16x1xf32>
    %127 = arith.addf %126, %120 : vector<16x1xf32>
    %c0_i32_55 = arith.constant 0 : i32
    %128 = vector.broadcast %c0_i32_55 : i32 to vector<16x1xi32>
    %129 = arith.addi %111, %128 : vector<16x1xi32>
    %130 = vector.broadcast %129 : vector<16x1xi32> to vector<16x9xi32>
    %131 = arith.cmpi eq, %110, %130 : vector<16x9xi32>
    %132 = arith.extui %131 : vector<16x9xi1> to vector<16x9xi32>
    %133 = arith.sitofp %132 : vector<16x9xi32> to vector<16x9xf32>
    %134 = arith.mulf %108, %133 : vector<16x9xf32>
    %cst_56 = arith.constant dense<0.000000e+00> : vector<16xf32>
    %135 = vector.multi_reduction <add>, %134, %cst_56 [1] : vector<16x9xf32> to vector<16xf32>
    %136 = vector.shape_cast %135 : vector<16xf32> to vector<16x1xf32>
    %137 = arith.subf %127, %136 : vector<16x1xf32>
    %138 = vector.shape_cast %137 : vector<16x1xf32> to vector<1x16x1xf32>
    %cst_57 = arith.constant dense<0.000000e+00> : vector<1xf32>
    %139 = vector.multi_reduction <add>, %138, %cst_57 [1, 2] : vector<1x16x1xf32> to vector<1xf32>
    %140 = vector.shape_cast %139 : vector<1xf32> to vector<1x1x1xf32>
    %141 = vector.extract %140[0, 0, 0] : f32 from vector<1x1x1xf32>
    %cst_58 = arith.constant 1.600000e+01 : f32
    %142 = arith.divf %141, %cst_58 : f32
    %c0_59 = arith.constant 0 : index
    %143 = memref.load %arg13[%c0_59] : memref<3xf32, #tpu.memory_space<smem>>
    memref.store %142, %arg13[%c0_59] : memref<3xf32, #tpu.memory_space<smem>>
    %c0_60 = arith.constant 0 : index
    %c0_61 = arith.constant 0 : index
    %144 = vector.load %arg10[%c0_60, %c0_61] : memref<16x1xi32, #tpu.memory_space<vmem>>, vector<16x1xi32>
    %c5_i32_62 = arith.constant 5 : i32
    %145 = vector.broadcast %c5_i32_62 : i32 to vector<16x9xi32>
    %146 = arith.cmpi sge, %110, %145 : vector<16x9xi32>
    %c9_i32 = arith.constant 9 : i32
    %147 = vector.broadcast %c9_i32 : i32 to vector<16x9xi32>
    %148 = arith.cmpi slt, %110, %147 : vector<16x9xi32>
    %149 = arith.andi %146, %148 : vector<16x9xi1>
    %cst_63 = arith.constant -1.000000e+30 : f32
    %150 = vector.broadcast %cst_63 : f32 to vector<16x9xf32>
    %151 = arith.select %149, %108, %150 : vector<16x9xi1>, vector<16x9xf32>
    %cst_64 = arith.constant dense<0xFF800000> : vector<16xf32>
    %152 = vector.multi_reduction <maximumf>, %151, %cst_64 [1] : vector<16x9xf32> to vector<16xf32>
    %153 = vector.shape_cast %152 : vector<16xf32> to vector<16x1xf32>
    %154 = vector.broadcast %153 : vector<16x1xf32> to vector<16x9xf32>
    %155 = arith.subf %151, %154 : vector<16x9xf32>
    %156 = math.exp %155 : vector<16x9xf32>
    %cst_65 = arith.constant dense<0.000000e+00> : vector<16xf32>
    %157 = vector.multi_reduction <add>, %156, %cst_65 [1] : vector<16x9xf32> to vector<16xf32>
    %158 = vector.shape_cast %157 : vector<16xf32> to vector<16x1xf32>
    %159 = math.log %158 : vector<16x1xf32>
    %160 = arith.addf %159, %153 : vector<16x1xf32>
    %c5_i32_66 = arith.constant 5 : i32
    %161 = vector.broadcast %c5_i32_66 : i32 to vector<16x1xi32>
    %162 = arith.addi %144, %161 : vector<16x1xi32>
    %163 = vector.broadcast %162 : vector<16x1xi32> to vector<16x9xi32>
    %164 = arith.cmpi eq, %110, %163 : vector<16x9xi32>
    %165 = arith.extui %164 : vector<16x9xi1> to vector<16x9xi32>
    %166 = arith.sitofp %165 : vector<16x9xi32> to vector<16x9xf32>
    %167 = arith.mulf %108, %166 : vector<16x9xf32>
    %cst_67 = arith.constant dense<0.000000e+00> : vector<16xf32>
    %168 = vector.multi_reduction <add>, %167, %cst_67 [1] : vector<16x9xf32> to vector<16xf32>
    %169 = vector.shape_cast %168 : vector<16xf32> to vector<16x1xf32>
    %170 = arith.subf %160, %169 : vector<16x1xf32>
    %171 = vector.shape_cast %170 : vector<16x1xf32> to vector<1x16x1xf32>
    %cst_68 = arith.constant dense<0.000000e+00> : vector<1xf32>
    %172 = vector.multi_reduction <add>, %171, %cst_68 [1, 2] : vector<1x16x1xf32> to vector<1xf32>
    %173 = vector.shape_cast %172 : vector<1xf32> to vector<1x1x1xf32>
    %174 = vector.extract %173[0, 0, 0] : f32 from vector<1x1x1xf32>
    %cst_69 = arith.constant 1.600000e+01 : f32
    %175 = arith.divf %174, %cst_69 : f32
    %c1_70 = arith.constant 1 : index
    %176 = memref.load %arg13[%c1_70] : memref<3xf32, #tpu.memory_space<smem>>
    memref.store %175, %arg13[%c1_70] : memref<3xf32, #tpu.memory_space<smem>>
    %177 = arith.mulf %103, %103 : vector<16x32xf32>
    %cst_71 = arith.constant dense<0.000000e+00> : vector<16xf32>
    %178 = vector.multi_reduction <add>, %177, %cst_71 [1] : vector<16x32xf32> to vector<16xf32>
    %179 = vector.shape_cast %178 : vector<16xf32> to vector<16x1xf32>
    %cst_72 = arith.constant 9.99999996E-13 : f32
    %180 = vector.broadcast %cst_72 : f32 to vector<16x1xf32>
    %181 = arith.addf %179, %180 : vector<16x1xf32>
    %182 = math.rsqrt %181 : vector<16x1xf32>
    %183 = vector.broadcast %182 : vector<16x1xf32> to vector<16x32xf32>
    %184 = arith.mulf %103, %183 : vector<16x32xf32>
    %cst_73 = arith.constant dense<0.000000e+00> : vector<16x16xf32>
    %185 = tpu.matmul %184, %184, %cst_73 {dimension_numbers = #tpu.dot_dimension_numbers<[1], [1], [0], [0], [0, 0, 1, 0], [], []>} : vector<16x32xf32>, vector<16x32xf32>, vector<16x16xf32> -> vector<16x16xf32>
    %cst_74 = arith.constant 14.2857141 : f32
    %186 = vector.broadcast %cst_74 : f32 to vector<16x16xf32>
    %187 = arith.mulf %185, %186 : vector<16x16xf32>
    %cst_75 = arith.constant dense<0xFF800000> : vector<16xf32>
    %188 = vector.multi_reduction <maximumf>, %187, %cst_75 [1] : vector<16x16xf32> to vector<16xf32>
    %189 = vector.shape_cast %188 : vector<16xf32> to vector<16x1xf32>
    %190 = vector.broadcast %189 : vector<16x1xf32> to vector<16x16xf32>
    %191 = arith.subf %187, %190 : vector<16x16xf32>
    %192 = tpu.iota {dimensions = array<i32: 0>} : vector<16x16xi32>
    %193 = tpu.iota {dimensions = array<i32: 1>} : vector<16x16xi32>
    %194 = arith.cmpi ne, %192, %193 : vector<16x16xi32>
    %195 = arith.extui %194 : vector<16x16xi1> to vector<16x16xi32>
    %196 = arith.sitofp %195 : vector<16x16xi32> to vector<16x16xf32>
    %c0_76 = arith.constant 0 : index
    %c0_77 = arith.constant 0 : index
    %197 = vector.load %arg9[%c0_76, %c0_77] : memref<16x1xi32, #tpu.memory_space<vmem>>, vector<16x1xi32>
    %c0_78 = arith.constant 0 : index
    %c0_79 = arith.constant 0 : index
    %198 = vector.load %arg11[%c0_78, %c0_79] : memref<1x16xi32, #tpu.memory_space<vmem>>, vector<1x16xi32>
    %199 = vector.broadcast %197 : vector<16x1xi32> to vector<16x16xi32>
    %200 = vector.broadcast %198 : vector<1x16xi32> to vector<16x16xi32>
    %201 = arith.cmpi eq, %199, %200 : vector<16x16xi32>
    %202 = arith.extui %201 : vector<16x16xi1> to vector<16x16xi32>
    %203 = arith.sitofp %202 : vector<16x16xi32> to vector<16x16xf32>
    %204 = arith.mulf %203, %196 : vector<16x16xf32>
    %205 = math.exp %191 : vector<16x16xf32>
    %206 = arith.mulf %205, %196 : vector<16x16xf32>
    %cst_80 = arith.constant dense<0.000000e+00> : vector<16xf32>
    %207 = vector.multi_reduction <add>, %206, %cst_80 [1] : vector<16x16xf32> to vector<16xf32>
    %208 = vector.shape_cast %207 : vector<16xf32> to vector<16x1xf32>
    %209 = math.log %208 : vector<16x1xf32>
    %210 = vector.broadcast %209 : vector<16x1xf32> to vector<16x16xf32>
    %211 = arith.subf %191, %210 : vector<16x16xf32>
    %cst_81 = arith.constant dense<0.000000e+00> : vector<16xf32>
    %212 = vector.multi_reduction <add>, %204, %cst_81 [1] : vector<16x16xf32> to vector<16xf32>
    %213 = vector.shape_cast %212 : vector<16xf32> to vector<16x1xf32>
    %cst_82 = arith.constant 1.000000e+00 : f32
    %214 = vector.broadcast %cst_82 : f32 to vector<16x1xf32>
    %215 = arith.maximumf %213, %214 : vector<16x1xf32>
    %216 = arith.mulf %204, %211 : vector<16x16xf32>
    %cst_83 = arith.constant dense<0.000000e+00> : vector<16xf32>
    %217 = vector.multi_reduction <add>, %216, %cst_83 [1] : vector<16x16xf32> to vector<16xf32>
    %218 = vector.shape_cast %217 : vector<16xf32> to vector<16x1xf32>
    %219 = tpu.reciprocal %215 {approx = true} : vector<16x1xf32> -> vector<16x1xf32>
    %220 = arith.mulf %218, %219 : vector<16x1xf32>
    %221 = vector.shape_cast %220 : vector<16x1xf32> to vector<1x16x1xf32>
    %cst_84 = arith.constant dense<0.000000e+00> : vector<1xf32>
    %222 = vector.multi_reduction <add>, %221, %cst_84 [1, 2] : vector<1x16x1xf32> to vector<1xf32>
    %223 = vector.shape_cast %222 : vector<1xf32> to vector<1x1x1xf32>
    %224 = vector.extract %223[0, 0, 0] : f32 from vector<1x1x1xf32>
    %cst_85 = arith.constant 1.600000e+01 : f32
    %225 = arith.divf %224, %cst_85 : f32
    %cst_86 = arith.constant -1.000000e+00 : f32
    %226 = arith.mulf %cst_86, %225 : f32
    %c2_87 = arith.constant 2 : index
    %227 = memref.load %arg13[%c2_87] : memref<3xf32, #tpu.memory_space<smem>>
    memref.store %226, %arg13[%c2_87] : memref<3xf32, #tpu.memory_space<smem>>
    return
  }
}

</mosaic_0001>

<bundles_post_ra>
// kernel: ddlearn_forward.1
= control target key start
LH: loop header
LB: loop body
LE: loop exit
PB: predicated region body
PF: predicated region fallthrough
CT: control target
= control target key end

     0   :  { %v2499_v3 = vmov 0   ;;  %s4415_s0 = inlined_call_operand.vmem [shape: f32[32,16,1], index: 0, kind: input, shape index: {}]   ;;  %s4416_s1 = inlined_call_operand.vmem [shape: f32[5,16], index: 1, kind: input, shape index: {}]   ;;  %s4417_s2 = inlined_call_operand.vmem [shape: f32[1,16], index: 2, kind: input, shape index: {}]   ;;  %s4418_s3 = inlined_call_operand.vmem [shape: f32[80,32], index: 3, kind: input, shape index: {}]   ;;  %s4419_s4 = inlined_call_operand.vmem [shape: f32[1,32], index: 4, kind: input, shape index: {}]   ;;  %s4420_s5 = inlined_call_operand.vmem [shape: f32[160,32], index: 5, kind: input, shape index: {}]   ;;  %s4421_s6 = inlined_call_operand.vmem [shape: f32[1,32], index: 6, kind: input, shape index: {}]   ;;  %s4422_s7 = inlined_call_operand.vmem [shape: f32[32,9], index: 7, kind: input, shape index: {}]   ;;  %s4423_s8 = inlined_call_operand.vmem [shape: f32[1,9], index: 8, kind: input, shape index: {}]   ;;  %s4424_s9 = inlined_call_operand.vmem [shape: s32[16,1], index: 9, kind: input, shape index: {}]   ;;  %s4425_s10 = inlined_call_operand.vmem [shape: s32[16,1], index: 10, kind: input, shape index: {}]   ;;  %s4426_s11 = inlined_call_operand.vmem [shape: s32[1,16], index: 11, kind: input, shape index: {}]   ;;  %s4427_s12 = inlined_call_operand.vmem [shape: f32[16,9], index: 12, kind: output, shape index: {0}]   ;;  %s4428_s13 = inlined_call_operand.vmem [shape: f32[3], index: 13, kind: output, shape index: {1}]  }
   0x1   :  { %v56_v0 = vld [vmem:[%s4415_s0 + $0x60] sm:$0xff]  ;;  %2434 = vset.pattern.permute.xlu2 %v2499_v3  ;;  %2433 = vset.pattern.permute.xlu1 %v2499_v3  ;;  %v58_v4 = vld [vmem:[%s4415_s0 + $0x70] sm:$0xff] }
   0x2   :  { %v52_v1 = vld [vmem:[%s4415_s0 + $0x40] sm:$0xff]  ;;  %2432 = vset.pattern.permute.xlu0 %v2499_v3  ;;  %171 = vperm.xlu2 %2434, %v56_v0   ;;  %v54_v5 = vld [vmem:[%s4415_s0 + $0x50] sm:$0xff] }
   0x3   :  { %v48_v2 = vld [vmem:[%s4415_s0 + $0x20] sm:$0xff]  ;;  %151 = vperm.xlu1 %2433, %v52_v1   ;;  %v50_v6 = vld [vmem:[%s4415_s0 + $0x30] sm:$0xff] }
   0x4   :  { %131 = vperm.xlu0 %2432, %v48_v2  }
   0x5   :  { %19 = vsyncpa [#allocation3], 0  ;;  %v53_v7 = vld [vmem:[%s4415_s0 + $0x48] sm:$0xff]  ;;  %v51_v8 = vld [vmem:[%s4415_s0 + $0x38] sm:$0xff]  ;;  %vm1146_vm0 = vcmask 130048   ;;  %vm1744_vm1 = vcmask 261120  }
   0x6   :  { %v49_v9 = vld [vmem:[%s4415_s0 + $0x28] sm:$0xff]  ;;  %v59_v10 = vld [vmem:[%s4415_s0 + $0x78] sm:$0xff]  ;;  %v80_v13 = vld [vmem:[%s4415_s0 + $0x120] sm:$0xff]  ;;  %vm1953_vm4 = vcmask 72704   ;;  %s2280_s23 = sshll.u32 %s4428_s13, 4  ;;  %s2502_s26 = smov [#allocation2]   ;;  %s2281_s23 = int_to_ptr.vmem [resolvable:$true] %s2280_s23 }
   0x7   :  { %v57_v11 = vld [vmem:[%s4415_s0 + $0x68] sm:$0xff]  ;;  %v55_v12 = vld [vmem:[%s4415_s0 + $0x58] sm:$0xff]  ;;  %v78_v14 = vld [vmem:[%s4415_s0 + $0x110] sm:$0xff] }
   0x8   :  { %v76_v15 = vld [vmem:[%s4415_s0 + $0x100] sm:$0xff]  ;;  %v82_v18 = vld [vmem:[%s4415_s0 + $0x130] sm:$0xff]  ;;  %v67_v19 = vld [vmem:[%s4415_s0 + $0xb8] sm:$0xff] }
   0x9   :  { %v84_v16 = vld [vmem:[%s4415_s0 + $0x140] sm:$0xff]  ;;  %v65_v20 = vld [vmem:[%s4415_s0 + $0xa8] sm:$0xff]  ;;  %v62_v21 = vld [vmem:[%s4415_s0 + $0x90] sm:$0xff] }
   0xa   :  { %181 = vperm.xlu2 %2434, %v58_v4   ;;  %v60_v17 = vld [vmem:[%s4415_s0 + $0x80] sm:$0xff]  ;;  %v71_v22 = vld [vmem:[%s4415_s0 + $0xd8] sm:$0xff]  ;;  %v86_v23 = vld [vmem:[%s4415_s0 + $0x150] sm:$0xff] }
   0xb   :  { %161 = vperm.xlu1 %2433, %v54_v5   ;;  %v69_v24 = vld [vmem:[%s4415_s0 + $0xc8] sm:$0xff]  ;;  %v79_v26 = vld [vmem:[%s4415_s0 + $0x118] sm:$0xff]  ;;  %v72_v34 = vld [vmem:[%s4415_s0 + $0xe0] sm:$0xff] }
   0xc   :  { %141 = vperm.xlu0 %2432, %v50_v6   ;;  %v81_v25 = vld [vmem:[%s4415_s0 + $0x128] sm:$0xff]  ;;  %v83_v29 = vld [vmem:[%s4415_s0 + $0x138] sm:$0xff]  ;;  %v70_v35 = vld [vmem:[%s4415_s0 + $0xd0] sm:$0xff] }
   0xd   :  { %v77_v27 = vld [vmem:[%s4415_s0 + $0x108] sm:$0xff]  ;;  %v63_v31 = vld [vmem:[%s4415_s0 + $0x98] sm:$0xff]  ;;  %v68_v36 = vld [vmem:[%s4415_s0 + $0xc0] sm:$0xff] }
   0xe   :  { %v61_v28 = vld [vmem:[%s4415_s0 + $0x88] sm:$0xff]  ;;  %v75_v33 = vld [vmem:[%s4415_s0 + $0xf8] sm:$0xff]  ;;  %v64_v38 = vld [vmem:[%s4415_s0 + $0xa0] sm:$0xff] }
   0xf   :  { %v73_v30 = vld [vmem:[%s4415_s0 + $0xe8] sm:$0xff]  ;;  %v74_v39 = vld [vmem:[%s4415_s0 + $0xf0] sm:$0xff]  ;;  %v87_v40 = vld [vmem:[%s4415_s0 + $0x158] sm:$0xff] }
  0x10   :  { %v85_v32 = vld [vmem:[%s4415_s0 + $0x148] sm:$0xff]  ;;  %v2695_v41 = vld [vmem:[%s4416_s1] ss:$0 sm:$0xff]  ;;  %v2700_v42 = vld [vmem:[%s4416_s1 + $0x1] ss:$0 sm:$0xff] }
  0x11   :  { %v90_v47 = vld [vmem:[%s4415_s0 + $0x170] sm:$0xff]  ;;  %v88_v49 = vld [vmem:[%s4415_s0 + $0x160] sm:$0xff]  ;;  %v1145_v50 = vld [vmem:[%s4418_s3 + $0x18] sm:$0xff] }
  0x12   :  { %156 = vperm.xlu2 %2434, %v53_v7   ;;  %v66_v48 = vld [vmem:[%s4415_s0 + $0xb0] sm:$0xff]  ;;  %1221 = vmatpush.msra.mxu0 %v1145_v50  ;;  %v92_v53 = vld [vmem:[%s4415_s0 + $0x180] sm:$0xff]  ;;  %v91_v54 = vld [vmem:[%s4415_s0 + $0x178] sm:$0xff] }
  0x13   :  { %146 = vperm.xlu1 %2433, %v51_v8   ;;  %v1144_v52 = vld [vmem:[%s4418_s3 + $0x10] sm:$0xff]  ;;  %2417 = vmatpush.msra.mxu3 %v1145_v50  ;;  %v89_v55 = vld [vmem:[%s4415_s0 + $0x168] sm:$0xff]  ;;  %v95_v59 = vld [vmem:[%s4415_s0 + $0x198] sm:$0xff] }
  0x14   :  { %136 = vperm.xlu0 %2432, %v49_v9   ;;  %2416 = vmatpush.msra.mxu2 %v1145_v50  ;;  %v93_v60 = vld [vmem:[%s4415_s0 + $0x188] sm:$0xff]  ;;  %v94_v61 = vld [vmem:[%s4415_s0 + $0x190] sm:$0xff]  ;;  %v2771_v6 = vld [vmem:[%s4416_s1 + $0x2] ss:$0 sm:$0xff] }
  0x15   :  { %1222 = vmatpush.msra.mxu0 %v1144_v52  ;;  %2419 = vmatpush.msra.mxu3 %v1144_v52  ;;  %v45_v5 = vld [vmem:[%s4415_s0 + $0x8] sm:$0xff]  ;;  %v46_v7 = vld [vmem:[%s4415_s0 + $0x10] sm:$0xff]  ;;  %v44_v8 = vld [vmem:[%s4415_s0] sm:$0xff] }
  0x16   :  { %2418 = vmatpush.msra.mxu2 %v1144_v52 }
  0x1a   :  { %186 = vperm.xlu2 %2434, %v59_v10  }
  0x1b   :  { %176 = vperm.xlu1 %2433, %v57_v11   ;;  %v2782_v11 = vld [vmem:[%s4416_s1 + $0x3] ss:$0 sm:$0xff] }
  0x1c   :  { %166 = vperm.xlu0 %2432, %v55_v12  }
  0x22   :  { %291 = vperm.xlu2 %2434, %v80_v13  }
  0x23   :  { %281 = vperm.xlu1 %2433, %v78_v14   ;;  %v2791_v14 = vld [vmem:[%s4416_s1 + $0x4] ss:$0 sm:$0xff] }
  0x24   :  { %271 = vperm.xlu0 %2432, %v76_v15  }
  0x2a   :  { %311 = vperm.xlu2 %2434, %v84_v16  }
  0x2b   :  { %191 = vperm.xlu1 %2433, %v60_v17  }
  0x2c   :  { %301 = vperm.xlu0 %2432, %v82_v18  }
  0x32   :  { %226 = vperm.xlu2 %2434, %v67_v19  }
  0x33   :  { %216 = vperm.xlu1 %2433, %v65_v20  }
  0x34   :  { %201 = vperm.xlu0 %2432, %v62_v21  }
  0x3a   :  { %246 = vperm.xlu2 %2434, %v71_v22  }
  0x3b   :  { %321 = vperm.xlu1 %2433, %v86_v23  }
  0x3c   :  { %236 = vperm.xlu0 %2432, %v69_v24   ;;  %v98_v24 = vld [vmem:[%s4415_s0 + $0x1b0] sm:$0xff] }
  0x42   :  { %296 = vperm.xlu2 %2434, %v81_v25  }
  0x43   :  { %286 = vperm.xlu1 %2433, %v79_v26  }
  0x44   :  { %276 = vperm.xlu0 %2432, %v77_v27   ;;  %v96_v27 = vld [vmem:[%s4415_s0 + $0x1a0] sm:$0xff] }
  0x4a   :  { %196 = vperm.xlu2 %2434, %v61_v28   ;;  %v47_v28 = vld [vmem:[%s4415_s0 + $0x18] sm:$0xff] }
  0x4b   :  { %306 = vperm.xlu1 %2433, %v83_v29  }
  0x4c   :  { %256 = vperm.xlu0 %2432, %v73_v30  }
  0x52   :  { %206 = vperm.xlu2 %2434, %v63_v31   ;;  %v2823_v31 = vld [vmem:[%s4417_s2] ss:$0 sm:$0xff] }
  0x53   :  { %316 = vperm.xlu1 %2433, %v85_v32  }
  0x54   :  { %266 = vperm.xlu0 %2432, %v75_v33  }
  0x5a   :  { %251 = vperm.xlu2 %2434, %v72_v34  }
  0x5b   :  { %241 = vperm.xlu1 %2433, %v70_v35  }
  0x5c   :  { %231 = vperm.xlu0 %2432, %v68_v36   ;;  %v2681_v37 = vpop.permute.xlu2 %171 }
  0x5d   :  { %v402_v43 = vmul.f32 %v2695_v41, %v2681_v37  ;;  %v768_v20 = vmul.f32 %v2782_v11, %v2681_v37  ;;  %v890_v22 = vmul.f32 %v2791_v14, %v2681_v37  ;;  %v524_v50 = vmul.f32 %v2700_v42, %v2681_v37 }
  0x5e   :  { %v646_v52 = vmul.f32 %v2771_v6, %v2681_v37  ;;  %v99_v37 = vld [vmem:[%s4415_s0 + $0x1b8] sm:$0xff] }
  0x62   :  { %211 = vperm.xlu2 %2434, %v64_v38  }
  0x63   :  { %261 = vperm.xlu1 %2433, %v74_v39  }
  0x64   :  { %326 = vperm.xlu0 %2432, %v87_v40   ;;  %v2704_v44 = vpop.permute.xlu2 %181 }
  0x65   :  { %v526_v45 = vmul.f32 %v2700_v42, %v2704_v44  ;;  %v892_v23 = vmul.f32 %v2791_v14, %v2704_v44 }
  0x67   :  { %v2708_v46 = vadd.f32 %v526_v45, %v402_v43 }
  0x6a   :  { %341 = vperm.xlu2 %2434, %v90_v47  }
  0x6b   :  { %221 = vperm.xlu1 %2433, %v66_v48  }
  0x6c   :  { %331 = vperm.xlu0 %2432, %v88_v49   ;;  %v2722_v51 = vpop.permute.xlu2 %156 }
  0x6d   :  { %4449 = vst [vmem:[#allocation5_spill] sm:$0xff] %v2722_v51  ;;  %v521_v38 = vmul.f32 %v2700_v42, %v2722_v51  ;;  %v643_v47 = vmul.f32 %v2771_v6, %v2722_v51 }
  0x72   :  { %351 = vperm.xlu2 %2434, %v92_v53  }
  0x73   :  { %346 = vperm.xlu1 %2433, %v91_v54  }
  0x74   :  { %336 = vperm.xlu0 %2432, %v89_v55   ;;  %v2736_v56 = vpop.permute.xlu2 %186  ;;  %v100_v55 = vld [vmem:[%s4415_s0 + $0x1c0] sm:$0xff] }
  0x75   :  { %v2738_v57 = vpop.permute.xlu1 %151  ;;  %v527_v48 = vmul.f32 %v2700_v42, %v2736_v56 }
  0x76   :  { %v2740_v58 = vpop.permute.xlu0 %131  ;;  %v520_v1 = vmul.f32 %v2700_v42, %v2738_v57  ;;  %v642_v12 = vmul.f32 %v2771_v6, %v2738_v57 }
  0x77   :  { %v394_v2 = vmul.f32 %v2695_v41, %v2740_v58 }
  0x7a   :  { %366 = vperm.xlu2 %2434, %v95_v59  }
  0x7b   :  { %356 = vperm.xlu1 %2433, %v93_v60  }
  0x7c   :  { %361 = vperm.xlu0 %2432, %v94_v61   ;;  %v2751_v62 = vpop.permute.xlu2 %291 }
  0x7d   :  { %v2753_v63 = vpop.permute.xlu1 %161 }
  0x7e   :  { %v2755_v0 = vpop.permute.xlu0 %141  ;;  %v644_v13 = vmul.f32 %v2771_v6, %v2753_v63  ;;  %v766_v21 = vmul.f32 %v2782_v11, %v2753_v63  ;;  %v522_v53 = vmul.f32 %v2700_v42, %v2753_v63 }
  0x7f   :  { %v396_v3 = vmul.f32 %v2695_v41, %v2755_v0  ;;  %v518_v4 = vmul.f32 %v2700_v42, %v2755_v0 }
  0x81   :  { %v574_v9 = vadd.f32 %v518_v4, %v394_v2  ;;  %v576_v10 = vadd.f32 %v520_v1, %v396_v3  ;;  %v97_v2 = vld [vmem:[%s4415_s0 + $0x1a8] sm:$0xff]  ;;  %v2866_v3 = vmul.f32 %v2695_v41, %v2704_v44  ;;  %v648_v4 = vmul.f32 %v2771_v6, %v2704_v44 }
  0x82   :  { %116 = vperm.xlu2 %2434, %v45_v5  }
  0x83   :  { %121 = vperm.xlu1 %2433, %v46_v7   ;;  %v698_v15 = vadd.f32 %v642_v12, %v574_v9  ;;  %v700_v16 = vadd.f32 %v644_v13, %v576_v10 }
  0x84   :  { %111 = vperm.xlu0 %2432, %v44_v8   ;;  %v2793_v17 = vpop.permute.xlu2 %311  ;;  %v398_v8 = vmul.f32 %v2695_v41, %v2738_v57 }
  0x85   :  { %v2795_v18 = vpop.permute.xlu1 %146  ;;  %v822_v29 = vadd.f32 %v766_v21, %v698_v15  ;;  %v824_v30 = vadd.f32 %v768_v20, %v700_v16  ;;  %v770_v16 = vmul.f32 %v2782_v11, %v2704_v44  ;;  %v399_v20 = vmul.f32 %v2695_v41, %v2722_v51 }
  0x86   :  { %4450 = vst [vmem:[#allocation6_spill] sm:$0xff] %v2795_v18  ;;  %v2797_v19 = vpop.permute.xlu0 %136  ;;  %v519_v25 = vmul.f32 %v2700_v42, %v2795_v18  ;;  %v397_v34 = vmul.f32 %v2695_v41, %v2795_v18  ;;  %v400_v21 = vmul.f32 %v2695_v41, %v2753_v63 }
  0x87   :  { %v395_v26 = vmul.f32 %v2695_v41, %v2797_v19  ;;  %v946_v32 = vadd.f32 %v890_v22, %v822_v29  ;;  %v948_v33 = vadd.f32 %v892_v23, %v824_v30  ;;  %v578_v22 = vadd.f32 %v522_v53, %v398_v8 }
  0x88   :  { %v577_v54 = vadd.f32 %v521_v38, %v397_v34  ;;  %v2902_v29 = vmul.f32 %v2771_v6, %v2736_v56  ;;  %v2906_v30 = vmul.f32 %v2782_v11, %v2736_v56  ;;  %v2916_v34 = vmul.f32 %v2791_v14, %v2738_v57 }
  0x89   :  { %v575_v35 = vadd.f32 %v519_v25, %v395_v26  ;;  %v1006_v43 = vadd.f32 %v2823_v31, %v946_v32  ;;  %v1008_v45 = vadd.f32 %v2823_v31, %v948_v33  ;;  %v2892_v25 = vmul.f32 %v2695_v41, %v2736_v56 }
  0x8a   :  { %381 = vperm.xlu2 %2434, %v98_v24   ;;  %v2888_v24 = vmul.f32 %v2782_v11, %v2722_v51  ;;  %v893_v32 = vmul.f32 %v2791_v14, %v2736_v56  ;;  %v2912_v33 = vmul.f32 %v2782_v11, %v2738_v57  ;;  %4455 = vst [vmem:[#allocation11_spill] sm:$0xff] %v2916_v34  ;;  %v103_v56 = vld [vmem:[%s4415_s0 + $0x1d8] sm:$0xff] }
  0x8b   :  { %371 = vperm.xlu1 %2433, %v96_v27   ;;  %v699_v59 = vadd.f32 %v643_v47, %v575_v35  ;;  %v1062_v5 = vmax.f32 %v1006_v43, 0.0  ;;  %v1064_v7 = vmax.f32 %v1008_v45, 0.0  ;;  %v2920_v35 = vmul.f32 %v2700_v42, %v2740_v58 }
  0x8c   :  { %126 = vperm.xlu0 %2432, %v47_v28   ;;  %v2827_v36 = vpop.permute.xlu2 %226  ;;  %4453 = vst [vmem:[#allocation9_spill] sm:$0xff] %v2888_v24  ;;  %v2924_v38 = vmul.f32 %v2771_v6, %v2740_v58  ;;  %v426_v43 = vmul.f32 %v2695_v41, %v2751_v62  ;;  %v2933_v45 = vmul.f32 %v2700_v42, %v2751_v62  ;;  %v101_v58 = vld [vmem:[%s4415_s0 + $0x1c8] sm:$0xff] }
  0x8d   :  { %v2831_v39 = vpop.permute.xlu1 %176  ;;  %v2876_v15 = vmax.f32 %v1062_v5, %v1064_v7  ;;  %4454 = vst [vmem:[#allocation10_spill] sm:$0xff] %v2912_v33  ;;  %v2937_v57 = vmul.f32 %v2771_v6, %v2751_v62  ;;  %v580_v47 = vadd.f32 %v524_v50, %v400_v21  ;;  %v2947_v53 = vmul.f32 %v2782_v11, %v2751_v62 }
  0x8e   :  { %v2833_v40 = vpop.permute.xlu0 %166  ;;  %v403_v49 = vmul.f32 %v2695_v41, %v2831_v39  ;;  %v769_v12 = vmul.f32 %v2782_v11, %v2831_v39  ;;  %v891_v13 = vmul.f32 %v2791_v14, %v2831_v39  ;;  %4456 = vst [vmem:[#allocation12_spill] sm:$0xff] %v2920_v35 }
  0x8f   :  { %4451 = vst [vmem:[#allocation7_spill] sm:$0xff] %v2833_v40  ;;  %v645_v61 = vmul.f32 %v2771_v6, %v2833_v40  ;;  %v767_v1 = vmul.f32 %v2782_v11, %v2833_v40  ;;  %2292 = vmatmul.msk.f32.vlgmr.msra.gmra.mxu0 %vm1146_vm0, %v2876_v15  ;;  %v2983_v7 = vadd.f32 %v648_v4, %v580_v47 }
  0x90   :  { %v2852_v60 = vadd.f32 %v527_v48, %v403_v49  ;;  %4452 = vst [vmem:[#allocation8_spill] sm:$0xff] %v2876_v15  ;;  %v102_v48 = vld [vmem:[%s4415_s0 + $0x1d0] sm:$0xff]  ;;  %v702_v49 = vadd.f32 %v646_v52, %v578_v22  ;;  %v2964_v52 = vmul.f32 %v2782_v11, %v2755_v0  ;;  %v3001_v4 = vmul.f32 %v2771_v6, %v2795_v18 }
  0x91   :  { %v701_v9 = vadd.f32 %v645_v61, %v577_v54  ;;  %v823_v10 = vadd.f32 %v767_v1, %v699_v59  ;;  %4457 = vst [vmem:[#allocation13_spill] sm:$0xff] %v2924_v38  ;;  %v2951_v54 = vmul.f32 %v2791_v14, %v2751_v62  ;;  %v2956_v59 = vmul.f32 %v2791_v14, %v2753_v63 }
  0x92   :  { %505 = vperm.xlu2 %2434, %v100_v55   ;;  %4458 = vst [vmem:[#allocation14_spill] sm:$0xff] %v2947_v53  ;;  %v2960_v61 = vmul.f32 %v2771_v6, %v2755_v0  ;;  %v525_v1 = vmul.f32 %v2700_v42, %v2831_v39  ;;  %v401_v62 = vmul.f32 %v2695_v41, %v2833_v40 }
  0x93   :  { %386 = vperm.xlu1 %2433, %v99_v37   ;;  %v825_v27 = vadd.f32 %v769_v12, %v701_v9  ;;  %v947_v28 = vadd.f32 %v891_v13, %v823_v10  ;;  %4459 = vst [vmem:[#allocation15_spill] sm:$0xff] %v2951_v54  ;;  %v523_v37 = vmul.f32 %v2700_v42, %v2833_v40 }
  0x94   :  { %376 = vperm.xlu0 %2432, %v97_v2   ;;  %v2884_v23 = vpop.permute.xlu2 %246  ;;  %4460 = vst [vmem:[#allocation16_spill] sm:$0xff] %v2956_v59  ;;  %v2975_v2 = vmul.f32 %v2695_v41, %v2793_v17  ;;  %v2979_v0 = vmul.f32 %v2700_v42, %v2793_v17  ;;  %v2985_v8 = vadd.f32 %v770_v16, %v702_v49  ;;  %v107_v59 = vld [vmem:[%s4415_s0 + $0x1f8] sm:$0xff] }
  0x95   :  { %v2896_v44 = vpop.permute.xlu1 %281  ;;  %v949_v55 = vadd.f32 %v893_v32, %v825_v27  ;;  %v1007_v50 = vadd.f32 %v2823_v31, %v947_v28  ;;  %4461 = vst [vmem:[#allocation17_spill] sm:$0xff] %v2960_v61  ;;  %v674_v9 = vmul.f32 %v2771_v6, %v2793_v17  ;;  %v2991_v10 = vmul.f32 %v2782_v11, %v2793_v17 }
  0x96   :  { %v2898_v26 = vpop.permute.xlu0 %271  ;;  %4462 = vst [vmem:[#allocation18_spill] sm:$0xff] %v2964_v52  ;;  %v2997_v27 = vmul.f32 %v2791_v14, %v2793_v17  ;;  %v3005_v16 = vmul.f32 %v2700_v42, %v2797_v19  ;;  %v3009_v28 = vmul.f32 %v2771_v6, %v2797_v19  ;;  %v579_v32 = vadd.f32 %v523_v37, %v399_v20  ;;  %v105_v17 = vld [vmem:[%s4415_s0 + $0x1e8] sm:$0xff] }
  0x97   :  { %v1009_v63 = vadd.f32 %v2823_v31, %v949_v55  ;;  %v1063_v12 = vmax.f32 %v1007_v50, 0.0  ;;  %4463 = vst [vmem:[#allocation19_spill] sm:$0xff] %v3001_v4  ;;  %v3023_v49 = vmul.f32 %v2700_v42, %v2827_v36  ;;  %v3027_v19 = vmul.f32 %v2771_v6, %v2827_v36  ;;  %v106_v55 = vld [vmem:[%s4415_s0 + $0x1f0] sm:$0xff]  ;;  %v104_v50 = vld [vmem:[%s4415_s0 + $0x1e0] sm:$0xff] }
  0x98   :  { %4464 = vst [vmem:[#allocation20_spill] sm:$0xff] %v3005_v16  ;;  %v422_v37 = vmul.f32 %v2695_v41, %v2898_v26  ;;  %v3060_v40 = vmul.f32 %v2695_v41, %v2884_v23  ;;  %v3108_v51 = vmul.f32 %v2771_v6, %v2898_v26 }
  0x99   :  { %v1065_v13 = vmax.f32 %v1009_v63, 0.0  ;;  %4465 = vst [vmem:[#allocation21_spill] sm:$0xff] %v3009_v28 }
  0x9a   :  { %634 = vperm.xlu2 %2434, %v103_v56   ;;  %v581_v56 = vadd.f32 %v525_v1, %v401_v62  ;;  %v647_v1 = vmul.f32 %v2771_v6, %v2831_v39  ;;  %v546_v62 = vmul.f32 %v2700_v42, %v2896_v44  ;;  %v424_v39 = vmul.f32 %v2695_v41, %v2896_v44 }
  0x9b   :  { %510 = vperm.xlu1 %2433, %v101_v58   ;;  %v3011_v47 = vmax.f32 %v1063_v12, %v1065_v13  ;;  %v3050_v12 = vmul.f32 %v2782_v11, %v2827_v36  ;;  %v3054_v13 = vmul.f32 %v2791_v14, %v2827_v36  ;;  %4470 = vst [vmem:[#allocation26_spill] sm:$0xff] %v3108_v51 }
  0x9c   :  { %629 = vperm.xlu0 %2432, %v102_v48   ;;  %v2981_v5 = vpop.permute.xlu2 %296  ;;  %v3019_v48 = vmul.f32 %v2695_v41, %v2827_v36  ;;  %v3071_v36 = vmul.f32 %v2771_v6, %v2884_v23 }
  0x9d   :  { %v192_v21 = vpop.permute.xlu1 %191  ;;  %4466 = vst [vmem:[#allocation22_spill] sm:$0xff] %v3011_v47  ;;  %2293 = vmatmul.msk.f32.gmra.mxu0 %vm1146_vm0, %v3011_v47  ;;  %v3067_v47 = vmul.f32 %v2700_v42, %v2884_v23  ;;  %v3134_v34 = vmul.f32 %v2695_v41, %v2981_v5  ;;  %v3138_v4 = vmul.f32 %v2700_v42, %v2981_v5 }
  0x9e   :  { %v2993_v22 = vpop.permute.xlu0 %301  ;;  %v650_v58 = vmul.f32 %v2771_v6, %v192_v21  ;;  %v3145_v52 = vmul.f32 %v2771_v6, %v2981_v5  ;;  %v3153_v33 = vmul.f32 %v2782_v11, %v2981_v5 }
  0x9f   :  { %v550_v20 = vmul.f32 %v2700_v42, %v2993_v22  ;;  %v794_v24 = vmul.f32 %v2782_v11, %v2993_v22 }
  0xa0   :  { %v3046_v63 = vadd.f32 %v650_v58, %v2708_v46  ;;  %v703_v46 = vadd.f32 %v647_v1, %v579_v32  ;;  %v3063_v58 = vadd.f32 %v2902_v29, %v581_v56  ;;  %v3083_v29 = vmul.f32 %v2791_v14, %v2884_v23  ;;  %4473 = vst [vmem:[#allocation29_spill] sm:$0xff] %v3153_v33 }
  0xa1   :  { %v606_v15 = vadd.f32 %v550_v20, %v426_v43  ;;  %v3075_v43 = vmul.f32 %v2782_v11, %v2884_v23  ;;  %v3087_v32 = vmul.f32 %v2771_v6, %v2896_v44  ;;  %v3091_v56 = vmul.f32 %v2782_v11, %v2896_v44 }
  0xa2   :  { %758 = vperm.xlu2 %2434, %v105_v17   ;;  %v3104_v23 = vmul.f32 %v2700_v42, %v2898_v26 }
  0xa3   :  { %877 = vperm.xlu1 %2433, %v106_v55   ;;  %v3079_v20 = vadd.f32 %v674_v9, %v606_v15  ;;  %4467 = vst [vmem:[#allocation23_spill] sm:$0xff] %v3087_v32  ;;  %v602_v55 = vadd.f32 %v546_v62, %v422_v37  ;;  %v604_v15 = vadd.f32 %v2933_v45, %v424_v39 }
  0xa4   :  { %753 = vperm.xlu0 %2432, %v104_v50   ;;  %v3077_v17 = vpop.permute.xlu2 %196  ;;  %4468 = vst [vmem:[#allocation24_spill] sm:$0xff] %v3091_v56  ;;  %v3100_v9 = vmul.f32 %v2791_v14, %v2896_v44  ;;  %v3112_v62 = vmul.f32 %v2782_v11, %v2898_v26  ;;  %v3116_v37 = vmul.f32 %v2791_v14, %v2898_v26 }
  0xa5   :  { %v3093_v50 = vpop.permute.xlu1 %216  ;;  %v528_v45 = vmul.f32 %v2700_v42, %v192_v21  ;;  %v672_v44 = vmul.f32 %v2771_v6, %v2993_v22  ;;  %v406_v39 = vmul.f32 %v2695_v41, %v192_v21  ;;  %v3130_v26 = vadd.f32 %v2906_v30, %v703_v46 }
  0xa6   :  { %v3095_v1 = vpop.permute.xlu0 %201  ;;  %4469 = vst [vmem:[#allocation25_spill] sm:$0xff] %v3100_v9  ;;  %v726_v18 = vadd.f32 %v2937_v57, %v602_v55  ;;  %v529_v16 = vmul.f32 %v2700_v42, %v3077_v17  ;;  %v772_v30 = vmul.f32 %v2782_v11, %v192_v21  ;;  %v894_v46 = vmul.f32 %v2791_v14, %v192_v21 }
  0xa7   :  { %4471 = vst [vmem:[#allocation27_spill] sm:$0xff] %v3112_v62  ;;  %v530_v28 = vmul.f32 %v2700_v42, %v3095_v1  ;;  %v3157_v57 = vmul.f32 %v2791_v14, %v2981_v5  ;;  %v3160_v55 = vadd.f32 %v528_v45, %v2866_v3  ;;  %v728_v61 = vadd.f32 %v672_v44, %v604_v15 }
  0xa8   :  { %4472 = vst [vmem:[#allocation28_spill] sm:$0xff] %v3116_v37  ;;  %v850_v35 = vadd.f32 %v794_v24, %v726_v18  ;;  %v407_v54 = vmul.f32 %v2695_v41, %v3077_v17  ;;  %v533_v21 = vmul.f32 %v2700_v42, %v3093_v50  ;;  %v585_v37 = vadd.f32 %v529_v16, %v2892_v25 }
  0xa9   :  { %v3149_v38 = vadd.f32 %v530_v28, %v406_v39  ;;  %4474 = vst [vmem:[#allocation30_spill] sm:$0xff] %v3157_v57  ;;  %v896_v28 = vmul.f32 %v2791_v14, %v3095_v1  ;;  %v655_v24 = vmul.f32 %v2771_v6, %v3093_v50  ;;  %v828_v44 = vadd.f32 %v772_v30, %v2983_v7 }
  0xaa   :  { %v950_v25 = vadd.f32 %v894_v46, %v2985_v8  ;;  %v777_v16 = vmul.f32 %v2782_v11, %v3093_v50  ;;  %v852_v62 = vadd.f32 %v2991_v10, %v728_v61  ;;  %v974_v33 = vadd.f32 %v2997_v27, %v850_v35 }
  0xab   :  { %v952_v51 = vadd.f32 %v896_v28, %v828_v44  ;;  %v428_v61 = vmul.f32 %v2695_v41, %v2993_v22  ;;  %v411_v27 = vmul.f32 %v2695_v41, %v3093_v50 }
  0xac   :  { %882 = vperm.xlu0 %2432, %v107_v59   ;;  %v207_v39 = vpop.permute.xlu2 %206  ;;  %v1010_v46 = vadd.f32 %v2823_v31, %v950_v25 }
  0xad   :  { %v409_v5 = vmul.f32 %v2695_v41, %v207_v39  ;;  %v531_v3 = vmul.f32 %v2700_v42, %v207_v39  ;;  %v653_v15 = vmul.f32 %v2771_v6, %v207_v39  ;;  %v3172_v59 = vpop.permute.xlu1 %321  ;;  %v897_v25 = vmul.f32 %v2791_v14, %v207_v39 }
  0xae   :  { %v3174_v18 = vpop.permute.xlu0 %236  ;;  %v554_v45 = vmul.f32 %v2700_v42, %v3172_v59  ;;  %v920_v32 = vmul.f32 %v2791_v14, %v3172_v59 }
  0xaf   :  { %v587_v57 = vadd.f32 %v531_v3, %v407_v54  ;;  %v589_v9 = vadd.f32 %v533_v21, %v409_v5  ;;  %v709_v53 = vadd.f32 %v653_v15, %v585_v37  ;;  %v651_v54 = vmul.f32 %v2771_v6, %v3077_v17  ;;  %v1578_v15 = vld [vmem:[%s4418_s3 + $0x48] sm:$0xff] }
  0xb0   :  { %v3185_v56 = vadd.f32 %v554_v45, %v2975_v2  ;;  %v895_v37 = vmul.f32 %v2791_v14, %v3077_v17  ;;  %v976_v2 = vadd.f32 %v920_v32, %v852_v62  ;;  %v781_v35 = vmul.f32 %v2782_v11, %v3174_v18  ;;  %1599 = vmatpush.msrb.mxu0 %v1578_v15 }
  0xb1   :  { %v711_v7 = vadd.f32 %v655_v24, %v587_v57  ;;  %v833_v30 = vadd.f32 %v777_v16, %v709_v53  ;;  %v713_v8 = vadd.f32 %v3027_v19, %v589_v9  ;;  %v903_v53 = vmul.f32 %v2791_v14, %v3174_v18 }
  0xb2   :  { %v775_v19 = vmul.f32 %v2782_v11, %v207_v39  ;;  %v1036_v32 = vadd.f32 %v2823_v31, %v976_v2  ;;  %v1012_v9 = vadd.f32 %v2823_v31, %v952_v51  ;;  %v1034_v3 = vadd.f32 %v2823_v31, %v974_v33 }
  0xb3   :  { %v835_v10 = vadd.f32 %v3050_v12, %v711_v7  ;;  %v773_v12 = vmul.f32 %v2782_v11, %v3077_v17  ;;  %v837_v57 = vadd.f32 %v781_v35, %v713_v8  ;;  %v707_v24 = vadd.f32 %v651_v54, %v2852_v60 }
  0xb4   :  { %v3209_v62 = vpop.permute.xlu2 %251  ;;  %v1066_v45 = vmax.f32 %v1010_v46, 0.0  ;;  %v1068_v51 = vmax.f32 %v1012_v9, 0.0  ;;  %v951_v44 = vadd.f32 %v895_v37, %v3130_v26  ;;  %v3223_v17 = vmul.f32 %v2791_v14, %v2993_v22 }
  0xb5   :  { %4475 = vst [vmem:[#allocation31_spill] sm:$0xff] %v3209_v62  ;;  %v959_v21 = vadd.f32 %v903_v53, %v835_v10  ;;  %v287_v28 = vpop.permute.xlu1 %286  ;;  %v1092_v16 = vmax.f32 %v1036_v32, 0.0  ;;  %v3227_v33 = vadd.f32 %v3083_v29, %v837_v57  ;;  %v608_v7 = vadd.f32 %v2979_v0, %v428_v61 }
  0xb6   :  { %v3213_v5 = vpop.permute.xlu0 %276  ;;  %4476 = vst [vmem:[#allocation32_spill] sm:$0xff] %v3223_v17  ;;  %v591_v8 = vadd.f32 %v3023_v49, %v411_v27  ;;  %v831_v60 = vadd.f32 %v775_v19, %v707_v24  ;;  %v3231_v54 = vmax.f32 %v1066_v45, %v1068_v51  ;;  %v652_v26 = vmul.f32 %v2771_v6, %v3095_v1 }
  0xb7   :  { %v774_v22 = vmul.f32 %v2782_v11, %v3095_v1  ;;  %v829_v37 = vadd.f32 %v773_v12, %v3063_v58  ;;  %v1090_v39 = vmax.f32 %v1034_v3, 0.0  ;;  %v899_v29 = vmul.f32 %v2791_v14, %v3093_v50 }
  0xb8   :  { %4477 = vst [vmem:[#allocation33_spill] sm:$0xff] %v3231_v54  ;;  %v676_v0 = vmul.f32 %v2771_v6, %v3172_v59  ;;  %v798_v49 = vmul.f32 %v2782_v11, %v3172_v59  ;;  %2294 = vmatmul.msk.f32.gmra.mxu0 %vm1146_vm0, %v3231_v54  ;;  %v1011_v2 = vadd.f32 %v2823_v31, %v951_v44 }
  0xb9   :  { %v415_v46 = vmul.f32 %v2695_v41, %v3174_v18  ;;  %v537_v58 = vmul.f32 %v2700_v42, %v3174_v18  ;;  %v953_v61 = vadd.f32 %v897_v25, %v829_v37  ;;  %v3251_v10 = vmax.f32 %v1090_v39, %v1092_v16 }
  0xba   :  { %v408_v50 = vmul.f32 %v2695_v41, %v3095_v1  ;;  %v659_v35 = vmul.f32 %v2771_v6, %v3174_v18  ;;  %v3257_v27 = vadd.f32 %v899_v29, %v831_v60  ;;  %v3260_v19 = vadd.f32 %v3054_v13, %v833_v30 }
  0xbb   :  { %4478 = vst [vmem:[#allocation34_spill] sm:$0xff] %v3251_v10  ;;  %v708_v32 = vadd.f32 %v652_v26, %v3160_v55  ;;  %v830_v9 = vadd.f32 %v774_v22, %v3046_v63  ;;  %v3266_v12 = vmul.f32 %v2695_v41, %v3172_v59  ;;  %v1013_v57 = vadd.f32 %v2823_v31, %v953_v61 }
  0xbc   :  { %v212_v53 = vpop.permute.xlu2 %211  ;;  %2306 = vmatmul.msk.f32.vlgmr.msra.gmra.mxu3 %vm1146_vm0, %v3251_v10  ;;  %v3271_v3 = vadd.f32 %v676_v0, %v608_v7  ;;  %v3274_v13 = vadd.f32 %v798_v49, %v3079_v20  ;;  %v3277_v55 = vadd.f32 %v2823_v31, %v959_v21  ;;  %v425_v63 = vmul.f32 %v2695_v41, %v287_v28 }
  0xbd   :  { %v307_v1 = vpop.permute.xlu1 %306  ;;  %v593_v59 = vadd.f32 %v537_v58, %v3019_v48  ;;  %v3282_v30 = vadd.f32 %v3067_v47, %v415_v46  ;;  %v1067_v15 = vmax.f32 %v1011_v2, 0.0  ;;  %v1069_v24 = vmax.f32 %v1013_v57, 0.0 }
  0xbe   :  { %v257_v18 = vpop.permute.xlu0 %256  ;;  %4479 = vst [vmem:[#allocation35_spill] sm:$0xff] %v3277_v55  ;;  %v715_v45 = vadd.f32 %v659_v35, %v591_v8  ;;  %v3286_v51 = vmul.f32 %v2695_v41, %v3209_v62  ;;  %v547_v20 = vmul.f32 %v2700_v42, %v287_v28  ;;  %v423_v21 = vmul.f32 %v2695_v41, %v3213_v5 }
  0xbf   :  { %v3293_v44 = vmul.f32 %v2700_v42, %v3209_v62  ;;  %v3297_v47 = vmul.f32 %v2771_v6, %v3209_v62  ;;  %v3301_v48 = vmul.f32 %v2782_v11, %v3209_v62  ;;  %v3303_v25 = vmax.f32 %v1067_v15, %v1069_v24 }
  0xc0   :  { %v605_v7 = vadd.f32 %v3138_v4, %v425_v63  ;;  %v3308_v8 = vmul.f32 %v2771_v6, %v287_v28  ;;  %v3311_v60 = vmul.f32 %v2782_v11, %v287_v28  ;;  %v3314_v26 = vmul.f32 %v2791_v14, %v287_v28 }
  0xc1   :  { %4480 = vst [vmem:[#allocation36_spill] sm:$0xff] %v3301_v48  ;;  %v3318_v22 = vmul.f32 %v2700_v42, %v3213_v5  ;;  %v3322_v37 = vmul.f32 %v2771_v6, %v3213_v5  ;;  %2295 = vmatmul.msk.f32.gmra.mxu0 %vm1146_vm0, %v3303_v25  ;;  %v898_v4 = vmul.f32 %v2791_v14, %v212_v53 }
  0xc2   :  { %4481 = vst [vmem:[#allocation37_spill] sm:$0xff] %v3303_v25  ;;  %v603_v39 = vadd.f32 %v547_v20, %v423_v21  ;;  %v3329_v29 = vmul.f32 %v2782_v11, %v3213_v5  ;;  %v532_v28 = vmul.f32 %v2700_v42, %v212_v53  ;;  %v907_v0 = vmul.f32 %v2791_v14, %v257_v18 }
  0xc3   :  { %v654_v2 = vmul.f32 %v2771_v6, %v212_v53  ;;  %v776_v46 = vmul.f32 %v2782_v11, %v212_v53  ;;  %v551_v58 = vmul.f32 %v2700_v42, %v307_v1  ;;  %v673_v61 = vmul.f32 %v2771_v6, %v307_v1 }
  0xc4   :  { %v342_v49 = vpop.permute.xlu2 %341  ;;  %v3341_v63 = vmul.f32 %v2791_v14, %v3213_v5  ;;  %v795_v15 = vmul.f32 %v2782_v11, %v307_v1  ;;  %v717_v24 = vadd.f32 %v3071_v36, %v593_v59  ;;  %v839_v20 = vadd.f32 %v3075_v43, %v715_v45 }
  0xc5   :  { %v3337_v35 = vpop.permute.xlu1 %316  ;;  %v3347_v21 = vmul.f32 %v2695_v41, %v212_v53  ;;  %v954_v16 = vadd.f32 %v898_v4, %v830_v9  ;;  %v429_v10 = vmul.f32 %v2695_v41, %v307_v1  ;;  %v785_v25 = vmul.f32 %v2782_v11, %v257_v18  ;;  %v1473_v9 = vld [vmem:[%s4418_s3 + $0x38] sm:$0xff] }
  0xc6   :  { %v267_v57 = vpop.permute.xlu0 %266  ;;  %v3351_v54 = vadd.f32 %v532_v28, %v408_v50  ;;  %v727_v48 = vadd.f32 %v3145_v52, %v603_v39  ;;  %v541_v5 = vmul.f32 %v2700_v42, %v257_v18  ;;  %v963_v62 = vadd.f32 %v907_v0, %v839_v20  ;;  %1494 = vmatpush.msrb.mxu3 %v1473_v9 }
  0xc7   :  { %v3356_v55 = vadd.f32 %v654_v2, %v3149_v38  ;;  %v3358_v36 = vadd.f32 %v776_v46, %v708_v32  ;;  %v607_v43 = vadd.f32 %v551_v58, %v3134_v34  ;;  %v729_v53 = vadd.f32 %v673_v61, %v605_v7 }
  0xc8   :  { %v851_v59 = vadd.f32 %v795_v15, %v727_v48  ;;  %v3365_v50 = vmul.f32 %v2791_v14, %v307_v1  ;;  %v419_v52 = vmul.f32 %v2695_v41, %v257_v18  ;;  %v663_v45 = vmul.f32 %v2771_v6, %v257_v18 }
  0xc9   :  { %v841_v38 = vadd.f32 %v785_v25, %v717_v24  ;;  %v919_v32 = vmul.f32 %v2791_v14, %v3337_v35  ;;  %v909_v34 = vmul.f32 %v2791_v14, %v267_v57  ;;  %v3373_v7 = vadd.f32 %v2823_v31, %v954_v16 }
  0xca   :  { %4482 = vst [vmem:[#allocation38_spill] sm:$0xff] %v3365_v50  ;;  %v597_v4 = vadd.f32 %v541_v5, %v3060_v40  ;;  %v1023_v48 = vadd.f32 %v2823_v31, %v963_v62  ;;  %v436_v1 = vmul.f32 %v2695_v41, %v342_v49  ;;  %v3382_v18 = vadd.f32 %v2823_v31, %v3257_v27 }
  0xcb   :  { %v421_v25 = vmul.f32 %v2695_v41, %v267_v57  ;;  %v543_v28 = vmul.f32 %v2700_v42, %v267_v57  ;;  %v965_v0 = vadd.f32 %v909_v34, %v841_v38  ;;  %v719_v62 = vadd.f32 %v663_v45, %v3282_v30 }
  0xcc   :  { %v3378_v39 = vpop.permute.xlu2 %351  ;;  %v3394_v46 = vmul.f32 %v2700_v42, %v342_v49  ;;  %v553_v27 = vmul.f32 %v2700_v42, %v3337_v35  ;;  %v3400_v58 = vadd.f32 %v2823_v31, %v3260_v19  ;;  %v975_v61 = vadd.f32 %v919_v32, %v851_v59 }
  0xcd   :  { %4483 = vst [vmem:[#allocation39_spill] sm:$0xff] %v3378_v39  ;;  %v560_v16 = vmul.f32 %v2700_v42, %v3378_v39  ;;  %v3388_v2 = vpop.permute.xlu1 %241  ;;  %v665_v15 = vmul.f32 %v2771_v6, %v267_v57  ;;  %v1025_v24 = vadd.f32 %v2823_v31, %v965_v0  ;;  %v1079_v5 = vmax.f32 %v1023_v48, 0.0 }
  0xce   :  { %4484 = vst [vmem:[#allocation40_spill] sm:$0xff] %v3388_v2  ;;  %v3390_v40 = vpop.permute.xlu0 %231  ;;  %v675_v30 = vmul.f32 %v2771_v6, %v3337_v35  ;;  %v797_v9 = vmul.f32 %v2782_v11, %v3337_v35  ;;  %v538_v45 = vmul.f32 %v2700_v42, %v3388_v2  ;;  %v599_v38 = vadd.f32 %v543_v28, %v419_v52 }
  0xcf   :  { %v3404_v20 = vadd.f32 %v560_v16, %v436_v1  ;;  %v601_v19 = vadd.f32 %v3318_v22, %v421_v25  ;;  %v1081_v59 = vmax.f32 %v1025_v24, 0.0  ;;  %v414_v32 = vmul.f32 %v2695_v41, %v3390_v40  ;;  %v1368_v22 = vld [vmem:[%s4418_s3 + $0x28] sm:$0xff] }
  0xd0   :  { %v3416_v34 = vmul.f32 %v2771_v6, %v342_v49  ;;  %v3419_v48 = vmul.f32 %v2782_v11, %v342_v49  ;;  %v3422_v1 = vmul.f32 %v2791_v14, %v342_v49  ;;  %v416_v0 = vmul.f32 %v2695_v41, %v3388_v2  ;;  %1389 = vmatpush.msrb.mxu2 %v1368_v22 }
  0xd1   :  { %4485 = vst [vmem:[#allocation41_spill] sm:$0xff] %v3404_v20  ;;  %v3430_v52 = vadd.f32 %v2823_v31, %v975_v61  ;;  %v721_v25 = vadd.f32 %v665_v15, %v597_v4  ;;  %v787_v28 = vmul.f32 %v2782_v11, %v267_v57  ;;  %v3433_v16 = vmax.f32 %v1079_v5, %v1081_v59 }
  0xd2   :  { %4486 = vst [vmem:[#allocation42_spill] sm:$0xff] %v3419_v48  ;;  %v3437_v49 = vmul.f32 %v2695_v41, %v3337_v35  ;;  %v3439_v24 = vadd.f32 %v553_v27, %v429_v10  ;;  %v3441_v50 = vadd.f32 %v675_v30, %v607_v43  ;;  %v594_v17 = vadd.f32 %v538_v45, %v414_v32  ;;  %v4490_v32 = vld [vmem:[#allocation26_spill] sm:$0xff] }
  0xd3   :  { %4487 = vst [vmem:[#allocation43_spill] sm:$0xff] %v3433_v16  ;;  %v853_v20 = vadd.f32 %v797_v9, %v729_v53  ;;  %v723_v48 = vadd.f32 %v3322_v37, %v599_v38  ;;  %v725_v61 = vadd.f32 %v3308_v8, %v601_v19  ;;  %2301 = vmatmul.msk.f32.vlgmr.msra.gmra.mxu2 %vm1146_vm0, %v3433_v16  ;;  %v1091_v8 = vmax.f32 %v3430_v52, 0.0  ;;  %v4489_v19 = vld [vmem:[#allocation29_spill] sm:$0xff]  ;;  %v4492_v52 = vld [vmem:[#allocation27_spill] sm:$0xff] }
  0xd4   :  { %v596_v35 = vadd.f32 %v3293_v44, %v416_v0  ;;  %v843_v53 = vadd.f32 %v787_v28, %v719_v62  ;;  %v845_v27 = vadd.f32 %v3329_v29, %v721_v25  ;;  %v718_v9 = vadd.f32 %v3297_v47, %v594_v17 }
  0xd5   :  { %v3447_v57 = vpop.permute.xlu1 %261  ;;  %v3465_v38 = vadd.f32 %v3311_v60, %v723_v48  ;;  %v3468_v59 = vadd.f32 %v4489_v19, %v725_v61  ;;  %v3472_v62 = vmul.f32 %v2695_v41, %v3378_v39  ;;  %v3482_v48 = vmul.f32 %v2782_v11, %v3378_v39  ;;  %v4493_v61 = vld [vmem:[#allocation24_spill] sm:$0xff] }
  0xd6   :  { %4488 = vst [vmem:[#allocation44_spill] sm:$0xff] %v3447_v57  ;;  %v327_v4 = vpop.permute.xlu0 %326  ;;  %v420_v10 = vmul.f32 %v2695_v41, %v3447_v57  ;;  %v542_v43 = vmul.f32 %v2700_v42, %v3447_v57  ;;  %v664_v37 = vmul.f32 %v2771_v6, %v3447_v57  ;;  %v786_v5 = vmul.f32 %v2782_v11, %v3447_v57  ;;  %v4498_v19 = vld [vmem:[#allocation28_spill] sm:$0xff] }
  0xd7   :  { %v921_v29 = vmul.f32 %v2791_v14, %v327_v4  ;;  %v967_v47 = vadd.f32 %v3341_v63, %v843_v53  ;;  %v969_v60 = vadd.f32 %v3314_v26, %v845_v27  ;;  %v3486_v28 = vmul.f32 %v2791_v14, %v3378_v39 }
  0xd8   :  { %v598_v30 = vadd.f32 %v542_v43, %v3286_v51  ;;  %v600_v44 = vadd.f32 %v3104_v23, %v420_v10  ;;  %v720_v45 = vadd.f32 %v664_v37, %v596_v35  ;;  %v4491_v51 = vld [vmem:[#allocation23_spill] sm:$0xff]  ;;  %v842_v23 = vadd.f32 %v786_v5, %v718_v9  ;;  %v4494_v10 = vld [vmem:[#allocation14_spill] sm:$0xff]  ;;  %v4495_v37 = vld [vmem:[#allocation25_spill] sm:$0xff] }
  0xd9   :  { %v977_v25 = vadd.f32 %v921_v29, %v853_v20  ;;  %v3497_v26 = vmul.f32 %v2771_v6, %v3388_v2  ;;  %v3501_v63 = vmul.f32 %v2791_v14, %v3388_v2  ;;  %v3505_v20 = vmul.f32 %v2700_v42, %v3390_v40 }
  0xda   :  { %v722_v0 = vadd.f32 %v4490_v32, %v598_v30  ;;  %v724_v22 = vadd.f32 %v4491_v51, %v600_v44  ;;  %v844_v17 = vadd.f32 %v4492_v52, %v720_v45  ;;  %v658_v44 = vmul.f32 %v2771_v6, %v3390_v40  ;;  %v3512_v45 = vpop.permute.xlu2 %366 }
  0xdb   :  { %4496 = vst [vmem:[#allocation29_spill] sm:$0xff] %v3497_v26  ;;  %v1037_v53 = vadd.f32 %v2823_v31, %v977_v25  ;;  %v780_v9 = vmul.f32 %v2782_v11, %v3390_v40  ;;  %v966_v29 = vadd.f32 %v4498_v19, %v842_v23  ;;  %v555_v32 = vmul.f32 %v2700_v42, %v327_v4 }
  0xdc   :  { %v3489_v35 = vadd.f32 %v4493_v61, %v722_v0  ;;  %v3492_v43 = vadd.f32 %v4494_v10, %v724_v22  ;;  %v968_v5 = vadd.f32 %v4495_v37, %v844_v17  ;;  %4497 = vst [vmem:[#allocation26_spill] sm:$0xff] %v3512_v45  ;;  %v1577_v0 = vld [vmem:[%s4418_s3 + $0x40] sm:$0xff]  ;;  %v902_v51 = vmul.f32 %v2791_v14, %v3390_v40 }
  0xdd   :  { %v222_v27 = vpop.permute.xlu1 %221  ;;  %v3523_v52 = vadd.f32 %v2823_v31, %v967_v47  ;;  %v3526_v17 = vadd.f32 %v2823_v31, %v969_v60  ;;  %1600 = vmatpush.msrb.mxu0 %v1577_v0  ;;  %v677_v23 = vmul.f32 %v2771_v6, %v327_v4  ;;  %v799_v25 = vmul.f32 %v2782_v11, %v327_v4 }
  0xde   :  { %v332_v30 = vpop.permute.xlu0 %331  ;;  %v1093_v61 = vmax.f32 %v1037_v53, 0.0  ;;  %v3533_v37 = vmul.f32 %v2700_v42, %v3512_v45  ;;  %v3536_v40 = vmul.f32 %v2695_v41, %v327_v4  ;;  %v3543_v60 = vadd.f32 %v2823_v31, %v3227_v33  ;;  %v1472_v33 = vld [vmem:[%s4418_s3 + $0x30] sm:$0xff] }
  0xdf   :  { %v434_v22 = vmul.f32 %v2695_v41, %v332_v30  ;;  %v3546_v19 = vadd.f32 %v555_v32, %v3437_v49  ;;  %v534_v53 = vmul.f32 %v2700_v42, %v222_v27  ;;  %v656_v0 = vmul.f32 %v2771_v6, %v222_v27  ;;  %1495 = vmatpush.msrb.mxu3 %v1472_v33 }
  0xe0   :  { %v1026_v10 = vadd.f32 %v2823_v31, %v966_v29  ;;  %v778_v15 = vmul.f32 %v2782_v11, %v222_v27  ;;  %v900_v4 = vmul.f32 %v2791_v14, %v222_v27  ;;  %v733_v49 = vadd.f32 %v677_v23, %v3439_v24 }
  0xe1   :  { %v3539_v47 = vadd.f32 %v3394_v46, %v434_v22  ;;  %v800_v46 = vmul.f32 %v2782_v11, %v332_v30  ;;  %v922_v22 = vmul.f32 %v2791_v14, %v332_v30  ;;  %v855_v32 = vadd.f32 %v799_v25, %v3441_v50 }
  0xe2   :  { %v556_v16 = vmul.f32 %v2700_v42, %v332_v30  ;;  %v1028_v57 = vadd.f32 %v2823_v31, %v968_v5  ;;  %v1083_v2 = vmax.f32 %v3523_v52, 0.0  ;;  %v412_v24 = vmul.f32 %v2695_v41, %v222_v27 }
  0xe3   :  { %4499 = vst [vmem:[#allocation23_spill] sm:$0xff] %v3539_v47  ;;  %v3561_v47 = vmax.f32 %v1091_v8, %v1093_v61  ;;  %v856_v29 = vadd.f32 %v800_v46, %v3271_v3  ;;  %v978_v39 = vadd.f32 %v922_v22, %v3274_v13  ;;  %v590_v50 = vadd.f32 %v534_v53, %v3347_v21  ;;  %v1367_v13 = vld [vmem:[%s4418_s3 + $0x20] sm:$0xff] }
  0xe4   :  { %v712_v23 = vadd.f32 %v656_v0, %v3351_v54  ;;  %v834_v8 = vadd.f32 %v778_v15, %v3356_v55  ;;  %v956_v5 = vadd.f32 %v900_v4, %v3358_v36  ;;  %v1082_v52 = vmax.f32 %v1026_v10, 0.0  ;;  %1390 = vmatpush.msrb.mxu2 %v1367_v13 }
  0xe5   :  { %v3566_v26 = vpop.permute.xlu1 %346  ;;  %2307 = vmatmul.msk.f32.gmra.mxu3 %vm1146_vm0, %v3561_v47  ;;  %v1084_v41 = vmax.f32 %v1028_v57, 0.0  ;;  %v612_v21 = vadd.f32 %v556_v16, %v3266_v12  ;;  %v678_v54 = vmul.f32 %v2771_v6, %v332_v30  ;;  %v980_v27 = vadd.f32 %v3422_v1, %v856_v29 }
  0xe6   :  { %v337_v45 = vpop.permute.xlu0 %336  ;;  %v559_v3 = vmul.f32 %v2700_v42, %v3566_v26  ;;  %v3587_v42 = vld [vmem:[%s4416_s1] ss:$0 sm:$0xff]  ;;  %v1038_v55 = vadd.f32 %v2823_v31, %v978_v39  ;;  %v3596_v12 = vadd.f32 %v3505_v20, %v412_v24  ;;  %v3598_v16 = vadd.f32 %v658_v44, %v590_v50  ;;  %v1143_v44 = vld [vmem:[%s4418_s3 + $0x8] sm:$0xff] }
  0xe7   :  { %v435_v25 = vmul.f32 %v3587_v42, %v337_v45  ;;  %v3591_v15 = vmax.f32 %v1082_v52, %v1084_v41  ;;  %v801_v36 = vmul.f32 %v2782_v11, %v337_v45  ;;  %v923_v57 = vmul.f32 %v2791_v14, %v337_v45  ;;  %v3608_v11 = vld [vmem:[%s4416_s1 + $0x1] ss:$0 sm:$0xff]  ;;  %1304 = vmatpush.msra.mxu1 %v1143_v44 }
  0xe8   :  { %v1085_v30 = vmax.f32 %v3526_v17, 0.0  ;;  %v836_v61 = vadd.f32 %v780_v9, %v712_v23  ;;  %v3601_v10 = vadd.f32 %v902_v51, %v834_v8  ;;  %v557_v39 = vmul.f32 %v3608_v11, %v337_v45  ;;  %v1142_v50 = vld [vmem:[%s4418_s3] sm:$0xff] }
  0xe9   :  { %v615_v1 = vadd.f32 %v559_v3, %v435_v25  ;;  %2302 = vmatmul.msk.f32.gmra.mxu2 %vm1146_vm0, %v3591_v15  ;;  %v979_v20 = vadd.f32 %v923_v57, %v855_v32  ;;  %v734_v17 = vadd.f32 %v678_v54, %v3185_v56  ;;  %v736_v9 = vadd.f32 %v3416_v34, %v612_v21 }
  0xea   :  { %v1016_v51 = vadd.f32 %v2823_v31, %v956_v5  ;;  %v1040_v53 = vadd.f32 %v2823_v31, %v980_v27  ;;  %v1094_v0 = vmax.f32 %v1038_v55, 0.0  ;;  %v437_v4 = vmul.f32 %v3587_v42, %v3566_v26  ;;  %1305 = vmatpush.msra.mxu1 %v1142_v50  ;;  %v4501_v27 = vld [vmem:[#allocation42_spill] sm:$0xff]  ;;  %v3669_v55 = vld [vmem:[%s4416_s1 + $0x3] ss:$0 sm:$0xff] }
  0xeb   :  { %v925_v46 = vmul.f32 %v2791_v14, %v3566_v26  ;;  %v857_v22 = vadd.f32 %v801_v36, %v733_v49  ;;  %v613_v23 = vadd.f32 %v557_v39, %v3536_v40  ;;  %v679_v3 = vmul.f32 %v2771_v6, %v337_v45 }
  0xec   :  { %v1072_v29 = vmax.f32 %v1016_v51, 0.0  ;;  %v1096_v56 = vmax.f32 %v1040_v53, 0.0  ;;  %v1039_v14 = vadd.f32 %v2823_v31, %v979_v20  ;;  %v4500_v13 = vmax.f32 %v3373_v7, 0.0  ;;  %v4502_v20 = vld [vmem:[#allocation41_spill] sm:$0xff] }
  0xed   :  { %v357_v33 = vpop.permute.xlu1 %356  ;;  %v960_v40 = vadd.f32 %v3501_v63, %v836_v61  ;;  %v981_v21 = vadd.f32 %v925_v46, %v857_v22  ;;  %v3645_v45 = vmax.f32 %v1083_v2, %v1085_v30  ;;  %v858_v25 = vadd.f32 %v4501_v27, %v734_v17  ;;  %v4504_v46 = vld [vmem:[#allocation15_spill] sm:$0xff] }
  0xee   :  { %v3622_v32 = vpop.permute.xlu0 %361  ;;  %v439_v34 = vmul.f32 %v3587_v42, %v357_v33  ;;  %v561_v24 = vmul.f32 %v3608_v11, %v357_v33  ;;  %v683_v49 = vmul.f32 %v2771_v6, %v357_v33  ;;  %v3635_v8 = vmax.f32 %v4500_v13, %v1072_v29  ;;  %v3652_v6 = vld [vmem:[%s4416_s1 + $0x2] ss:$0 sm:$0xff] }
  0xef   :  { %v3637_v5 = vmax.f32 %v1094_v0, %v1096_v56  ;;  %v681_v7 = vmul.f32 %v3652_v6, %v3566_v26  ;;  %v562_v2 = vmul.f32 %v3608_v11, %v3622_v32  ;;  %v684_v63 = vmul.f32 %v3652_v6, %v3622_v32 }
  0xf0   :  { %v3639_v52 = vadd.f32 %v561_v24, %v437_v4  ;;  %v3642_v41 = vadd.f32 %v3533_v37, %v439_v34  ;;  %v3647_v54 = vadd.f32 %v683_v49, %v615_v1  ;;  %2296 = vmatmul.msk.f32.gmra.mxu0 %vm1146_vm0, %v3635_v8  ;;  %v1071_v37 = vmax.f32 %v3382_v18, 0.0  ;;  %v3679_v1 = vld [vmem:[%s4416_s1 + $0x4] ss:$0 sm:$0xff] }
  0xf1   :  { %2308 = vmatmul.msk.f32.gmra.mxu3 %vm1146_vm0, %v3637_v5  ;;  %v803_v36 = vmul.f32 %v3669_v55, %v3566_v26  ;;  %v735_v57 = vadd.f32 %v679_v3, %v3546_v19  ;;  %2303 = vmatmul.msk.f32.gmra.mxu2 %vm1146_vm0, %v3645_v45  ;;  %v928_v18 = vmul.f32 %v3679_v1, %v3622_v32  ;;  %v1095_v30 = vmax.f32 %v1039_v14, 0.0 }
  0xf2   :  { %v737_v61 = vadd.f32 %v681_v7, %v613_v23  ;;  %v3684_v39 = vadd.f32 %v562_v2, %v3472_v62  ;;  %v3687_v26 = vadd.f32 %v684_v63, %v4502_v20  ;;  %v805_v19 = vmul.f32 %v3669_v55, %v357_v33  ;;  %v4505_v62 = vld [vmem:[#allocation32_spill] sm:$0xff]  ;;  %v4507_v2 = vld [vmem:[#allocation17_spill] sm:$0xff]  ;;  %v4510_v20 = vld [vmem:[#allocation30_spill] sm:$0xff] }
  0xf3   :  { %v860_v44 = vadd.f32 %v3482_v48, %v736_v9  ;;  %v4503_v17 = vmax.f32 %v3400_v58, 0.0  ;;  %v1041_v53 = vadd.f32 %v2823_v31, %v981_v21  ;;  %v970_v22 = vadd.f32 %v4504_v46, %v3489_v35  ;;  %v3706_v31 = vld [vmem:[%s4417_s2] ss:$0 sm:$0xff]  ;;  %v4506_v23 = vld [vmem:[#allocation12_spill] sm:$0xff] }
  0xf4   :  { %v972_v29 = vadd.f32 %v4505_v62, %v3492_v43  ;;  %v859_v24 = vadd.f32 %v803_v36, %v735_v57  ;;  %v927_v48 = vmul.f32 %v3679_v1, %v357_v33  ;;  %v1018_v33 = vadd.f32 %v3706_v31, %v3601_v10 }
  0xf5   :  { %v3693_v51 = vmax.f32 %v1071_v37, %v4503_v17  ;;  %v122_v0 = vpop.permute.xlu1 %121  ;;  %v984_v58 = vadd.f32 %v928_v18, %v860_v44  ;;  %v1097_v9 = vmax.f32 %v1041_v53, 0.0  ;;  %v1030_v50 = vadd.f32 %v3706_v31, %v970_v22  ;;  %v4509_v18 = vld [vmem:[#allocation13_spill] sm:$0xff]  ;;  %v117_v22 = vpop.permute.xlu2 %116 }
  0xf6   :  { %v112_v4 = vpop.permute.xlu0 %111  ;;  %v392_v56 = vmul.f32 %v3587_v42, %v122_v0  ;;  %v514_v34 = vmul.f32 %v3608_v11, %v122_v0  ;;  %v1032_v35 = vadd.f32 %v3706_v31, %v972_v29  ;;  %v1020_v49 = vadd.f32 %v3706_v31, %v960_v40  ;;  %v4512_v29 = vld [vmem:[#allocation18_spill] sm:$0xff] }
  0xf7   :  { %v390_v3 = vmul.f32 %v3587_v42, %v112_v4  ;;  %v3712_v14 = vmax.f32 %v1095_v30, %v1097_v9  ;;  %v982_v13 = vadd.f32 %v3486_v28, %v858_v25  ;;  %v1086_v21 = vmax.f32 %v1030_v50, 0.0  ;;  %v4508_v28 = vld [vmem:[#allocation10_spill] sm:$0xff] }
  0xf8   :  { %v572_v43 = vadd.f32 %v4506_v23, %v392_v56  ;;  %2297 = vmatmul.msk.f32.gmra.mxu0 %vm1146_vm0, %v3693_v51  ;;  %v1088_v7 = vmax.f32 %v1032_v35, 0.0  ;;  %v1074_v27 = vmax.f32 %v1018_v33, 0.0  ;;  %v1076_v36 = vmax.f32 %v1020_v49, 0.0  ;;  %v4511_v4 = vld [vmem:[#allocation38_spill] sm:$0xff] }
  0xf9   :  { %v570_v37 = vadd.f32 %v514_v34, %v390_v3  ;;  %2309 = vmatmul.msk.f32.gmra.mxu3 %vm1146_vm0, %v3712_v14  ;;  %v1042_v57 = vadd.f32 %v3706_v31, %v982_v13  ;;  %v1044_v10 = vadd.f32 %v3706_v31, %v984_v58  ;;  %v971_v44 = vadd.f32 %v4510_v20, %v3465_v38  ;;  %v4513_v38 = vld [vmem:[#allocation40_spill] sm:$0xff] }
  0xfa   :  { %v696_v63 = vadd.f32 %v4507_v2, %v572_v43  ;;  %v3725_v40 = vmax.f32 %v1086_v21, %v1088_v7  ;;  %v3731_v17 = vmax.f32 %v1074_v27, %v1076_v36  ;;  %v973_v46 = vadd.f32 %v4511_v4, %v3468_v59  ;;  %v4514_v43 = vld [vmem:[#allocation26_spill] sm:$0xff]  ;;  %v4516_v2 = vld [vmem:[#allocation35_spill] sm:$0xff] }
  0xfb   :  { %v694_v30 = vadd.f32 %v4509_v18, %v570_v37  ;;  %v1098_v53 = vmax.f32 %v1042_v57, 0.0  ;;  %v1100_v0 = vmax.f32 %v1044_v10, 0.0  ;;  %v861_v62 = vadd.f32 %v805_v19, %v737_v61  ;;  %v4518_v36 = vld [vmem:[#allocation31_spill] sm:$0xff]  ;;  %v4519_v57 = vld [vmem:[#allocation20_spill] sm:$0xff] }
  0xfc   :  { %v820_v25 = vadd.f32 %v4508_v28, %v696_v63  ;;  %2304 = vmatmul.msk.f32.gmra.mxu2 %vm1146_vm0, %v3725_v40  ;;  %v1031_v34 = vadd.f32 %v3706_v31, %v971_v44  ;;  %v1077_v9 = vmax.f32 %v3543_v60, 0.0  ;;  %v782_v50 = vmul.f32 %v3669_v55, %v4513_v38  ;;  %v4515_v60 = vld [vmem:[#allocation29_spill] sm:$0xff]  ;;  %v4521_v4 = vld [vmem:[#allocation19_spill] sm:$0xff] }
  0xfd   :  { %v818_v56 = vadd.f32 %v4512_v29, %v694_v30  ;;  %v983_v35 = vadd.f32 %v927_v48, %v859_v24  ;;  %v3742_v23 = vmax.f32 %v1098_v53, %v1100_v0  ;;  %v1033_v59 = vadd.f32 %v3706_v31, %v973_v46  ;;  %v4520_v53 = vld [vmem:[#allocation6_spill] sm:$0xff]  ;;  %v4523_v29 = vld [vmem:[#allocation16_spill] sm:$0xff] }
  0xfe   :  { %v127_v58 = vpop.permute.xlu0 %126  ;;  %v685_v61 = vmul.f32 %v3652_v6, %v4514_v43  ;;  %v807_v19 = vmul.f32 %v3669_v55, %v4514_v43  ;;  %v929_v3 = vmul.f32 %v3679_v1, %v4514_v43  ;;  %v1087_v33 = vmax.f32 %v1031_v34, 0.0 }
  0xff   :  { %v716_v49 = vadd.f32 %v4515_v60, %v3596_v12  ;;  %v391_v13 = vmul.f32 %v3587_v42, %v117_v22  ;;  %v1089_v24 = vmax.f32 %v1033_v59, 0.0  ;;  %v393_v48 = vmul.f32 %v3587_v42, %v127_v58  ;;  %v4522_v22 = vld [vmem:[#allocation11_spill] sm:$0xff] }
 0x100   :  { %v838_v21 = vadd.f32 %v782_v50, %v3598_v16  ;;  %2298 = vmatmul.msk.f32.gmra.mxu0 %vm1146_vm0, %v3731_v17  ;;  %v515_v7 = vmul.f32 %v3608_v11, %v127_v58  ;;  %v4517_v63 = vmax.f32 %v4516_v2, 0.0  ;;  %v985_v27 = vadd.f32 %v929_v3, %v861_v62  ;;  %v4524_v58 = vld [vmem:[#allocation36_spill] sm:$0xff]  ;;  %v4528_v2 = vld [vmem:[#allocation33_spill] sm:$0xff] }
 0x101   :  { %v906_v12 = vmul.f32 %v3679_v1, %v4518_v36  ;;  %2310 = vmatmul.msk.f32.gmra.mxu3 %vm1146_vm0, %v3742_v23  ;;  %v573_v10 = vadd.f32 %v4519_v57, %v393_v48  ;;  %v1043_v16 = vadd.f32 %v3706_v31, %v983_v35  ;;  %v3770_v28 = vadd.f32 %v685_v61, %v3639_v52  ;;  %v4529_v36 = vld [vmem:[#allocation5_spill] sm:$0xff] }
 0x102   :  { %v3761_v37 = vmax.f32 %v4517_v63, %v1077_v9  ;;  %v3772_v18 = vmax.f32 %v1087_v33, %v1089_v24  ;;  %v571_v30 = vadd.f32 %v515_v7, %v391_v13  ;;  %v1045_v20 = vadd.f32 %v3706_v31, %v985_v27  ;;  %v4525_v9 = vld [vmem:[#allocation21_spill] sm:$0xff] }
 0x103   :  { %v3776_v44 = vadd.f32 %v807_v19, %v3647_v54  ;;  %v763_v0 = vmul.f32 %v3669_v55, %v4520_v53  ;;  %v697_v46 = vadd.f32 %v4521_v4, %v573_v10  ;;  %v942_v62 = vadd.f32 %v4522_v22, %v818_v56  ;;  %v4526_v54 = vld [vmem:[#allocation9_spill] sm:$0xff]  ;;  %v4527_v19 = vld [vmem:[#allocation44_spill] sm:$0xff]  ;;  %v4530_v10 = vld [vmem:[#allocation7_spill] sm:$0xff] }
 0x104   :  { %v944_v34 = vadd.f32 %v4523_v29, %v820_v25  ;;  %v840_v52 = vadd.f32 %v4524_v58, %v716_v49  ;;  %2305 = vmatmul.msk.f32.gmra.mxu2 %vm1146_vm0, %v3772_v18  ;;  %v695_v38 = vadd.f32 %v4525_v9, %v571_v30  ;;  %v1101_v50 = vmax.f32 %v1045_v20, 0.0  ;;  %v4531_v20 = vld [vmem:[#allocation39_spill] sm:$0xff] }
 0x105   :  { %v962_v35 = vadd.f32 %v906_v12, %v838_v21  ;;  %v821_v59 = vadd.f32 %v4526_v54, %v697_v46  ;;  %v1099_v61 = vmax.f32 %v1043_v16, 0.0  ;;  %v908_v3 = vmul.f32 %v3679_v1, %v4527_v19 }
 0x106   :  { %v819_v33 = vadd.f32 %v763_v0, %v695_v38  ;;  %v1002_v25 = vadd.f32 %v3706_v31, %v942_v62  ;;  %v1004_v56 = vadd.f32 %v3706_v31, %v944_v34  ;;  %v887_v12 = vmul.f32 %v3679_v1, %v4529_v36  ;;  %v4532_v62 = vld [vmem:[#allocation23_spill] sm:$0xff]  ;;  %v4533_v34 = vld [vmem:[#allocation37_spill] sm:$0xff]  ;;  %v3833_v54 = vpop.permute.xlu0 %376 }
 0x107   :  { %v3790_v60 = vmax.f32 %v1099_v61, %v1101_v50  ;;  %v964_v49 = vadd.f32 %v908_v3, %v840_v52  ;;  %v1022_v13 = vadd.f32 %v3706_v31, %v962_v35  ;;  %v889_v16 = vmul.f32 %v3679_v1, %v4530_v10  ;;  %v3822_v52 = vpop.permute.xlu1 %371  ;;  %v3829_v35 = vpop.permute.xlu2 %381 }
 0x108   :  { %2299 = vmatmul.msk.f32.gmra.mxu0 %vm1146_vm0, %v3761_v37  ;;  %v1058_v24 = vmax.f32 %v1002_v25, 0.0  ;;  %v1060_v48 = vmax.f32 %v1004_v56, 0.0  ;;  %v943_v30 = vadd.f32 %v887_v12, %v819_v33  ;;  %v682_v53 = vmul.f32 %v3652_v6, %v4531_v20  ;;  %v4534_v33 = vld [vmem:[#allocation8_spill] sm:$0xff] }
 0x109   :  { %2311 = vmatmul.msk.f32.gmra.mxu3 %vm1146_vm0, %v3790_v60  ;;  %v1024_v21 = vadd.f32 %v3706_v31, %v964_v49  ;;  %v1078_v7 = vmax.f32 %v1022_v13, 0.0  ;;  %v945_v0 = vadd.f32 %v889_v16, %v821_v59  ;;  %v806_v4 = vmul.f32 %v3669_v55, %v3622_v32 }
 0x10a   :  { %v1114_v63 = vmax.f32 %v1058_v24, %v1060_v48  ;;  %v1003_v46 = vadd.f32 %v3706_v31, %v943_v30  ;;  %v738_v29 = vadd.f32 %v682_v53, %v4532_v62  ;;  %v564_v61 = vmul.f32 %v3608_v11, %v3822_v52 }
 0x10b   :  { %v1080_v27 = vmax.f32 %v1024_v21, 0.0  ;;  %v1005_v22 = vadd.f32 %v3706_v31, %v945_v0  ;;  %v808_v19 = vmul.f32 %v3669_v55, %v3822_v52  ;;  %v930_v3 = vmul.f32 %v3679_v1, %v3822_v52 }
 0x10c   :  { %2332 = vmatmul.msk.f32.vlgmr.msrb.gmra.mxu2 %vm1146_vm0, %v4528_v2  ;;  %2312 = vmatmul.msk.f32.vlgmr.msra.gmra.mxu1 %vm1146_vm0, %v1114_v63  ;;  %v1059_v58 = vmax.f32 %v1003_v46, 0.0  ;;  %v862_v38 = vadd.f32 %v806_v4, %v738_v29  ;;  %v440_v25 = vmul.f32 %v3587_v42, %v3622_v32  ;;  %v686_v56 = vmul.f32 %v3652_v6, %v3822_v52 }
 0x10d   :  { %v3805_v57 = vmax.f32 %v1078_v7, %v1080_v27  ;;  %v1061_v9 = vmax.f32 %v1005_v22, 0.0  ;;  %v932_v49 = vmul.f32 %v3679_v1, %v3829_v35  ;;  %v864_v48 = vadd.f32 %v808_v19, %v3687_v26  ;;  %v4535_v22 = vld [vmem:[#allocation22_spill] sm:$0xff] }
 0x10e   :  { %v620_v24 = vadd.f32 %v564_v61, %v440_v25  ;;  %v986_v21 = vadd.f32 %v930_v3, %v862_v38  ;;  %v565_v7 = vmul.f32 %v3608_v11, %v3833_v54  ;;  %v809_v32 = vmul.f32 %v3669_v55, %v3833_v54  ;;  %v3872_v16 = vpop.permute.xlu0 %629 }
 0x10f   :  { %v1115_v50 = vmax.f32 %v1059_v58, %v1061_v9  ;;  %v3835_v59 = vpop.permute.xlu1 %386  ;;  %v3855_v13 = vpop.permute.xlu2 %505  ;;  %v688_v63 = vmul.f32 %v3652_v6, %v3829_v35  ;;  %v931_v27 = vmul.f32 %v3679_v1, %v3833_v54  ;;  %v988_v36 = vadd.f32 %v932_v49, %v864_v48 }
 0x110   :  { %2300 = vmatmul.msk.f32.gmra.mxu0 %vm1146_vm0, %v3805_v57  ;;  %v1046_v12 = vadd.f32 %v3706_v31, %v986_v21  ;;  %v441_v10 = vmul.f32 %v3587_v42, %v4514_v43  ;;  %v742_v26 = vadd.f32 %v686_v56, %v3684_v39  ;;  %v810_v30 = vmul.f32 %v3669_v55, %v3829_v35 }
 0x111   :  { %2352 = vmatmul.msk.f32.vlgmr.msrb.gmra.mxu3 %vm1146_vm0, %v3635_v8  ;;  %v687_v20 = vmul.f32 %v3652_v6, %v3833_v54  ;;  %v744_v53 = vadd.f32 %v688_v63, %v620_v24  ;;  %v1048_v0 = vadd.f32 %v3706_v31, %v988_v36  ;;  %v812_v4 = vmul.f32 %v3669_v55, %v3855_v13  ;;  %v4536_v63 = vld [vmem:[#allocation43_spill] sm:$0xff] }
 0x112   :  { %v621_v43 = vadd.f32 %v565_v7, %v441_v10  ;;  %v865_v39 = vadd.f32 %v809_v32, %v3770_v28  ;;  %v987_v62 = vadd.f32 %v931_v27, %v3776_v44  ;;  %v936_v29 = vmul.f32 %v3679_v1, %v3872_v16 }
 0x113   :  { %v1102_v58 = vmax.f32 %v1046_v12, 0.0  ;;  %v1104_v9 = vmax.f32 %v1048_v0, 0.0  ;;  %v866_v38 = vadd.f32 %v810_v30, %v742_v26  ;;  %v933_v28 = vmul.f32 %v3679_v1, %v3835_v59 }
 0x114   :  { %2333 = vmatmul.msk.f32.gmra.mxu2 %vm1146_vm0, %v4533_v34  ;;  %2313 = vmatmul.msk.f32.gmra.mxu1 %vm1146_vm0, %v1115_v50  ;;  %v689_v50 = vmul.f32 %v3652_v6, %v3835_v59  ;;  %v743_v61 = vadd.f32 %v687_v20, %v3642_v41  ;;  %v868_v3 = vadd.f32 %v812_v4, %v744_v53 }
 0x115   :  { %v3902_v44 = vmax.f32 %v1102_v58, %v1104_v9  ;;  %v811_v25 = vmul.f32 %v3669_v55, %v3835_v59  ;;  %v989_v48 = vadd.f32 %v933_v28, %v865_v39  ;;  %v1047_v21 = vadd.f32 %v3706_v31, %v987_v62 }
 0x116   :  { %v745_v56 = vadd.f32 %v689_v50, %v621_v43  ;;  %v992_v24 = vadd.f32 %v936_v29, %v868_v3 }
 0x117   :  { %v3884_v46 = vpop.permute.xlu1 %510  ;;  %v3908_v49 = vpop.permute.xlu2 %634  ;;  %v867_v7 = vadd.f32 %v811_v25, %v743_v61  ;;  %v1049_v27 = vadd.f32 %v3706_v31, %v989_v48  ;;  %v1103_v30 = vmax.f32 %v1047_v21, 0.0 }
 0x118   :  { %2372 = vmatmul.msk.f32.vlgmr.msrb.gmra.mxu0 %vm1146_vm0, %v3731_v17  ;;  %v813_v19 = vmul.f32 %v3669_v55, %v3884_v46  ;;  %v935_v41 = vmul.f32 %v3679_v1, %v3884_v46  ;;  %v937_v12 = vmul.f32 %v3679_v1, %v3908_v49  ;;  %v1052_v26 = vadd.f32 %v3706_v31, %v992_v24 }
 0x119   :  { %2353 = vmatmul.msk.f32.gmra.mxu3 %vm1146_vm0, %v3693_v51  ;;  %v1105_v20 = vmax.f32 %v1049_v27, 0.0  ;;  %v568_v27 = vmul.f32 %v3608_v11, %v3855_v13 }
 0x11a   :  { %v869_v32 = vadd.f32 %v813_v19, %v745_v56  ;;  %v991_v10 = vadd.f32 %v935_v41, %v867_v7  ;;  %v1108_v39 = vmax.f32 %v1052_v26, 0.0  ;;  %v692_v26 = vmul.f32 %v3652_v6, %v3872_v16 }
 0x11b   :  { %v3925_v0 = vmax.f32 %v1103_v30, %v1105_v20  ;;  %v566_v30 = vmul.f32 %v3608_v11, %v3829_v35 }
 0x11c   :  { %2334 = vmatmul.msk.f32.gmra.mxu2 %vm1146_vm0, %v3635_v8  ;;  %2314 = vmatmul.msk.f32.gmra.mxu1 %vm1146_vm0, %v4534_v33  ;;  %v934_v33 = vmul.f32 %v3679_v1, %v3855_v13  ;;  %v993_v53 = vadd.f32 %v937_v12, %v869_v32  ;;  %v1051_v43 = vadd.f32 %v3706_v31, %v991_v10 }
 0x11d   :  { %v444_v10 = vmul.f32 %v3587_v42, %v3829_v35  ;;  %v690_v35 = vmul.f32 %v3652_v6, %v3855_v13  ;;  %v814_v13 = vmul.f32 %v3669_v55, %v3872_v16 }
 0x11e   :  { %v990_v36 = vadd.f32 %v934_v33, %v866_v38  ;;  %v1107_v29 = vmax.f32 %v1051_v43, 0.0 }
 0x11f   :  { %v759_v16 = vpop.permute.xlu2 %758 }
 0x120   :  { %2373 = vmatmul.msk.f32.gmra.mxu0 %vm1146_vm0, %v3761_v37  ;;  %v1050_v4 = vadd.f32 %v3706_v31, %v990_v36  ;;  %v754_v36 = vpop.permute.xlu0 %753 }
 0x121   :  { %2354 = vmatmul.msk.f32.gmra.mxu3 %vm1146_vm0, %v3731_v17  ;;  %v816_v20 = vmul.f32 %v3669_v55, %v754_v36 }
 0x124   :  { %2335 = vmatmul.msk.f32.gmra.mxu2 %vm1146_vm0, %v3693_v51  ;;  %2315 = vmatmul.msk.f32.gmra.mxu1 %vm1146_vm0, %v4535_v22  ;;  %v1053_v22 = vadd.f32 %v3706_v31, %v993_v53 }
 0x126   :  { %v1109_v58 = vmax.f32 %v1053_v22, 0.0  ;;  %v878_v22 = vpop.permute.xlu1 %877 }
 0x128   :  { %2374 = vmatmul.msk.f32.gmra.mxu0 %vm1146_vm0, %v3805_v57  ;;  %v3940_v9 = vmax.f32 %v1107_v29, %v1109_v58  ;;  %v1737_v58 = vld [vmem:[%s4420_s5 + $0x8] sm:$0xff] }
 0x129   :  { %2355 = vmatmul.msk.f32.gmra.mxu3 %vm1146_vm0, %v3761_v37 }
 0x12c   :  { %2336 = vmatmul.msk.f32.gmra.mxu2 %vm1146_vm0, %v3731_v17  ;;  %2316 = vmatmul.msk.f32.gmra.mxu1 %vm1146_vm0, %v4528_v2  ;;  %v1106_v2 = vmax.f32 %v1050_v4, 0.0  ;;  %v569_v4 = vmul.f32 %v3608_v11, %v3884_v46 }
 0x12e   :  { %v3936_v62 = vmax.f32 %v1106_v2, %v1108_v39  ;;  %v445_v2 = vmul.f32 %v3587_v42, %v3835_v59 }
 0x130   :  { %2375 = vmatmul.msk.f32.gmra.mxu0 %vm1146_vm0, %v4536_v63 }
 0x131   :  { %2356 = vmatmul.msk.f32.gmra.mxu3 %vm1146_vm0, %v3805_v57 }
 0x134   :  { %2337 = vmatmul.msk.f32.gmra.mxu2 %vm1146_vm0, %v3761_v37  ;;  %2317 = vmatmul.msk.f32.gmra.mxu1 %vm1146_vm0, %v4533_v34  ;;  %v3956_v34 = vpop.f32.mrf.mxu0 }
 0x138   :  { %2376 = vmatmul.msk.f32.gmra.mxu0 %vm1146_vm0, %v3591_v15 }
 0x139   :  { %2357 = vmatmul.msk.f32.gmra.mxu3 %vm1146_vm0, %v4536_v63 }
 0x13c   :  { %2338 = vmatmul.msk.f32.gmra.mxu2 %vm1146_vm0, %v3805_v57  ;;  %2318 = vmatmul.msk.f32.gmra.mxu1 %vm1146_vm0, %v3635_v8  ;;  %v3966_v8 = vpop.f32.mrf.mxu0 }
 0x140   :  { %2377 = vmatmul.msk.f32.gmra.mxu0 %vm1146_vm0, %v3645_v45 }
 0x141   :  { %2358 = vmatmul.msk.f32.gmra.mxu3 %vm1146_vm0, %v3591_v15 }
 0x144   :  { %2339 = vmatmul.msk.f32.gmra.mxu2 %vm1146_vm0, %v4536_v63  ;;  %2319 = vmatmul.msk.f32.gmra.mxu1 %vm1146_vm0, %v3693_v51  ;;  %v4537_v51 = vld [vmem:[#allocation34_spill] sm:$0xff]  ;;  %v3976_v38 = vpop.f32.mrf.mxu0 }
 0x148   :  { %2378 = vmatmul.msk.f32.gmra.mxu0 %vm1146_vm0, %v3725_v40 }
 0x149   :  { %2359 = vmatmul.msk.f32.gmra.mxu3 %vm1146_vm0, %v3645_v45 }
 0x14c   :  { %2340 = vmatmul.msk.f32.gmra.mxu2 %vm1146_vm0, %v3591_v15  ;;  %2320 = vmatmul.msk.f32.gmra.mxu1 %vm1146_vm0, %v3731_v17  ;;  %v1743_v17 = vld [vmem:[%s4420_s5 + $0x38] sm:$0xff]  ;;  %v3995_v28 = vpop.f32.mrf.mxu0 }
 0x14d   :  { %1763 = vmatpush.msrb.mxu1 %v1743_v17  ;;  %v443_v17 = vmul.f32 %v3587_v42, %v3833_v54 }
 0x150   :  { %2379 = vmatmul.msk.f32.gmra.mxu0 %vm1146_vm0, %v3772_v18 }
 0x151   :  { %2360 = vmatmul.msk.f32.gmra.mxu3 %vm1146_vm0, %v3725_v40 }
 0x154   :  { %2341 = vmatmul.msk.f32.gmra.mxu2 %vm1146_vm0, %v3645_v45  ;;  %2321 = vmatmul.msk.f32.gmra.mxu1 %vm1146_vm0, %v3761_v37  ;;  %v3989_v37 = vpop.f32.mrf.mxu3 }
 0x156   :  { %v3991_v50 = vpop.f32.mrf.mxu2 }
 0x158   :  { %2380 = vmatmul.msk.f32.gmra.mxu0 %vm1146_vm0, %v4537_v51 }
 0x159   :  { %2361 = vmatmul.msk.f32.gmra.mxu3 %vm1146_vm0, %v3772_v18 }
 0x15c   :  { %2342 = vmatmul.msk.f32.gmra.mxu2 %vm1146_vm0, %v3725_v40  ;;  %2322 = vmatmul.msk.f32.gmra.mxu1 %vm1146_vm0, %v3805_v57  ;;  %v1739_v57 = vld [vmem:[%s4420_s5 + $0x18] sm:$0xff] }
 0x15d   :  { %1792 = vmatpush.msra.mxu2 %v1739_v57 }
 0x160   :  { %2381 = vmatmul.msk.f32.gmra.mxu0 %vm1146_vm0, %v3561_v47 }
 0x161   :  { %2362 = vmatmul.msk.f32.gmra.mxu3 %vm1146_vm0, %v4537_v51 }
 0x164   :  { %2343 = vmatmul.msk.f32.gmra.mxu2 %vm1146_vm0, %v3772_v18  ;;  %2323 = vmatmul.msk.f32.gmra.mxu1 %vm1146_vm0, %v4536_v63  ;;  %v1742_v63 = vld [vmem:[%s4420_s5 + $0x30] sm:$0xff] }
 0x165   :  { %1764 = vmatpush.msrb.mxu1 %v1742_v63 }
 0x168   :  { %2382 = vmatmul.msk.f32.gmra.mxu0 %vm1146_vm0, %v3637_v5  ;;  %v4006_v61 = vpop.f32.mrf.mxu3 }
 0x169   :  { %2363 = vmatmul.msk.f32.gmra.mxu3 %vm1146_vm0, %v3561_v47 }
 0x16c   :  { %2344 = vmatmul.msk.f32.gmra.mxu2 %vm1146_vm0, %v4537_v51  ;;  %v4010_v19 = vpop.f32.mrf.mxu2  ;;  %2324 = vmatmul.msk.f32.gmra.mxu1 %vm1146_vm0, %v3591_v15 }
 0x16d   :  { %v4012_v3 = vpop.f32.mrf.mxu0 }
 0x170   :  { %2383 = vmatmul.msk.f32.gmra.mxu0 %vm1146_vm0, %v3712_v14 }
 0x171   :  { %2364 = vmatmul.msk.f32.gmra.mxu3 %vm1146_vm0, %v3637_v5 }
 0x174   :  { %v4020_v33 = vpop.f32.mrf.mxu3  ;;  %2345 = vmatmul.msk.f32.gmra.mxu2 %vm1146_vm0, %v3561_v47  ;;  %v4026_v56 = vpop.f32.mrf.mxu2  ;;  %2325 = vmatmul.msk.f32.gmra.mxu1 %vm1146_vm0, %v3645_v45 }
 0x175   :  { %v4024_v25 = vpop.f32.mrf.mxu0 }
 0x178   :  { %2384 = vmatmul.msk.f32.gmra.mxu0 %vm1146_vm0, %v3742_v23 }
 0x179   :  { %2365 = vmatmul.msk.f32.gmra.mxu3 %vm1146_vm0, %v3712_v14 }
 0x17c   :  { %2346 = vmatmul.msk.f32.gmra.mxu2 %vm1146_vm0, %v3637_v5  ;;  %v4036_v15 = vpop.f32.mrf.mxu3  ;;  %2326 = vmatmul.msk.f32.gmra.mxu1 %vm1146_vm0, %v3725_v40 }
 0x17d   :  { %v4038_v41 = vpop.f32.mrf.mxu0 }
 0x17f   :  { %v4040_v24 = vpop.f32.mrf.mxu2 }
 0x180   :  { %2385 = vmatmul.msk.f32.gmra.mxu0 %vm1146_vm0, %v3790_v60 }
 0x181   :  { %2366 = vmatmul.msk.f32.gmra.mxu3 %vm1146_vm0, %v3742_v23 }
 0x184   :  { %2347 = vmatmul.msk.f32.gmra.mxu2 %vm1146_vm0, %v3712_v14  ;;  %v4050_v45 = vpop.f32.mrf.mxu3  ;;  %2327 = vmatmul.msk.f32.gmra.mxu1 %vm1146_vm0, %v3772_v18  ;;  %v442_v18 = vmul.f32 %v3587_v42, %v3822_v52  ;;  %v624_v52 = vadd.f32 %v568_v27, %v444_v10  ;;  %v691_v27 = vmul.f32 %v3652_v6, %v3884_v46  ;;  %v883_v46 = vpop.permute.xlu0 %882 }
 0x185   :  { %v4052_v48 = vpop.f32.mrf.mxu0  ;;  %v625_v10 = vadd.f32 %v569_v4, %v445_v2  ;;  %v693_v42 = vmul.f32 %v3652_v6, %v3908_v49  ;;  %v817_v6 = vmul.f32 %v3669_v55, %v759_v16 }
 0x186   :  { %v622_v53 = vadd.f32 %v566_v30, %v442_v18  ;;  %v748_v43 = vadd.f32 %v692_v26, %v624_v52  ;;  %v940_v26 = vmul.f32 %v3679_v1, %v878_v22  ;;  %v938_v30 = vmul.f32 %v3679_v1, %v754_v36 }
 0x187   :  { %v4054_v21 = vpop.f32.mrf.mxu2  ;;  %v941_v22 = vmul.f32 %v3679_v1, %v883_v46 }
 0x188   :  { %2386 = vmatmul.msk.f32.gmra.mxu0 %vm1146_vm0, %v3902_v44  ;;  %v872_v57 = vadd.f32 %v816_v20, %v748_v43  ;;  %v746_v18 = vadd.f32 %v690_v35, %v622_v53  ;;  %v749_v53 = vadd.f32 %v693_v42, %v625_v10  ;;  %v815_v35 = vmul.f32 %v3669_v55, %v3908_v49 }
 0x189   :  { %2367 = vmatmul.msk.f32.gmra.mxu3 %vm1146_vm0, %v3790_v60  ;;  %v1307_v40 = vpop.f32.mrf.mxu1  ;;  %v939_v55 = vmul.f32 %v3679_v1, %v759_v16 }
 0x18a   :  { %v870_v54 = vadd.f32 %v814_v13, %v746_v18  ;;  %v1308_v36 = vadd.f32 %v1307_v40, %v3956_v34 }
 0x18c   :  { %2348 = vmatmul.msk.f32.gmra.mxu2 %vm1146_vm0, %v3742_v23  ;;  %v4064_v7 = vpop.f32.mrf.mxu3  ;;  %v1738_v23 = vld [vmem:[%s4420_s5 + $0x10] sm:$0xff]  ;;  %2328 = vmatmul.msk.f32.gmra.mxu1 %vm1146_vm0, %v4537_v51  ;;  %v1736_v51 = vld [vmem:[%s4420_s5] sm:$0xff]  ;;  %v994_v20 = vadd.f32 %v938_v30, %v870_v54 }
 0x18d   :  { %v4066_v32 = vpop.f32.mrf.mxu0  ;;  %1793 = vmatpush.msra.mxu2 %v1738_v23 }
 0x18f   :  { %v1392_v12 = vpop.f32.mrf.mxu2  ;;  %1794 = vmatpush.msra.mxu2 %v1737_v58 }
 0x190   :  { %2387 = vmatmul.msk.f32.gmra.mxu0 %vm1146_vm0, %v3925_v0  ;;  %v1452_v4 = vadd.f32 %v1392_v12, %v1308_v36 }
 0x191   :  { %2368 = vmatmul.msk.f32.gmra.mxu3 %vm1146_vm0, %v3902_v44  ;;  %v1310_v63 = vpop.f32.mrf.mxu1  ;;  %1795 = vmatpush.msra.mxu2 %v1736_v51 }
 0x194   :  { %2349 = vmatmul.msk.f32.gmra.mxu2 %vm1146_vm0, %v3790_v60  ;;  %v1497_v39 = vpop.f32.mrf.mxu3  ;;  %v567_v60 = vmul.f32 %v3608_v11, %v3835_v59  ;;  %2329 = vmatmul.msk.f32.gmra.mxu1 %vm1146_vm0, %v3561_v47  ;;  %v996_v59 = vadd.f32 %v940_v26, %v872_v57  ;;  %v4144_v57 = vld [vmem:[%s4419_s4] ss:$0 sm:$0xff] }
 0x195   :  { %v1602_v29 = vpop.f32.mrf.mxu0  ;;  %v1557_v34 = vadd.f32 %v1497_v39, %v1452_v4  ;;  %v1311_v39 = vadd.f32 %v1310_v63, %v3966_v8 }
 0x196   :  { %v623_v11 = vadd.f32 %v567_v60, %v443_v17  ;;  %v1056_v2 = vadd.f32 %v3706_v31, %v996_v59  ;;  %v1054_v60 = vadd.f32 %v3706_v31, %v994_v20  ;;  %v873_v17 = vadd.f32 %v817_v6, %v749_v53 }
 0x197   :  { %v1395_v23 = vpop.f32.mrf.mxu2  ;;  %v1662_v13 = vadd.f32 %v1602_v29, %v1557_v34  ;;  %v1740_v34 = vld [vmem:[%s4420_s5 + $0x20] sm:$0xff] }
 0x198   :  { %2388 = vmatmul.msk.f32.gmra.mxu0 %vm1146_vm0, %v3936_v62  ;;  %v747_v52 = vadd.f32 %v691_v27, %v623_v11  ;;  %v1112_v49 = vmax.f32 %v1056_v2, 0.0  ;;  %v997_v12 = vadd.f32 %v941_v22, %v873_v17 }
 0x199   :  { %2369 = vmatmul.msk.f32.gmra.mxu3 %vm1146_vm0, %v3925_v0  ;;  %v1313_v58 = vpop.f32.mrf.mxu1  ;;  %v1686_v29 = vadd.f32 %v4144_v57, %v1662_v13 }
 0x19a   :  { %v871_v51 = vadd.f32 %v815_v35, %v747_v52  ;;  %v1057_v26 = vadd.f32 %v3706_v31, %v997_v12 }
 0x19b   :  { %v1706_v16 = vmax.f32 %v1686_v29, 0.0 }
 0x19c   :  { %2350 = vmatmul.msk.f32.gmra.mxu2 %vm1146_vm0, %v3902_v44  ;;  %v1500_v47 = vpop.f32.mrf.mxu3  ;;  %v1314_v44 = vadd.f32 %v1313_v58, %v3976_v38  ;;  %2330 = vmatmul.msk.f32.gmra.mxu1 %vm1146_vm0, %v3637_v5  ;;  %v1110_v38 = vmax.f32 %v1054_v60, 0.0  ;;  %v995_v18 = vadd.f32 %v939_v55, %v871_v51  ;;  %v1741_v58 = vld [vmem:[%s4420_s5 + $0x28] sm:$0xff] }
 0x19d   :  { %v1605_v43 = vpop.f32.mrf.mxu0  ;;  %1765 = vmatpush.msrb.mxu1 %v1741_v58 }
 0x19e   :  { %v1140_v8 = vmax.f32 %v1110_v38, %v1112_v49  ;;  %v1055_v54 = vadd.f32 %v3706_v31, %v995_v18 }
 0x19f   :  { %v1398_v40 = vpop.f32.mrf.mxu2  ;;  %1766 = vmatpush.msrb.mxu1 %v1740_v34 }
 0x1a0   :  { %2389 = vmatmul.msk.f32.gmra.mxu0 %vm1146_vm0, %v3940_v9  ;;  %v1454_v27 = vadd.f32 %v1398_v40, %v1314_v44  ;;  %v1111_v20 = vmax.f32 %v1055_v54, 0.0 }
 0x1a1   :  { %2370 = vmatmul.msk.f32.gmra.mxu3 %vm1146_vm0, %v3936_v62  ;;  %v1453_v62 = vadd.f32 %v1395_v23, %v1311_v39  ;;  %v1316_v30 = vpop.f32.mrf.mxu1  ;;  %v1113_v23 = vmax.f32 %v1057_v26, 0.0 }
 0x1a2   :  { %v1317_v59 = vadd.f32 %v1316_v30, %v3995_v28 }
 0x1a3   :  { %v1558_v63 = vadd.f32 %v1500_v47, %v1453_v62  ;;  %v1141_v28 = vmax.f32 %v1111_v20, %v1113_v23  ;;  %v1806_v20 = vld [vmem:[%s4420_s5 + $0x58] sm:$0xff] }
 0x1a4   :  { %2351 = vmatmul.msk.f32.gmra.mxu2 %vm1146_vm0, %v3925_v0  ;;  %v1503_v5 = vpop.f32.mrf.mxu3  ;;  %2331 = vmatmul.msk.f32.gmra.mxu1 %vm1146_vm0, %v3712_v14 }
 0x1a5   :  { %v1559_v10 = vadd.f32 %v1503_v5, %v1454_v27  ;;  %v1608_v1 = vpop.f32.mrf.mxu0  ;;  %v1663_v46 = vadd.f32 %v1605_v43, %v1558_v63  ;;  %1825 = vmatpush.msra.mxu1 %v1806_v20 }
 0x1a7   :  { %v1664_v42 = vadd.f32 %v1608_v1, %v1559_v10  ;;  %v1401_v11 = vpop.f32.mrf.mxu2  ;;  %v1687_v6 = vadd.f32 %v4144_v57, %v1663_v46 }
 0x1a8   :  { %2390 = vmatmul.msk.f32.gmra.mxu0 %vm1146_vm0, %v1140_v8  ;;  %v1455_v52 = vadd.f32 %v1401_v11, %v1317_v59 }
 0x1a9   :  { %v1688_v0 = vadd.f32 %v4144_v57, %v1664_v42  ;;  %2371 = vmatmul.msk.f32.gmra.mxu3 %vm1146_vm0, %v3940_v9  ;;  %v1319_v35 = vpop.f32.mrf.mxu1  ;;  %v1707_v43 = vmax.f32 %v1687_v6, 0.0 }
 0x1aa   :  { %v1320_v55 = vadd.f32 %v1319_v35, %v4012_v3 }
 0x1ab   :  { %v1708_v36 = vmax.f32 %v1688_v0, 0.0 }
 0x1ac   :  { %v1506_v53 = vpop.f32.mrf.mxu3 }
 0x1ad   :  { %v1726_v31 = vmax.f32 %v1706_v16, %v1708_v36  ;;  %v1560_v47 = vadd.f32 %v1506_v53, %v1455_v52  ;;  %v1611_v4 = vpop.f32.mrf.mxu0 }
 0x1af   :  { %v1665_v2 = vadd.f32 %v1611_v4, %v1560_v47  ;;  %v1404_v14 = vpop.f32.mrf.mxu2  ;;  %2394 = vmatmul.msk.f32.vlgmr.msra.gmra.mxu2 %vm1744_vm1, %v1726_v31  ;;  %v1805_v4 = vld [vmem:[%s4420_s5 + $0x50] sm:$0xff] }
 0x1b0   :  { %2391 = vmatmul.msk.f32.gmra.mxu0 %vm1146_vm0, %v1141_v28  ;;  %v1456_v12 = vadd.f32 %v1404_v14, %v1320_v55  ;;  %1826 = vmatpush.msra.mxu1 %v1805_v4  ;;  %v1803_v14 = vld [vmem:[%s4420_s5 + $0x40] sm:$0xff] }
 0x1b1   :  { %v1689_v9 = vadd.f32 %v4144_v57, %v1665_v2  ;;  %v1322_v17 = vpop.f32.mrf.mxu1  ;;  %v1804_v2 = vld [vmem:[%s4420_s5 + $0x48] sm:$0xff] }
 0x1b2   :  { %v1323_v5 = vadd.f32 %v1322_v17, %v4024_v25  ;;  %1827 = vmatpush.msra.mxu1 %v1804_v2 }
 0x1b3   :  { %v1709_v22 = vmax.f32 %v1689_v9, 0.0 }
 0x1b4   :  { %v1509_v40 = vpop.f32.mrf.mxu3  ;;  %1828 = vmatpush.msra.mxu1 %v1803_v14 }
 0x1b5   :  { %v1727_v51 = vmax.f32 %v1707_v43, %v1709_v22  ;;  %v1614_v60 = vpop.f32.mrf.mxu0  ;;  %v1561_v27 = vadd.f32 %v1509_v40, %v1456_v12 }
 0x1b7   :  { %v1407_v44 = vpop.f32.mrf.mxu2  ;;  %2395 = vmatmul.msk.f32.gmra.mxu2 %vm1744_vm1, %v1727_v51  ;;  %v1666_v62 = vadd.f32 %v1614_v60, %v1561_v27 }
 0x1b8   :  { %v1457_v26 = vadd.f32 %v1407_v44, %v1323_v5 }
 0x1b9   :  { %v1325_v13 = vpop.f32.mrf.mxu1  ;;  %v1690_v63 = vadd.f32 %v4144_v57, %v1666_v62 }
 0x1ba   :  { %v1326_v18 = vadd.f32 %v1325_v13, %v4038_v41 }
 0x1bb   :  { %v1710_v0 = vmax.f32 %v1690_v63, 0.0 }
 0x1bc   :  { %v1512_v49 = vpop.f32.mrf.mxu3 }
 0x1bd   :  { %v1617_v39 = vpop.f32.mrf.mxu0  ;;  %v1562_v3 = vadd.f32 %v1512_v49, %v1457_v26 }
 0x1bf   :  { %v1410_v38 = vpop.f32.mrf.mxu2  ;;  %v1667_v41 = vadd.f32 %v1617_v39, %v1562_v3 }
 0x1c0   :  { %v1458_v10 = vadd.f32 %v1410_v38, %v1326_v18 }
 0x1c1   :  { %v1328_v29 = vpop.f32.mrf.mxu1  ;;  %v1691_v31 = vadd.f32 %v4144_v57, %v1667_v41 }
 0x1c2   :  { %v1329_v54 = vadd.f32 %v1328_v29, %v4052_v48 }
 0x1c3   :  { %v1711_v35 = vmax.f32 %v1691_v31, 0.0 }
 0x1c4   :  { %v1515_v1 = vpop.f32.mrf.mxu3 }
 0x1c5   :  { %v1563_v30 = vadd.f32 %v1515_v1, %v1458_v10  ;;  %v1620_v8 = vpop.f32.mrf.mxu0 }
 0x1c7   :  { %v1668_v42 = vadd.f32 %v1620_v8, %v1563_v30  ;;  %v1413_v11 = vpop.f32.mrf.mxu2 }
 0x1c8   :  { %v1459_v25 = vadd.f32 %v1413_v11, %v1329_v54 }
 0x1c9   :  { %v1692_v59 = vadd.f32 %v4144_v57, %v1668_v42  ;;  %v1331_v53 = vpop.f32.mrf.mxu1 }
 0x1ca   :  { %v1332_v40 = vadd.f32 %v1331_v53, %v4066_v32 }
 0x1cb   :  { %v1712_v23 = vmax.f32 %v1692_v59, 0.0 }
 0x1cc   :  { %v1518_v16 = vpop.f32.mrf.mxu3 }
 0x1cd   :  { %v1728_v46 = vmax.f32 %v1710_v0, %v1712_v23  ;;  %v1564_v36 = vadd.f32 %v1518_v16, %v1459_v25  ;;  %v1623_v52 = vpop.f32.mrf.mxu0  ;;  %v1841_v0 = vld [vmem:[%s4420_s5 + $0x78] sm:$0xff]  ;;  %v1840_v16 = vld [vmem:[%s4420_s5 + $0x70] sm:$0xff] }
 0x1cf   :  { %v1669_v47 = vadd.f32 %v1623_v52, %v1564_v36  ;;  %v1416_v48 = vpop.f32.mrf.mxu2  ;;  %2392 = vmatmul.msk.f32.vlgmr.msrb.gmra.mxu1 %vm1744_vm1, %v1728_v46 }
 0x1d0   :  { %v1460_v60 = vadd.f32 %v1416_v48, %v1332_v40  ;;  %1860 = vmatpush.msrb.mxu1 %v1841_v0  ;;  %v1838_v48 = vld [vmem:[%s4420_s5 + $0x60] sm:$0xff] }
 0x1d1   :  { %v1693_v28 = vadd.f32 %v4144_v57, %v1669_v47  ;;  %v1334_v58 = vpop.f32.mrf.mxu1  ;;  %v1839_v47 = vld [vmem:[%s4420_s5 + $0x68] sm:$0xff]  ;;  %v1873_v0 = vld [vmem:[%s4420_s5 + $0x80] sm:$0xff] }
 0x1d2   :  { %v1335_v39 = vadd.f32 %v1334_v58, %v3991_v50  ;;  %1861 = vmatpush.msrb.mxu1 %v1840_v16 }
 0x1d3   :  { %v1713_v6 = vmax.f32 %v1693_v28, 0.0 }
 0x1d4   :  { %v1521_v9 = vpop.f32.mrf.mxu3  ;;  %1862 = vmatpush.msrb.mxu1 %v1839_v47 }
 0x1d5   :  { %v1626_v43 = vpop.f32.mrf.mxu0  ;;  %v1729_v22 = vmax.f32 %v1711_v35, %v1713_v6  ;;  %v1565_v55 = vadd.f32 %v1521_v9, %v1460_v60 }
 0x1d6   :  { %1863 = vmatpush.msrb.mxu1 %v1838_v48 }
 0x1d7   :  { %v1419_v34 = vpop.f32.mrf.mxu2  ;;  %2393 = vmatmul.msk.f32.gmra.mxu1 %vm1744_vm1, %v1729_v22  ;;  %v1670_v13 = vadd.f32 %v1626_v43, %v1565_v55 }
 0x1d8   :  { %v1461_v18 = vadd.f32 %v1419_v34, %v1335_v39 }
 0x1d9   :  { %v1337_v44 = vpop.f32.mrf.mxu1  ;;  %v1694_v1 = vadd.f32 %v4144_v57, %v1670_v13 }
 0x1da   :  { %v1338_v12 = vadd.f32 %v1337_v44, %v4010_v19 }
 0x1db   :  { %v1714_v63 = vmax.f32 %v1694_v1, 0.0 }
 0x1dc   :  { %v1524_v51 = vpop.f32.mrf.mxu3 }
 0x1dd   :  { %v1629_v17 = vpop.f32.mrf.mxu0  ;;  %v1566_v32 = vadd.f32 %v1524_v51, %v1461_v18 }
 0x1df   :  { %v1422_v49 = vpop.f32.mrf.mxu2  ;;  %v1671_v19 = vadd.f32 %v1629_v17, %v1566_v32 }
 0x1e0   :  { %v1462_v27 = vadd.f32 %v1422_v49, %v1338_v12 }
 0x1e1   :  { %v1340_v10 = vpop.f32.mrf.mxu1  ;;  %v1695_v23 = vadd.f32 %v4144_v57, %v1671_v19 }
 0x1e2   :  { %v1341_v8 = vadd.f32 %v1340_v10, %v4026_v56 }
 0x1e3   :  { %v1715_v36 = vmax.f32 %v1695_v23, 0.0 }
 0x1e4   :  { %v1527_v38 = vpop.f32.mrf.mxu3 }
 0x1e5   :  { %v1567_v5 = vadd.f32 %v1527_v38, %v1462_v27  ;;  %v1632_v62 = vpop.f32.mrf.mxu0 }
 0x1e7   :  { %v1672_v26 = vadd.f32 %v1632_v62, %v1567_v5  ;;  %v1425_v30 = vpop.f32.mrf.mxu2 }
 0x1e8   :  { %v1463_v50 = vadd.f32 %v1425_v30, %v1341_v8  ;;  %v1875_v30 = vld [vmem:[%s4420_s5 + $0x90] sm:$0xff] }
 0x1e9   :  { %v1696_v29 = vadd.f32 %v4144_v57, %v1672_v26  ;;  %v1343_v41 = vpop.f32.mrf.mxu1  ;;  %v1876_v26 = vld [vmem:[%s4420_s5 + $0x98] sm:$0xff] }
 0x1ea   :  { %v1344_v35 = vadd.f32 %v1343_v41, %v4040_v24  ;;  %1895 = vmatpush.msrb.mxu2 %v1876_v26 }
 0x1eb   :  { %v1716_v3 = vmax.f32 %v1696_v29, 0.0 }
 0x1ec   :  { %v1530_v42 = vpop.f32.mrf.mxu3  ;;  %1896 = vmatpush.msrb.mxu2 %v1875_v30 }
 0x1ed   :  { %v1730_v11 = vmax.f32 %v1714_v63, %v1716_v3  ;;  %v1568_v54 = vadd.f32 %v1530_v42, %v1463_v50  ;;  %v1635_v59 = vpop.f32.mrf.mxu0 }
 0x1ef   :  { %v1673_v25 = vadd.f32 %v1635_v59, %v1568_v54  ;;  %v1428_v56 = vpop.f32.mrf.mxu2  ;;  %2396 = vmatmul.msk.f32.vlgmr.msra.gmra.mxu1 %vm1744_vm1, %v1730_v11  ;;  %v1874_v59 = vld [vmem:[%s4420_s5 + $0x88] sm:$0xff] }
 0x1f0   :  { %v1464_v2 = vadd.f32 %v1428_v56, %v1344_v35  ;;  %1897 = vmatpush.msrb.mxu2 %v1874_v59 }
 0x1f1   :  { %v1697_v46 = vadd.f32 %v4144_v57, %v1673_v25  ;;  %v1346_v4 = vpop.f32.mrf.mxu1 }
 0x1f2   :  { %v1347_v34 = vadd.f32 %v1346_v4, %v4054_v21  ;;  %1898 = vmatpush.msrb.mxu2 %v1873_v0 }
 0x1f3   :  { %v1717_v52 = vmax.f32 %v1697_v46, 0.0 }
 0x1f4   :  { %v1533_v20 = vpop.f32.mrf.mxu3 }
 0x1f5   :  { %v1638_v53 = vpop.f32.mrf.mxu0  ;;  %v1731_v31 = vmax.f32 %v1715_v36, %v1717_v52  ;;  %v1569_v43 = vadd.f32 %v1533_v20, %v1464_v2 }
 0x1f7   :  { %v1431_v28 = vpop.f32.mrf.mxu2  ;;  %2397 = vmatmul.msk.f32.gmra.mxu1 %vm1744_vm1, %v1731_v31  ;;  %v1674_v40 = vadd.f32 %v1638_v53, %v1569_v43 }
 0x1f8   :  { %v1465_v17 = vadd.f32 %v1431_v28, %v1347_v34 }
 0x1f9   :  { %v1349_v9 = vpop.f32.mrf.mxu1  ;;  %v1698_v12 = vadd.f32 %v4144_v57, %v1674_v40 }
 0x1fa   :  { %v1350_v58 = vadd.f32 %v1349_v9, %v3989_v37 }
 0x1fb   :  { %v1718_v18 = vmax.f32 %v1698_v12, 0.0 }
 0x1fc   :  { %v1536_v6 = vpop.f32.mrf.mxu3 }
 0x1fd   :  { %v1641_v14 = vpop.f32.mrf.mxu0  ;;  %v1570_v24 = vadd.f32 %v1536_v6, %v1465_v17 }
 0x1ff   :  { %v1434_v22 = vpop.f32.mrf.mxu2  ;;  %v1675_v37 = vadd.f32 %v1641_v14, %v1570_v24 }
 0x200   :  { %v1466_v51 = vadd.f32 %v1434_v22, %v1350_v58 }
 0x201   :  { %v1352_v49 = vpop.f32.mrf.mxu1 }
 0x202   :  { %v1353_v27 = vadd.f32 %v1352_v49, %v4006_v61  ;;  %v1699_v61 = vadd.f32 %v4144_v57, %v1675_v37  ;;  %v1916_v37 = vld [vmem:[%s4422_s7] sm:$0xff] }
 0x204   :  { %v1539_v60 = vpop.f32.mrf.mxu3  ;;  %v1719_v3 = vmax.f32 %v1699_v61, 0.0 }
 0x205   :  { %v1571_v44 = vadd.f32 %v1539_v60, %v1466_v51  ;;  %v1644_v55 = vpop.f32.mrf.mxu0 }
 0x207   :  { %v1676_v39 = vadd.f32 %v1644_v55, %v1571_v44  ;;  %v1437_v13 = vpop.f32.mrf.mxu2 }
 0x208   :  { %v1467_v21 = vadd.f32 %v1437_v13, %v1353_v27  ;;  %v1919_v13 = vld [vmem:[%s4422_s7 + $0x18] sm:$0xff] }
 0x209   :  { %v1700_v38 = vadd.f32 %v4144_v57, %v1676_v39  ;;  %v1355_v8 = vpop.f32.mrf.mxu1  ;;  %1942 = vmatpush.msra.mxu3 %v1919_v13 }
 0x20a   :  { %v1356_v25 = vadd.f32 %v1355_v8, %v4020_v33  ;;  %v2442_v8 = vld [vmem:[%s4421_s6] ss:$0 sm:$0xff] }
 0x20b   :  { %v1720_v5 = vmax.f32 %v1700_v38, 0.0 }
 0x20c   :  { %v1542_v62 = vpop.f32.mrf.mxu3 }
 0x20d   :  { %v1732_v10 = vmax.f32 %v1718_v18, %v1720_v5  ;;  %v1572_v1 = vadd.f32 %v1542_v62, %v1467_v21  ;;  %v1647_v32 = vpop.f32.mrf.mxu0  ;;  %v1918_v18 = vld [vmem:[%s4422_s7 + $0x10] sm:$0xff] }
 0x20e   :  { %1943 = vmatpush.msra.mxu3 %v1918_v18 }
 0x20f   :  { %v1677_v29 = vadd.f32 %v1647_v32, %v1572_v1  ;;  %v1440_v63 = vpop.f32.mrf.mxu2  ;;  %2398 = vmatmul.msk.f32.vlgmr.msrb.gmra.mxu1 %vm1744_vm1, %v1732_v10 }
 0x210   :  { %v1468_v16 = vadd.f32 %v1440_v63, %v1356_v25 }
 0x211   :  { %v1701_v19 = vadd.f32 %v4144_v57, %v1677_v29  ;;  %v1358_v41 = vpop.f32.mrf.mxu1 }
 0x212   :  { %v1359_v31 = vadd.f32 %v1358_v41, %v4036_v15 }
 0x213   :  { %v1721_v50 = vmax.f32 %v1701_v19, 0.0 }
 0x214   :  { %v1545_v42 = vpop.f32.mrf.mxu3 }
 0x215   :  { %v1733_v11 = vmax.f32 %v1719_v3, %v1721_v50  ;;  %v1650_v54 = vpop.f32.mrf.mxu0  ;;  %v1573_v52 = vadd.f32 %v1545_v42, %v1468_v16 }
 0x217   :  { %v1443_v23 = vpop.f32.mrf.mxu2  ;;  %2399 = vmatmul.msk.f32.gmra.mxu1 %vm1744_vm1, %v1733_v11  ;;  %v1678_v47 = vadd.f32 %v1650_v54, %v1573_v52 }
 0x218   :  { %v1469_v28 = vadd.f32 %v1443_v23, %v1359_v31 }
 0x219   :  { %v1361_v36 = vpop.f32.mrf.mxu1  ;;  %v1702_v14 = vadd.f32 %v4144_v57, %v1678_v47 }
 0x21a   :  { %v1362_v53 = vadd.f32 %v1361_v36, %v4050_v45 }
 0x21b   :  { %v1722_v34 = vmax.f32 %v1702_v14, 0.0 }
 0x21c   :  { %v1548_v56 = vpop.f32.mrf.mxu3 }
 0x21d   :  { %v1653_v46 = vpop.f32.mrf.mxu0  ;;  %v1574_v33 = vadd.f32 %v1548_v56, %v1469_v28  ;;  %v2443_v28 = vld [vmem:[%s4423_s8] ss:$0 sm:$0xff] }
 0x21f   :  { %v1446_v20 = vpop.f32.mrf.mxu2  ;;  %v1679_v45 = vadd.f32 %v1653_v46, %v1574_v33  ;;  %v4272_v46 = vld [vmem:[%s4424_s9] sm:$0xff] }
 0x220   :  { %v1470_v48 = vadd.f32 %v1446_v20, %v1362_v53  ;;  %v1956_v20 = vlaneseq }
 0x221   :  { %v1364_v2 = vpop.f32.mrf.mxu1  ;;  %v1703_v55 = vadd.f32 %v4144_v57, %v1679_v45 }
 0x222   :  { %v1365_v22 = vadd.f32 %v1364_v2, %v4064_v7  ;;  %v4276_v53 = vand.u32 127, %v1956_v20 }
 0x223   :  { %v1723_v24 = vmax.f32 %v1703_v55, 0.0 }
 0x224   :  { %v1551_v4 = vpop.f32.mrf.mxu3  ;;  %vm2037_vm2 = vcmp.ge.s32.totalorder %v4276_v53, 5  ;;  %vm2038_vm3 = vcmp.lt.s32.totalorder %v4276_v53, 9  ;;  %vm1961_vm6 = vcmp.lt.s32.totalorder %v4276_v53, 5 }
 0x225   :  { %v1575_v35 = vadd.f32 %v1551_v4, %v1470_v48  ;;  %v1656_v6 = vpop.f32.mrf.mxu0  ;;  %vm4283_vm5 = vmand %vm2037_vm2, %vm2038_vm3 }
 0x227   :  { %v1680_v9 = vadd.f32 %v1656_v6, %v1575_v35  ;;  %v1449_v43 = vpop.f32.mrf.mxu2 }
 0x228   :  { %v1471_v15 = vadd.f32 %v1449_v43, %v1365_v22 }
 0x229   :  { %v1704_v58 = vadd.f32 %v4144_v57, %v1680_v9 }
 0x22b   :  { %v1724_v40 = vmax.f32 %v1704_v58, 0.0 }
 0x22c   :  { %v1554_v51 = vpop.f32.mrf.mxu3 }
 0x22d   :  { %v1734_v60 = vmax.f32 %v1722_v34, %v1724_v40  ;;  %v1576_v17 = vadd.f32 %v1554_v51, %v1471_v15  ;;  %v1659_v44 = vpop.f32.mrf.mxu0 }
 0x22f   :  { %v1681_v49 = vadd.f32 %v1659_v44, %v1576_v17  ;;  %2400 = vmatmul.msk.f32.vlgmr.msrb.gmra.mxu2 %vm1744_vm1, %v1734_v60 }
 0x231   :  { %v1705_v12 = vadd.f32 %v4144_v57, %v1681_v49  ;;  %v1917_v57 = vld [vmem:[%s4422_s7 + $0x8] sm:$0xff] }
 0x232   :  { %1944 = vmatpush.msra.mxu3 %v1917_v57  ;;  %v1797_v21 = vpop.f32.mrf.mxu2  ;;  %v1959_v57 = vld [vmem:[%s4424_s9 + $0x8] sm:$0xff] }
 0x233   :  { %v1725_v39 = vmax.f32 %v1705_v12, 0.0 }
 0x234   :  { %1945 = vmatpush.msra.mxu3 %v1916_v37 }
 0x235   :  { %v1735_v7 = vmax.f32 %v1723_v24, %v1725_v39 }
 0x237   :  { %2401 = vmatmul.msk.f32.gmra.mxu2 %vm1744_vm1, %v1735_v7 }
 0x23a   :  { %v1800_v10 = vpop.f32.mrf.mxu2 }
 0x24c   :  { %v1768_v27 = vpop.f32.mrf.mxu1 }
 0x24d   :  { %v1798_v32 = vadd.f32 %v1797_v21, %v1768_v27 }
 0x254   :  { %v1771_v38 = vpop.f32.mrf.mxu1 }
 0x255   :  { %v1801_v63 = vadd.f32 %v1800_v10, %v1771_v38 }
 0x26c   :  { %v1830_v5 = vpop.f32.mrf.mxu1 }
 0x26d   :  { %v1836_v26 = vadd.f32 %v1830_v5, %v1798_v32 }
 0x274   :  { %v1833_v62 = vpop.f32.mrf.mxu1 }
 0x275   :  { %v1837_v50 = vadd.f32 %v1833_v62, %v1801_v63 }
 0x28c   :  { %v1865_v1 = vpop.f32.mrf.mxu1 }
 0x28d   :  { %v1871_v30 = vadd.f32 %v1865_v1, %v1836_v26 }
 0x294   :  { %v1868_v3 = vpop.f32.mrf.mxu1 }
 0x295   :  { %v1872_v11 = vadd.f32 %v1868_v3, %v1837_v50 }
 0x2b2   :  { %v1900_v61 = vpop.f32.mrf.mxu2 }
 0x2b3   :  { %v1906_v29 = vadd.f32 %v1900_v61, %v1871_v30 }
 0x2b5   :  { %v1912_v19 = vadd.f32 %v2442_v8, %v1906_v29 }
 0x2b7   :  { %v4260_v42 = vmax.f32 %v1912_v19, 0.0 }
 0x2b9   :  { %2402 = vmatmul.msk.f32.vlgmr.msra.gmra.mxu3 %vm1744_vm1, %v4260_v42  ;;  %v2113_v54 = vmul.f32 %v4260_v42, %v4260_v42 }
 0x2ba   :  { %v1903_v59 = vpop.f32.mrf.mxu2 }
 0x2bb   :  { %v1907_v0 = vadd.f32 %v1903_v59, %v1872_v11  ;;  %v2115_v41 = vsel %vm1744_vm1, %v2113_v54, 0.0 }
 0x2bc   :  { %2116 = vadd.xlane.f32.xlu2 %v2115_v41 }
 0x2bd   :  { %v1913_v23 = vadd.f32 %v2442_v8, %v1907_v0 }
 0x2bf   :  { %v1915_v25 = vmax.f32 %v1913_v23, 0.0  ;;  %v2185_v23 = vshrl.u32 %v1956_v20, 7 }
 0x2c1   :  { %2403 = vmatmul.msk.f32.gmra.mxu3 %vm1744_vm1, %v1915_v25  ;;  %v2114_v56 = vmul.f32 %v1915_v25, %v1915_v25  ;;  %vm2187_vm13 = vcmp.ne.s32.totalorder %v2185_v23, %v4276_v53 }
 0x2c3   :  { %v2118_v16 = vsel %vm1744_vm1, %v2114_v56, 0.0 }
 0x2c4   :  { %2119 = vadd.xlane.f32.xlu1 %v2118_v16  ;;  %v2186_v16 = vadd.s32 8, %v2185_v23 }
 0x2c6   :  { %vm2188_vm14 = vcmp.ne.s32.totalorder %v2186_v16, %v4276_v53 }
 0x2dd   :  { %2197 = vperm.xlu1 %2433, %v4272_v46  }
 0x32f   :  { %v2117_v36 = vpop.xlane.xlu2 %2116 }
 0x330   :  { %v2121_v52 = vadd.f32 1e-12, %v2117_v36 }
 0x332   :  { %2445 = vrsqrt.f32 %v2121_v52  ;;  %vm2129_vm11 = vweird.f32 %v2121_v52 }
 0x337   :  { %v2120_v31 = vpop.xlane.xlu1 %2119 }
 0x338   :  { %v2446_v47 = vpop.eup %2445  ;;  %v2122_v48 = vadd.f32 1e-12, %v2120_v31 }
 0x339   :  { %v2124_v4 = vmul.f32 %v2446_v47, %v2121_v52  ;;  %vm2130_vm8 = vweird.f32 %v2446_v47  ;;  %v2500_v52 = vmov 0.0  }
 0x33a   :  { %2447 = vrsqrt.f32 %v2122_v48  ;;  %vm2139_vm9 = vweird.f32 %v2122_v48  ;;  %vm2131_vm12 = vmor %vm2129_vm11, %vm2130_vm8  ;;  %v2412_v31 = vsel %vm2187_vm13, 1.0, %v2500_v52  ;;  %v2413_v20 = vsel %vm2188_vm14, 1.0, %v2500_v52 }
 0x33b   :  { %v2125_v2 = vmul.f32 %v2446_v47, %v2124_v4 }
 0x33c   :  { %v1947_v35 = vpop.f32.mrf.mxu3 }
 0x33d   :  { %v4288_v14 = vadd.f32 %v2443_v28, %v1947_v35  ;;  %v2126_v34 = vmul.f32 0.5, %v2125_v2 }
 0x33f   :  { %1954 = vst.msk [vmem:[%s4427_s12] sm:$0xff] %vm1953_vm4, %v4288_v14  ;;  %v4298_v33 = vsel %vm4283_vm5, %v4288_v14, -1e+30  ;;  %v1963_v9 = vsel %vm1961_vm6, %v4288_v14, -1e+30  ;;  %v2127_v51 = vsub.f32 1.5, %v2126_v34 }
 0x340   :  { %v2448_v43 = vpop.eup %2447  ;;  %v2042_v22 = vsel %vm1953_vm4, %v4298_v33, -inf  ;;  %v1965_v58 = vsel %vm1953_vm4, %v1963_v9, -inf  ;;  %v2035_v34 = vld [vmem:[%s4425_s10] sm:$0xff] }
 0x341   :  { %v2134_v45 = vmul.f32 %v2448_v43, %v2122_v48  ;;  %2043 = vmax.xlane.f32.xlu0 %v2042_v22  ;;  %1966 = vmax.xlane.f32.xlu1 %v1965_v58  ;;  %vm2140_vm7 = vweird.f32 %v2448_v43  ;;  %v2128_v39 = vmul.f32 %v2446_v47, %v2127_v51  ;;  %v2036_v22 = vld [vmem:[%s4425_s10 + $0x8] sm:$0xff] }
 0x342   :  { %vm2141_vm10 = vmor %vm2139_vm9, %vm2140_vm7  ;;  %v2067_v58 = vadd.s32 5, %v2036_v22 }
 0x343   :  { %v2135_v40 = vmul.f32 %v2448_v43, %v2134_v45  ;;  %v2132_v38 = vsel %vm2131_vm12, %v2446_v47, %v2128_v39  ;;  %v2066_v45 = vadd.s32 5, %v2035_v34 }
 0x344   :  { %v1950_v15 = vpop.f32.mrf.mxu3  ;;  %v2143_v18 = vmul.f32 %v2132_v38, %v4260_v42 }
 0x345   :  { %v2136_v60 = vmul.f32 0.5, %v2135_v40  ;;  %v4306_v17 = vadd.f32 %v2443_v28, %v1950_v15 }
 0x347   :  { %v2137_v44 = vsub.f32 1.5, %v2136_v60  ;;  %1955 = vst.msk [vmem:[%s4427_s12 + $0x8] sm:$0xff] %vm1953_vm4, %v4306_v17  ;;  %v2041_v55 = vsel %vm4283_vm5, %v4306_v17, -1e+30  ;;  %v4319_v49 = vsel %vm1961_vm6, %v4306_v17, -1e+30 }
 0x348   :  { %v2045_v12 = vsel %vm1953_vm4, %v2041_v55, -inf  ;;  %v1968_v24 = vsel %vm1953_vm4, %v4319_v49, -inf }
 0x349   :  { %v2138_v7 = vmul.f32 %v2448_v43, %v2137_v44  ;;  %2046 = vmax.xlane.f32.xlu1 %v2045_v12  ;;  %1969 = vmax.xlane.f32.xlu2 %v1968_v24 }
 0x34b   :  { %v2142_v13 = vsel %vm2141_vm10, %v2448_v43, %v2138_v7 }
 0x34c   :  { %v2144_v27 = vmul.f32 %v2142_v13, %v1915_v25 }
 0x34e   :  { %2408 = vmatpush.xpose.msk.msra.mxu1 %vm1744_vm1, %v2144_v27 }
 0x34f   :  { %v4332_v37 = vpop.permute.xlu1 %2197 }
 0x352   :  { %2409 = vmatpush.xpose.msk.msra.mxu1 %vm1744_vm1, %v2143_v18 }
 0x355   :  { %2410 = vmatmul.msk.f32.vlgmr.msra.gmra.mxu1 %vm1744_vm1, %v2143_v18 }
 0x35d   :  { %2411 = vmatmul.msk.f32.gmra.mxu1 %vm1744_vm1, %v2144_v27 }
 0x362   :  { %1993 = vperm.xlu1 %2433, %v1959_v57  }
 0x3b4   :  { %v4334_v5 = vpop.xlane.xlu1 %1966  ;;  %v4345_v11 = vpop.xlane.xlu0 %2043 }
 0x3b5   :  { %v1971_v21 = vsub.f32 %v1963_v9, %v4334_v5  ;;  %v2048_v40 = vsub.f32 %v4298_v33, %v4345_v11 }
 0x3b7   :  { %v1973_v62 = vmul.f32 1.442695, %v1971_v21  ;;  %v2050_v15 = vmul.f32 1.442695, %v2048_v40 }
 0x3b9   :  { %2449 = vpow2.f32 %v1973_v62 }
 0x3bc   :  { %v4337_v10 = vpop.xlane.xlu1 %2046  ;;  %v4347_v54 = vpop.xlane.xlu2 %1969 }
 0x3bd   :  { %v2049_v1 = vsub.f32 %v2041_v55, %v4337_v10  ;;  %v1972_v51 = vsub.f32 %v4319_v49, %v4347_v54  ;;  %v2444_v55 = vld [vmem:[%s4426_s11] ss:$0 sm:$0xff] }
 0x3be   :  { %vm2203_vm2 = vcmp.eq.s32.totalorder %v4332_v37, %v2444_v55 }
 0x3bf   :  { %v2450_v32 = vpop.eup %2449  ;;  %v2052_v26 = vmul.f32 1.442695, %v2049_v1  ;;  %v1975_v60 = vmul.f32 1.442695, %v1972_v51  ;;  %v2414_v13 = vsel %vm2203_vm2, 1.0, %v2500_v52 }
 0x3c0   :  { %v1977_v30 = vsel %vm1953_vm4, %v2450_v32, 0.0  ;;  %v2209_v18 = vmul.f32 %v2414_v13, %v2412_v31 }
 0x3c1   :  { %2451 = vpow2.f32 %v2052_v26  ;;  %1978 = vadd.xlane.f32.xlu1 %v1977_v30 }
 0x3c7   :  { %v2452_v8 = vpop.eup %2451 }
 0x3c8   :  { %v2057_v61 = vsel %vm1953_vm4, %v2452_v8, 0.0 }
 0x3c9   :  { %2058 = vadd.xlane.f32.xlu1 %v2057_v61 }
 0x3d2   :  { %v2168_v29 = vpop.f32.mrf.mxu1 }
 0x3d3   :  { %v2174_v63 = vmul.f32 14.285714, %v2168_v29 }
 0x3d4   :  { %v1994_v27 = vpop.permute.xlu1 %1993 }
 0x3d5   :  { %v2176_v19 = vsel %vm1146_vm0, %v2174_v63, -inf  ;;  %vm1996_vm3 = vcmp.eq.s32.totalorder %v4276_v53, %v1994_v27 }
 0x3d6   :  { %2177 = vmax.xlane.f32.xlu0 %v2176_v19  ;;  %v2405_v21 = vsel %vm1996_vm3, 1.0, %v2500_v52 }
 0x3d7   :  { %v2002_v37 = vmul.f32 %v2405_v21, %v4306_v17 }
 0x3d9   :  { %v2006_v62 = vsel %vm1953_vm4, %v2002_v37, 0.0 }
 0x3da   :  { %v2171_v3 = vpop.f32.mrf.mxu1 }
 0x3db   :  { %v2175_v50 = vmul.f32 14.285714, %v2171_v3 }
 0x3dd   :  { %v2179_v42 = vsel %vm1146_vm0, %v2175_v50, -inf }
 0x3de   :  { %2180 = vmax.xlane.f32.xlu2 %v2179_v42 }
 0x3ea   :  { %1990 = vperm.xlu0 %2432, %v4272_v46  }
 0x3f6   :  { %2200 = vperm.xlu2 %2434, %v1959_v57   ;;  %v2229_v57 = vsel %vm1146_vm0, %v2209_v18, 0.0 }
 0x449   :  { %v2178_v59 = vpop.xlane.xlu0 %2177 }
 0x44a   :  { %v4349_v0 = vsub.f32 %v2174_v63, %v2178_v59 }
 0x44c   :  { %v2211_v41 = vmul.f32 1.442695, %v4349_v0 }
 0x44e   :  { %2453 = vpow2.f32 %v2211_v41 }
 0x451   :  { %v2181_v25 = vpop.xlane.xlu2 %2180 }
 0x452   :  { %v4354_v56 = vsub.f32 %v2175_v50, %v2181_v25 }
 0x454   :  { %v2454_v46 = vpop.eup %2453  ;;  %v2213_v36 = vmul.f32 1.442695, %v4354_v56 }
 0x455   :  { %v2215_v47 = vmul.f32 %v2454_v46, %v2412_v31 }
 0x456   :  { %2455 = vpow2.f32 %v2213_v36  ;;  %v1979_v36 = vpop.xlane.xlu1 %1978 }
 0x457   :  { %v2217_v48 = vsel %vm1146_vm0, %v2215_v47, 0.0  ;;  %2457 = vpow2.f32 %v2050_v15 }
 0x458   :  { %2218 = vadd.xlane.f32.xlu2 %v2217_v48  ;;  %2459 = vpow2.f32 %v1975_v60 }
 0x459   :  { %v2201_v44 = vpop.permute.xlu2 %2200 }
 0x45a   :  { %vm2204_vm1 = vcmp.eq.s32.totalorder %v2201_v44, %v2444_v55 }
 0x45b   :  { %v2415_v39 = vsel %vm2204_vm1, 1.0, %v2500_v52 }
 0x45c   :  { %v2456_v4 = vpop.eup %2455  ;;  %v1991_v28 = vpop.permute.xlu0 %1990  ;;  %v2210_v7 = vmul.f32 %v2415_v39, %v2413_v20 }
 0x45d   :  { %vm1995_vm15 = vcmp.eq.s32.totalorder %v4276_v53, %v1991_v28  ;;  %v2216_v35 = vmul.f32 %v2456_v4, %v2413_v20  ;;  %v2458_v12 = vpop.eup %2457 }
 0x45e   :  { %v2404_v6 = vsel %vm1995_vm15, 1.0, %v2500_v52  ;;  %v2054_v24 = vsel %vm1953_vm4, %v2458_v12, 0.0  ;;  %v2460_v33 = vpop.eup %2459  ;;  %v2232_v38 = vsel %vm1146_vm0, %v2210_v7, 0.0  ;;  %v2059_v47 = vpop.xlane.xlu1 %2058 }
 0x45f   :  { %v2220_v2 = vsel %vm1146_vm0, %v2216_v35, 0.0  ;;  %v2001_v9 = vmul.f32 %v2404_v6, %v4288_v14  ;;  %v1980_v49 = vsel %vm1953_vm4, %v2460_v33, 0.0 }
 0x460   :  { %2221 = vadd.xlane.f32.xlu0 %v2220_v2 }
 0x461   :  { %v2003_v43 = vsel %vm1953_vm4, %v2001_v9, 0.0 }
 0x462   :  { %2004 = vadd.xlane.f32.xlu1 %v2003_v43 }
 0x470   :  { %2072 = vperm.xlu2 %2434, %v2067_v58  }
 0x474   :  { %2069 = vperm.xlu0 %2432, %v2066_v45  }
 0x499   :  { %2055 = vadd.xlane.f32.xlu2 %v2054_v24 }
 0x49e   :  { %1981 = vadd.xlane.f32.xlu0 %v1980_v49 }
 0x4a1   :  { %2233 = vadd.xlane.f32.xlu2 %v2232_v38 }
 0x4a6   :  { %2230 = vadd.xlane.f32.xlu0 %v2229_v57 }
 0x4ae   :  { %2007 = vadd.xlane.f32.xlu0 %v2006_v62  ;;  %v2501_v62 = vmov 16.0  }
 0x4cb   :  { %v2219_v1 = vpop.xlane.xlu2 %2218 }
 0x4cc   :  { %2461 = vlog2.f32 %v2219_v1 }
 0x4d2   :  { %v2462_v32 = vpop.eup %2461 }
 0x4d3   :  { %v2224_v26 = vmul.f32 0.6931472, %v2462_v32  ;;  %v2073_v30 = vpop.permute.xlu2 %2072  ;;  %v2222_v50 = vpop.xlane.xlu0 %2221 }
 0x4d4   :  { %vm2075_vm5 = vcmp.eq.s32.totalorder %v4276_v53, %v2073_v30  ;;  %2463 = vlog2.f32 %v2222_v50 }
 0x4d5   :  { %v2227_v8 = vsub.f32 %v4349_v0, %v2224_v26  ;;  %v2407_v61 = vsel %vm2075_vm5, 1.0, %v2500_v52  ;;  %2465 = vlog2.f32 %v1979_v36 }
 0x4d6   :  { %v2081_v29 = vmul.f32 %v2407_v61, %v4306_v17 }
 0x4d7   :  { %v2237_v63 = vmul.f32 %v2227_v8, %v2209_v18 }
 0x4d8   :  { %v2085_v19 = vsel %vm1953_vm4, %v2081_v29, 0.0 }
 0x4d9   :  { %2086 = vadd.xlane.f32.xlu1 %v2085_v19  ;;  %v2239_v3 = vsel %vm1146_vm0, %v2237_v63, 0.0 }
 0x4da   :  { %2240 = vadd.xlane.f32.xlu0 %v2239_v3  ;;  %v2464_v42 = vpop.eup %2463 }
 0x4db   :  { %v2226_v41 = vmul.f32 0.6931472, %v2464_v42  ;;  %v2466_v48 = vpop.eup %2465 }
 0x4dd   :  { %v2228_v17 = vsub.f32 %v4354_v56, %v2226_v41 }
 0x4df   :  { %v2238_v16 = vmul.f32 %v2228_v17, %v2210_v7 }
 0x4e1   :  { %v2242_v46 = vsel %vm1146_vm0, %v2238_v16, 0.0 }
 0x4e6   :  { %v2070_v59 = vpop.permute.xlu0 %2069 }
 0x4e7   :  { %vm2074_vm6 = vcmp.eq.s32.totalorder %v4276_v53, %v2070_v59 }
 0x4e8   :  { %v2406_v0 = vsel %vm2074_vm6, 1.0, %v2500_v52  ;;  %v1984_v52 = vmul.f32 0.6931472, %v2466_v48 }
 0x4e9   :  { %v2080_v23 = vmul.f32 %v2406_v0, %v4288_v14  ;;  %v2005_v14 = vpop.xlane.xlu1 %2004 }
 0x4ea   :  { %v1987_v56 = vadd.f32 %v1984_v52, %v4334_v5 }
 0x4eb   :  { %v2082_v25 = vsel %vm1953_vm4, %v2080_v23, 0.0  ;;  %vm2011_vm4 = vcmask 7168  }
 0x4ec   :  { %2083 = vadd.xlane.f32.xlu2 %v2082_v25  ;;  %v2009_v28 = vsub.f32 %v1987_v56, %v2005_v14 }
 0x4ee   :  { %v2012_v9 = vsel %vm2011_vm4, %v2009_v28, 0.0 }
 0x4f4   :  { %2243 = vadd.xlane.f32.xlu2 %v2242_v46 }
 0x50c   :  { %v2056_v58 = vpop.xlane.xlu2 %2055 }
 0x511   :  { %v1982_v31 = vpop.xlane.xlu0 %1981 }
 0x512   :  { %2467 = vlog2.f32 %v1982_v31 }
 0x513   :  { %2469 = vlog2.f32 %v2059_v47 }
 0x514   :  { %2471 = vlog2.f32 %v2056_v58  ;;  %v2234_v40 = vpop.xlane.xlu2 %2233 }
 0x515   :  { %v2236_v44 = vmax.f32 %v2234_v40, 1.0 }
 0x518   :  { %v2468_v53 = vpop.eup %2467 }
 0x519   :  { %v2231_v20 = vpop.xlane.xlu0 %2230  ;;  %v1986_v4 = vmul.f32 0.6931472, %v2468_v53  ;;  %v2470_v34 = vpop.eup %2469 }
 0x51a   :  { %v2472_v45 = vpop.eup %2471  ;;  %v2063_v15 = vmul.f32 0.6931472, %v2470_v34  ;;  %v2235_v51 = vmax.f32 %v2231_v20, 1.0 }
 0x51b   :  { %v1988_v35 = vadd.f32 %v1986_v4, %v4347_v54  ;;  %v2061_v5 = vmul.f32 0.6931472, %v2472_v45 }
 0x51c   :  { %v2065_v54 = vadd.f32 %v2063_v15, %v4337_v10  ;;  %2473 = vrcp.f32 %v2235_v51 }
 0x51d   :  { %v2064_v12 = vadd.f32 %v2061_v5, %v4345_v11  ;;  %2475 = vrcp.f32 %v2236_v44 }
 0x51e   :  { %2477 = vrcp.f32 %v2501_v62 }
 0x521   :  { %v2008_v6 = vpop.xlane.xlu0 %2007 }
 0x522   :  { %v2010_v2 = vsub.f32 %v1988_v35, %v2008_v6  ;;  %v2474_v27 = vpop.eup %2473 }
 0x523   :  { %v2476_v18 = vpop.eup %2475 }
 0x524   :  { %v2013_v43 = vsel %vm2011_vm4, %v2010_v2, 0.0  ;;  %v2478_v1 = vpop.eup %2477 }
 0x525   :  { %v2014_v22 = vadd.f32 %v2013_v43, %v2012_v9  ;;  %v2025_v32 = vmul.f32 16.0, %v2478_v1  ;;  %vm2029_vm0 = vweird.f32 %v2478_v1 }
 0x527   :  { %2015 = vadd.xlane.f32.xlu1 %v2014_v22  ;;  %v2026_v26 = vsub.f32 1.0, %v2025_v32 }
 0x529   :  { %v2027_v29 = vmul.f32 %v2478_v1, %v2026_v26 }
 0x52b   :  { %v2028_v3 = vadd.f32 %v2478_v1, %v2027_v29 }
 0x52d   :  { %v2030_v59 = vsel %vm2029_vm0, %v2478_v1, %v2028_v3 }
 0x54c   :  { %v2087_v60 = vpop.xlane.xlu1 %2086 }
 0x54d   :  { %v2089_v55 = vsub.f32 %v2065_v54, %v2087_v60  ;;  %v2241_v49 = vpop.xlane.xlu0 %2240 }
 0x54e   :  { %v2247_v38 = vmul.f32 %v2474_v27, %v2241_v49 }
 0x54f   :  { %v2091_v7 = vsel %vm2011_vm4, %v2089_v55, 0.0 }
 0x550   :  { %v2249_v21 = vsel %vm2011_vm4, %v2247_v38, 0.0 }
 0x55f   :  { %v2084_v24 = vpop.xlane.xlu2 %2083 }
 0x560   :  { %v2088_v39 = vsub.f32 %v2064_v12, %v2084_v24 }
 0x562   :  { %v2090_v33 = vsel %vm2011_vm4, %v2088_v39, 0.0 }
 0x563   :  { %v2092_v13 = vadd.f32 %v2091_v7, %v2090_v33 }
 0x565   :  { %2093 = vadd.xlane.f32.xlu0 %v2092_v13 }
 0x567   :  { %v2244_v57 = vpop.xlane.xlu2 %2243 }
 0x568   :  { %v2248_v10 = vmul.f32 %v2476_v18, %v2244_v57 }
 0x56a   :  { %v2250_v11 = vsel %vm2011_vm4, %v2248_v10, 0.0 }
 0x56b   :  { %v2251_v37 = vadd.f32 %v2250_v11, %v2249_v21 }
 0x56d   :  { %2252 = vadd.xlane.f32.xlu2 %v2251_v37 }
 0x59a   :  { %v2016_v30 = vpop.xlane.xlu1 %2015 }
 0x59b   :  { %v2017_v8 = vrot.slane %v2016_v30, 4 }
 0x59d   :  { %v2018_v61 = vadd.f32 %v2017_v8, %v2016_v30 }
 0x59f   :  { %v2019_v63 = vrot.slane %v2018_v61, 2 }
 0x5a1   :  { %v2020_v19 = vadd.f32 %v2019_v63, %v2018_v61 }
 0x5a3   :  { %v2021_v50 = vrot.slane %v2020_v19, 1 }
 0x5a5   :  { %v2022_v42 = vadd.f32 %v2021_v50, %v2020_v19 }
 0x5a7   :  { %2420 = vpush %v2022_v42 }
 0x5a8   :  { %2422 = vpush %v2030_v59 }
 0x5d8   :  { %s2421_s10 = spop %2420  ;;  %v2094_v41 = vpop.xlane.xlu0 %2093 }
 0x5d9   :  { %s2423_s11 = spop %2422  ;;  %v2095_v0 = vrot.slane %v2094_v41, 4 }
 0x5da   :  { %s2032_s20 = smul.f32 %s2423_s11, %s2421_s10 }
 0x5db   :  { %v2096_v23 = vadd.f32 %v2095_v0, %v2094_v41 }
 0x5dc   :  { %2034 = sst [smem:[#allocation2]] %s2032_s20 }
 0x5dd   :  { %v2097_v17 = vrot.slane %v2096_v23, 2 }
 0x5df   :  { %v2098_v25 = vadd.f32 %v2097_v17, %v2096_v23 }
 0x5e0   :  { %v2253_v16 = vpop.xlane.xlu2 %2252 }
 0x5e1   :  { %v2254_v46 = vrot.slane %v2253_v16, 4  ;;  %v2099_v36 = vrot.slane %v2098_v25, 1 }
 0x5e3   :  { %v2255_v31 = vadd.f32 %v2254_v46, %v2253_v16  ;;  %v2100_v47 = vadd.f32 %v2099_v36, %v2098_v25 }
 0x5e5   :  { %v2256_v48 = vrot.slane %v2255_v31, 2  ;;  %2424 = vpush %v2100_v47 }
 0x5e7   :  { %v2257_v53 = vadd.f32 %v2256_v48, %v2255_v31 }
 0x5e9   :  { %v2258_v20 = vrot.slane %v2257_v53, 1 }
 0x5eb   :  { %v2259_v52 = vadd.f32 %v2258_v20, %v2257_v53 }
 0x5ed   :  { %2426 = vpush %v2259_v52 }
 0x616   :  { %s2425_s21 = spop %2424 }
 0x617   :  { %s2110_s5 = smul.f32 %s2425_s21, %s2423_s11 }
 0x619   :  { %2112 = sst [smem:[#allocation2 + $0x1]] %s2110_s5 }
 0x61e   :  { %s2427_s1 = spop %2426 }
 0x61f   :  { %s2269_s24 = smul.f32 %s2427_s1, %s2423_s11 }
 0x621   :  { %s2270_s25 = smul.f32 -1.0, %s2269_s24 }
 0x623   :  { %2272 = sst [smem:[#allocation2 + $0x2]] %s2270_s25 }
 0x624   :  { %2283 = dma.smem_to_vmem %s2502_s26, 16, %s2281_s23, [#allocation3]  }
 0x625   :  { %2497 = dma.done.wait [#allocation3], 16  }
 0x626   :  { %2498 = vsyncadd [#allocation3], 4294967280 }
 0x627   :  { %2290 = sfence }
 0x628   :  { %2291 = vsyncpa [#allocation3], 1 }

</bundles_post_ra>
